<compile_context>
chip_gen: v7x
topology: tpu7x:2x2x1
jax: 0.10.0
libtpu: 0.0.40
codegen_flags: <defaults>
</compile_context>

<pallas_src>
from functools import lru_cache, partial

import jax
import jax.numpy as jnp
from jax.experimental import pallas as pl
from jax.experimental.pallas import tpu as pltpu

BN_EPS = 1e-3
SE_RATIO = 0.25

# EfficientNet-B3 architecture (width 1.2, depth 1.4 applied to the B0 base).
STEM_CH = 40
HEAD_CH = 1536
# (expand_ratio, kernel, stride, out_channels, repeats)
BLOCK_CFG = [
    (1, 3, 1, 24, 2),
    (6, 3, 2, 32, 3),
    (6, 5, 2, 48, 3),
    (6, 3, 2, 96, 5),
    (6, 5, 1, 136, 5),
    (6, 5, 2, 232, 6),
    (6, 3, 1, 384, 2),
]


def _round_up(x, m):
    return -(-x // m) * m


def _default_vmem_limit():
    # v5e/v6e: 128 MiB physical -> 64 MiB scoped; v7x: 64 MiB -> 32 MiB.
    try:
        cap = int(getattr(pltpu.get_tpu_info(), "vmem_capacity_bytes", 0))
        if cap > 0:
            return max(32 * 1024 * 1024, min(96 * 1024 * 1024, cap // 2))
    except Exception:
        pass
    return 32 * 1024 * 1024


VMEM_LIMIT = _default_vmem_limit()


def _cp(dim_sem):
    return pltpu.CompilerParams(
        dimension_semantics=dim_sem,
        vmem_limit_bytes=VMEM_LIMIT,
    )


# ----------------------------------------------------------------------------
# Tile-size heuristics (review item 1/2/3)
# ----------------------------------------------------------------------------
def _choose_tm(m, k):
    """M-tile sized so the bf16 A tile is ~2 MiB, clamped to [512, 4096] rows.
    Returns (tm, padded_m) with padded_m a multiple of tm."""
    m8 = _round_up(m, 8)
    cand = ((2 << 20) // (2 * max(k, 1)) // 256) * 256
    cand = max(512, min(4096, cand))
    if m8 <= cand:
        return m8, m8
    nt = -(-m8 // cand)
    tm = _round_up(-(-m8 // nt), 256)
    return tm, tm * nt


def _choose_tn(n):
    """N-tile for the late large-N matmuls (head / stage-6,7 expand)."""
    if n <= 1024:
        return n
    for tn in (768, 512, 384, 256):
        if n % tn == 0:
            return tn
    return n


def _choose_h_tiling(ho, wo, c):
    """Rows per depthwise H-tile so the f32 accumulator is ~2 MiB.
    Returns (th, n_h) with th * n_h >= ho."""
    cand = max(8, min(64, (2 << 20) // (4 * wo * c)))
    if cand >= ho:
        return ho, 1
    n_h = -(-ho // cand)
    th = -(-ho // n_h)
    return th, n_h


# ----------------------------------------------------------------------------
# Kernel 1: (M,N)-tiled matmul + bias + optional SiLU (expand 1x1 / stem / head)
# ----------------------------------------------------------------------------
def _mm_kernel(a_ref, w_ref, b_ref, o_ref, *, act):
    y = jnp.dot(a_ref[...], w_ref[...], preferred_element_type=jnp.float32)
    y = y + b_ref[...]
    if act:
        y = y * jax.nn.sigmoid(y)                        # SiLU / swish
    o_ref[...] = y.astype(o_ref.dtype)


@lru_cache(maxsize=None)
def _mm_call(mp, k, n, tm, tn, act):
    ce = pl.CostEstimate(
        flops=2 * mp * k * n,
        transcendentals=mp * n if act else 0,
        bytes_accessed=2 * (mp * k + k * n + mp * n) + 4 * n,
    )
    return pl.pallas_call(
        partial(_mm_kernel, act=act),
        out_shape=jax.ShapeDtypeStruct((mp, n), jnp.bfloat16),
        grid=(mp // tm, n // tn),
        in_specs=[
            pl.BlockSpec((tm, k), lambda i, j: (i, 0)),   # A: tiled over M, resident over N
            pl.BlockSpec((k, tn), lambda i, j: (0, j)),   # W: tiled over N
            pl.BlockSpec((1, tn), lambda i, j: (0, j)),   # bias
        ],
        out_specs=pl.BlockSpec((tm, tn), lambda i, j: (i, j)),
        compiler_params=_cp(("parallel", "parallel")),
        cost_estimate=ce,
    )


def matmul_bn(a, w, bias, act):
    m, k = a.shape
    n = int(w.shape[1])
    tm, mp = _choose_tm(m, int(k))
    tn = _choose_tn(n)
    if mp != m:
        a = jnp.pad(a, ((0, mp - m), (0, 0)))
    y = _mm_call(mp, int(k), n, tm, tn, bool(act))(a, w, bias)
    if mp != m:
        y = y[:m]
    return y


def conv1x1_bn(x, w, bias, act):
    nb, h, wd, cin = x.shape
    cout = w.shape[1]
    y = matmul_bn(x.reshape(nb * h * wd, cin), w, bias, act)
    return y.reshape(nb, h, wd, cout)


# ----------------------------------------------------------------------------
# Kernel 2: project 1x1 conv with fused SE gate (f32) + bias + optional residual
#           grid = (batch, M-tiles) so each tile sees a single gate vector
# ----------------------------------------------------------------------------
def _proj_kernel(*refs, has_res):
    if has_res:
        a_ref, g_ref, w_ref, b_ref, r_ref, o_ref = refs
    else:
        a_ref, g_ref, w_ref, b_ref, o_ref = refs
        r_ref = None
    # SE gate applied in f32 (gate is produced in f32 by the depthwise kernel)
    a = (a_ref[...].astype(jnp.float32) * g_ref[0]).astype(jnp.bfloat16)
    y = jnp.dot(a, w_ref[...], preferred_element_type=jnp.float32)
    y = y + b_ref[...]
    if r_ref is not None:
        y = y + r_ref[...].astype(jnp.float32)
    o_ref[...] = y.astype(o_ref.dtype)


@lru_cache(maxsize=None)
def _proj_call(nb, hwp, k, n, tm, has_res):
    mtiles = hwp // tm

    def a_map(b, i):
        return (b * mtiles + i, 0)

    in_specs = [
        pl.BlockSpec((tm, k), a_map),                     # activation tile
        pl.BlockSpec((1, 1, k), lambda b, i: (b, 0, 0)),  # per-batch f32 gate
        pl.BlockSpec((k, n), lambda b, i: (0, 0)),        # weights resident
        pl.BlockSpec((1, n), lambda b, i: (0, 0)),        # bias resident
    ]
    if has_res:
        in_specs.append(pl.BlockSpec((tm, n), a_map))
    ce = pl.CostEstimate(
        flops=2 * nb * hwp * k * n,
        transcendentals=0,
        bytes_accessed=2 * (nb * hwp * k + k * n + nb * hwp * n
                            + (nb * hwp * n if has_res else 0)) + 4 * nb * k,
    )
    return pl.pallas_call(
        partial(_proj_kernel, has_res=has_res),
        out_shape=jax.ShapeDtypeStruct((nb * hwp, n), jnp.bfloat16),
        grid=(nb, mtiles),
        in_specs=in_specs,
        out_specs=pl.BlockSpec((tm, n), a_map),
        compiler_params=_cp(("parallel", "parallel")),
        cost_estimate=ce,
    )


def proj_conv(x, gate, w, bias, residual):
    nb, h, wd, k = x.shape
    n = int(w.shape[1])
    hw = h * wd
    tm, hwp = _choose_tm(hw, int(k))

    a = x.reshape(nb, hw, k)
    if hwp != hw:
        a = jnp.pad(a, ((0, 0), (0, hwp - hw), (0, 0)))
    a = a.reshape(nb * hwp, k)

    args = [a, gate, w, bias]                            # gate is (nb, 1, k) f32
    has_res = residual is not None
    if has_res:
        r = residual.reshape(nb, hw, n)
        if hwp != hw:
            r = jnp.pad(r, ((0, 0), (0, hwp - hw), (0, 0)))
        args.append(r.reshape(nb * hwp, n))

    y = _proj_call(nb, hwp, int(k), n, tm, has_res)(*args)
    y = y.reshape(nb, hwp, n)
    if hwp != hw:
        y = y[:, :hw]
    return y.reshape(nb, h, wd, n)


# ----------------------------------------------------------------------------
# Kernel 3: depthwise KxK conv, H-tiled, fused BN bias + SiLU + SE squeeze
#           + SE FC stack (gate as second output).  Grid = (batch, h_tiles).
#           Stride handled via per-tap (row_base, col) into a phase-decomposed
#           input -> all in-kernel tap loads are sublane-contiguous.
# ----------------------------------------------------------------------------
def _dw_kernel(x_ref, w_ref, b_ref, sw1_ref, sb1_ref, sw2_ref, sb2_ref,
               y_ref, g_ref, pool_ref, *,
               k, th, wo, ho, row_bases, col_bases, need_mask, inv_hw):
    hidx = pl.program_id(1)
    r0 = hidx * th
    c = y_ref.shape[-1]
    w = w_ref[...]                                       # (k, k, c) f32

    acc = jnp.zeros((1, th, wo, c), jnp.float32)
    t = 0
    for kh in range(k):
        for kw in range(k):
            xs = x_ref[:, pl.ds(r0 + row_bases[t], th),
                       pl.ds(col_bases[t], wo), :]
            acc = acc + xs.astype(jnp.float32) * w[kh, kw, :]
            t += 1
    y = acc + b_ref[...]
    y = y * jax.nn.sigmoid(y)                            # SiLU
    y_ref[...] = y.astype(y_ref.dtype)

    # fused SE squeeze: spatial sum, masking the padded output rows
    row_sums = jnp.sum(y, axis=2)                        # (1, th, c)
    if need_mask:
        ridx = jax.lax.broadcasted_iota(jnp.int32, (1, th, 1), 1)
        row_sums = jnp.where(ridx + r0 < ho, row_sums, 0.0)
    psum = jnp.sum(row_sums, axis=1)                     # (1, c)

    @pl.when(hidx == 0)
    def _():
        pool_ref[...] = psum

    @pl.when(hidx > 0)
    def _():
        pool_ref[...] += psum

    # fused SE excite (FC -> SiLU -> FC -> sigmoid) at the last H tile
    @pl.when(hidx == pl.num_programs(1) - 1)
    def _():
        pooled = pool_ref[...] * inv_hw                  # (1, c) f32 mean
        h1 = jnp.dot(pooled, sw1_ref[...], preferred_element_type=jnp.float32)
        h1 = h1 + sb1_ref[...]
        h1 = h1 * jax.nn.sigmoid(h1)
        g = jnp.dot(h1, sw2_ref[...], preferred_element_type=jnp.float32)
        g = g + sb2_ref[...]
        g_ref[...] = jax.nn.sigmoid(g).reshape(1, 1, c)


@lru_cache(maxsize=None)
def _dw_call(nb, hq, wq, c, k, th, n_h, wo, ho, cse, row_bases, col_bases):
    ho_pad = th * n_h
    need_mask = ho_pad > ho
    ce = pl.CostEstimate(
        flops=2 * nb * ho_pad * wo * c * k * k + 4 * nb * c * cse,
        transcendentals=nb * (ho_pad * wo * c + c + cse),
        bytes_accessed=2 * nb * (hq * wq * c + ho_pad * wo * c)
                       + 8 * c * cse + 4 * nb * c,
    )
    kern = partial(_dw_kernel, k=k, th=th, wo=wo, ho=ho,
                   row_bases=row_bases, col_bases=col_bases,
                   need_mask=need_mask, inv_hw=1.0 / float(ho * wo))
    return pl.pallas_call(
        kern,
        out_shape=(jax.ShapeDtypeStruct((nb, ho_pad, wo, c), jnp.bfloat16),
                   jax.ShapeDtypeStruct((nb, 1, c), jnp.float32)),
        grid=(nb, n_h),
        in_specs=[
            pl.BlockSpec((1, hq, wq, c), lambda b, h: (b, 0, 0, 0)),  # resident per image
            pl.BlockSpec((k, k, c), lambda b, h: (0, 0, 0)),
            pl.BlockSpec((1, c), lambda b, h: (0, 0)),
            pl.BlockSpec((c, cse), lambda b, h: (0, 0)),
            pl.BlockSpec((1, cse), lambda b, h: (0, 0)),
            pl.BlockSpec((cse, c), lambda b, h: (0, 0)),
            pl.BlockSpec((1, c), lambda b, h: (0, 0)),
        ],
        out_specs=(pl.BlockSpec((1, th, wo, c), lambda b, h: (b, h, 0, 0)),
                   pl.BlockSpec((1, 1, c), lambda b, h: (b, 0, 0))),
        scratch_shapes=[pltpu.VMEM((1, c), jnp.float32)],
        compiler_params=_cp(("parallel", "arbitrary")),
        cost_estimate=ce,
    )


def tf_same_pad(x, k, s):
    """TensorFlow 'SAME' (possibly asymmetric) padding on NHWC."""
    _, h, w, _ = x.shape

    def pads(size):
        out = -(-size // s)
        total = max((out - 1) * s + k - size, 0)
        return total // 2, total - total // 2

    return jnp.pad(x, ((0, 0), pads(h), pads(w), (0, 0)))


def depthwise_bn_se(x, w, bias, sw1, sb1, sw2, sb2, k, s):
    """Depthwise conv + folded BN + SiLU + fused SE squeeze/excite.
    Returns (activation NHWC bf16, gate (nb,1,c) f32)."""
    nb, h, wd, c = x.shape
    ho, wo = -(-h // s), -(-wd // s)
    th, n_h = _choose_h_tiling(ho, wo, c)
    ho_pad = th * n_h

    xp = tf_same_pad(x, k, s)
    _, hp, wp, _ = xp.shape
    if s == 1:
        hq_need = ho_pad + k - 1
        if hq_need > hp:
            xp = jnp.pad(xp, ((0, 0), (0, hq_need - hp), (0, 0), (0, 0)))
        xq = xp
        row_bases = tuple(kh for kh in range(k) for _ in range(k))
        col_bases = tuple(kw for _ in range(k) for kw in range(k))
    else:
        # de-interleave into 2x2 spatial phases so all tap loads are contiguous
        hp2 = ho_pad + (k - 1) // 2
        wp2 = wo + (k - 1) // 2
        xp = jnp.pad(xp, ((0, 0), (0, 2 * hp2 - hp), (0, 2 * wp2 - wp), (0, 0)))
        xq = xp.reshape(nb, hp2, 2, wp2, 2, c)
        xq = jnp.transpose(xq, (0, 2, 4, 1, 3, 5)).reshape(nb, 4 * hp2, wp2, c)
        row_bases = tuple(((kh % 2) * 2 + (kw % 2)) * hp2 + kh // 2
                          for kh in range(k) for kw in range(k))
        col_bases = tuple(kw // 2 for _ in range(k) for kw in range(k))

    hq, wq = int(xq.shape[1]), int(xq.shape[2])
    cse = int(sw1.shape[1])
    y, gate = _dw_call(nb, hq, wq, int(c), k, th, n_h, wo, ho, cse,
                       row_bases, col_bases)(xq, w, bias, sw1, sb1, sw2, sb2)
    if ho_pad != ho:
        y = y[:, :ho]
    return y, gate


# ----------------------------------------------------------------------------
# Stem: 3x3 stride-2 conv via im2col + tiled matmul
# TODO(synk): stem im2col still materializes patches in HBM (stem is <1% FLOPs).
# ----------------------------------------------------------------------------
def conv_stem(x, wm, bias, k, s):
    nb, h, wd, cin = x.shape
    xp = tf_same_pad(x, k, s)
    ho, wo = -(-h // s), -(-wd // s)
    cols = []
    for kh in range(k):
        for kw in range(k):
            cols.append(xp[:, kh:kh + (ho - 1) * s + 1:s,
                           kw:kw + (wo - 1) * s + 1:s, :])
    patches = jnp.concatenate(cols, axis=-1)             # (nb, ho, wo, k*k*cin)
    cout = wm.shape[-1]
    a = patches.reshape(nb * ho * wo, k * k * cin)
    y = matmul_bn(a, wm, bias, act=True)
    return y.reshape(nb, ho, wo, cout)


# ----------------------------------------------------------------------------
# MBConv block
# ----------------------------------------------------------------------------
def block_forward(x, p, in_ch, exp, k, stride, out_ch):
    shortcut = x
    if exp != 1:
        x = conv1x1_bn(x, p["pw_w"], p["pw_b"], act=True)          # expand
    x, gate = depthwise_bn_se(x, p["dw_w"], p["dw_b"],
                              p["se_w1"], p["se_b1"], p["se_w2"], p["se_b2"],
                              k=k, s=stride)
    use_res = (stride == 1 and in_ch == out_ch)
    x = proj_conv(x, gate, p["proj_w"], p["proj_b"],               # project
                  shortcut if use_res else None)
    return x


# ----------------------------------------------------------------------------
# Deterministic synthetic parameter init (BN scale folded into weights)
# ----------------------------------------------------------------------------
class RngSeq:
    def __init__(self, seed):
        self._key = jax.random.PRNGKey(seed)

    def __call__(self):
        self._key, sub = jax.random.split(self._key)
        return sub


def init_bn(c, rngs):
    gamma = 1.0 + 0.1 * jax.random.normal(rngs(), (c,), jnp.float32)
    beta = 0.02 * jax.random.normal(rngs(), (c,), jnp.float32)
    mean = jnp.zeros((c,), jnp.float32)
    var = jnp.ones((c,), jnp.float32)
    scale = gamma / jnp.sqrt(var + BN_EPS)
    bias = beta - mean * scale
    return scale, bias.reshape(1, c)


def init_conv(shape, rngs, fan_in):
    return (jax.random.normal(rngs(), shape, jnp.float32) /
            jnp.sqrt(float(fan_in))).astype(jnp.float32)


def init_block(rngs, in_ch, exp, k, out_ch):
    mid = in_ch * exp
    se_ch = max(1, int(in_ch * SE_RATIO))
    p = {}
    if exp != 1:
        w = init_conv((in_ch, mid), rngs, in_ch)
        sc, b = init_bn(mid, rngs)
        p["pw_w"] = (w * sc[None, :]).astype(jnp.bfloat16)
        p["pw_b"] = b
    w = init_conv((k, k, mid), rngs, k * k)
    sc, b = init_bn(mid, rngs)
    p["dw_w"] = w * sc[None, None, :]                    # f32 (VPU path)
    p["dw_b"] = b
    p["se_w1"] = init_conv((mid, se_ch), rngs, mid)
    p["se_b1"] = 0.01 * jax.random.normal(rngs(), (1, se_ch), jnp.float32)
    p["se_w2"] = init_conv((se_ch, mid), rngs, se_ch)
    p["se_b2"] = 0.01 * jax.random.normal(rngs(), (1, mid), jnp.float32)
    w = init_conv((mid, out_ch), rngs, mid)
    sc, b = init_bn(out_ch, rngs)
    p["proj_w"] = (w * sc[None, :]).astype(jnp.bfloat16)
    p["proj_b"] = b
    return p


def init_params(seed=0):
    rngs = RngSeq(seed)
    params = {}
    w = init_conv((3, 3, 3, STEM_CH), rngs, 3 * 3 * 3)
    sc, b = init_bn(STEM_CH, rngs)
    params["stem_w"] = (w * sc[None, None, None, :]).reshape(
        3 * 3 * 3, STEM_CH).astype(jnp.bfloat16)
    params["stem_b"] = b
    blocks = []
    in_ch = STEM_CH
    for exp, k, s, out_ch, rep in BLOCK_CFG:
        stage = []
        for i in range(rep):
            stride = s if i == 0 else 1
            bp = init_block(rngs, in_ch, exp, k, out_ch)
            stage.append((bp, in_ch, exp, k, stride, out_ch))
            in_ch = out_ch
        blocks.append(stage)
    params["blocks"] = blocks
    w = init_conv((in_ch, HEAD_CH), rngs, in_ch)
    sc, b = init_bn(HEAD_CH, rngs)
    params["head_w"] = (w * sc[None, :]).astype(jnp.bfloat16)
    params["head_b"] = b
    return params


# ----------------------------------------------------------------------------
# forward_features
# ----------------------------------------------------------------------------
def forward_features(params, x_nchw):
    x = jnp.transpose(x_nchw, (0, 2, 3, 1)).astype(jnp.bfloat16)   # NCHW->NHWC
    x = conv_stem(x, params["stem_w"], params["stem_b"], k=3, s=2)
    for stage in params["blocks"]:
        for bp, in_ch, exp, k, stride, out_ch in stage:
            x = block_forward(x, bp, in_ch, exp, k, stride, out_ch)
    x = conv1x1_bn(x, params["head_w"], params["head_b"], act=True)
    return jnp.transpose(x.astype(jnp.float32), (0, 3, 1, 2))      # NHWC->NCHW


if __name__ == "__main__":
    params = init_params(seed=0)
    key = jax.random.PRNGKey(0)
    x = jax.random.normal(key, (2, 3, 64, 64), jnp.float32)        # small input
    out = forward_features(params, x)
    out = jax.block_until_ready(out)
    assert out.shape == (2, HEAD_CH, 2, 2), out.shape
    assert bool(jnp.all(jnp.isfinite(out)))
    print("KERNEL_OK")
</pallas_src>

<mosaic_0001>
module attributes {stable_mosaic.version = 11 : i64} {
  func.func @_mm_kernel(%arg0: i32, %arg1: i32, %arg2: memref<2048x27xbf16, #tpu.memory_space<vmem>>, %arg3: memref<27x40xbf16, #tpu.memory_space<vmem>>, %arg4: memref<1x40xf32, #tpu.memory_space<vmem>>, %arg5: memref<2048x40xbf16, #tpu.memory_space<vmem>>) attributes {dimension_semantics = [#tpu.dimension_semantics<parallel>, #tpu.dimension_semantics<parallel>], iteration_bounds = array<i64: 1, 1>, scalar_prefetch = 0 : i64, scratch_operands = 0 : i64, tpu.core_type = #tpu.core_type<tc>, window_params = [{transform_indices = @transform_0, window_bounds = array<i64: 2048, 27>}, {transform_indices = @transform_1, window_bounds = array<i64: 27, 40>}, {transform_indices = @transform_2, window_bounds = array<i64: 1, 40>}, {transform_indices = @transform_3, window_bounds = array<i64: 2048, 40>}]} {
    %c0 = arith.constant 0 : index
    %c0_0 = arith.constant 0 : index
    %0 = vector.load %arg2[%c0, %c0_0] : memref<2048x27xbf16, #tpu.memory_space<vmem>>, vector<2048x27xbf16>
    %c0_1 = arith.constant 0 : index
    %c0_2 = arith.constant 0 : index
    %1 = vector.load %arg3[%c0_1, %c0_2] : memref<27x40xbf16, #tpu.memory_space<vmem>>, vector<27x40xbf16>
    %cst = arith.constant dense<0.000000e+00> : vector<2048x40xf32>
    %2 = tpu.matmul %0, %1, %cst {dimension_numbers = #tpu.dot_dimension_numbers<[1], [0], [0], [1], [0, 0, 1, 1], [], []>} : vector<2048x27xbf16>, vector<27x40xbf16>, vector<2048x40xf32> -> vector<2048x40xf32>
    %c0_3 = arith.constant 0 : index
    %c0_4 = arith.constant 0 : index
    %3 = vector.load %arg4[%c0_3, %c0_4] : memref<1x40xf32, #tpu.memory_space<vmem>>, vector<1x40xf32>
    %4 = vector.broadcast %3 : vector<1x40xf32> to vector<2048x40xf32>
    %5 = arith.addf %2, %4 : vector<2048x40xf32>
    %6 = arith.negf %5 : vector<2048x40xf32>
    %7 = math.exp %6 : vector<2048x40xf32>
    %cst_5 = arith.constant 1.000000e+00 : f32
    %8 = vector.broadcast %cst_5 : f32 to vector<2048x40xf32>
    %9 = arith.addf %8, %7 : vector<2048x40xf32>
    %10 = arith.divf %8, %9 : vector<2048x40xf32>
    %11 = arith.mulf %5, %10 : vector<2048x40xf32>
    %12 = arith.truncf %11 : vector<2048x40xf32> to vector<2048x40xbf16>
    %c0_6 = arith.constant 0 : index
    %c0_7 = arith.constant 0 : index
    %13 = vector.load %arg5[%c0_6, %c0_7] : memref<2048x40xbf16, #tpu.memory_space<vmem>>, vector<2048x40xbf16>
    tpu.vector_store %arg5[%c0_6, %c0_7], %12 {strides = array<i32>} : memref<2048x40xbf16, #tpu.memory_space<vmem>>, vector<2048x40xbf16>,
    return
  }
  func.func @transform_0(%arg0: i32, %arg1: i32) -> (i32, i32) {
    %c0_i32 = arith.constant 0 : i32
    %c0_i32_0 = arith.constant 0 : i32
    return %arg0, %c0_i32 : i32, i32
  }
  func.func @transform_1(%arg0: i32, %arg1: i32) -> (i32, i32) {
    %c0_i32 = arith.constant 0 : i32
    %c0_i32_0 = arith.constant 0 : i32
    return %c0_i32, %arg1 : i32, i32
  }
  func.func @transform_2(%arg0: i32, %arg1: i32) -> (i32, i32) {
    %c0_i32 = arith.constant 0 : i32
    %c0_i32_0 = arith.constant 0 : i32
    return %c0_i32, %arg1 : i32, i32
  }
  func.func @transform_3(%arg0: i32, %arg1: i32) -> (i32, i32) {
    %c0_i32 = arith.constant 0 : i32
    return %arg0, %arg1 : i32, i32
  }
}

</mosaic_0001>

<bundles_post_ra>
// kernel: tpu_custom_call.1
= control target key start
LH: loop header
LB: loop body
LE: loop exit
PB: predicated region body
PF: predicated region fallthrough
CT: control target
= control target key end

     0   :  { %vm1318_vm0 = vcmask 1044480   ;;  %vm1319_vm1 = vcmask 1045504   ;;  %vm933_vm2 = vcmask 220160   ;;  %v8040_v1 = vmov 65535   ;;  %s11610_s1 = inlined_call_operand.vmem [shape: bf16[27,40], index: 1, kind: input, shape index: {}]   ;;  %s11611_s0 = inlined_call_operand.vmem [shape: bf16[2048,27], index: 0, kind: input, shape index: {}]   ;;  %s11612_s2 = inlined_call_operand.vmem [shape: f32[1,40], index: 2, kind: input, shape index: {}]   ;;  %s11613_s3 = inlined_call_operand.vmem [shape: bf16[2048,40], index: 3, kind: output, shape index: {}]  }
   0x1   :  { %v6881_v0 = vld [vmem:[%s11610_s1] sm:$0xff]   ;;  %v1320_v2 = vsel %vm1318_vm0, 4294967295, %v8040_v1  ;;  %v6882_v3 = vld [vmem:[%s11610_s1 + $0x8] sm:$0x3f]   ;;  %v6887_v10 = vld [vmem:[%s11611_s0 + $0x10] sm:$0xff]   ;;  %vm5198_vm3 = vcmask 322560  }
   0x2   :  { %6616 = vmatprep.subr.bf16.mxu0 %v6881_v0  ;;  %6876 = vmatprep.subr.bf16.mxu1 %v6881_v0  ;;  %v1321_v4 = vsel %vm1319_vm1, %v1320_v2, 0  ;;  %v6883_v5 = vld [vmem:[%s11611_s0] sm:$0xff]   ;;  %v6885_v8 = vld [vmem:[%s11611_s0 + $0x8] sm:$0xff]   ;;  %v6888_v11 = vld [vmem:[%s11611_s0 + $0x210] sm:$0xff]  }
   0x3   :  { %6617 = vmatpush3.bf16.msra.mxu0 %v6881_v0  ;;  %6878 = vmatpush3.bf16.msra.mxu1 %v6881_v0  ;;  %v1323_v6 = vand.u32 %v6882_v3, %v1321_v4  ;;  %v6884_v7 = vld [vmem:[%s11611_s0 + $0x200] sm:$0xff]   ;;  %v6886_v9 = vld [vmem:[%s11611_s0 + $0x208] sm:$0xff]   ;;  %v6889_v12 = vld [vmem:[%s11611_s0 + $0x18] sm:$0xff]  }
   0x4   :  { %6620 = vmatprep.mubr.msk.bf16.mxu0 %vm933_vm2, %v6883_v5  ;;  %6748 = vmatprep.mubr.msk.bf16.mxu1 %vm933_vm2, %v6884_v7  ;;  %v6890_v13 = vld [vmem:[%s11611_s0 + $0x218] sm:$0xff]   ;;  %v6891_v14 = vld [vmem:[%s11611_s0 + $0x20] sm:$0xff]   ;;  %v6893_v16 = vld [vmem:[%s11611_s0 + $0x28] sm:$0xff]  }
   0x5   :  { %6618 = vmatprep.subr.bf16.mxu0 %v1323_v6  ;;  %6877 = vmatprep.subr.bf16.mxu1 %v1323_v6  ;;  %v6892_v15 = vld [vmem:[%s11611_s0 + $0x220] sm:$0xff]   ;;  %v6894_v17 = vld [vmem:[%s11611_s0 + $0x228] sm:$0xff]   ;;  %v6895_v18 = vld [vmem:[%s11611_s0 + $0x30] sm:$0xff]  }
   0x6   :  { %v6896_v19 = vld [vmem:[%s11611_s0 + $0x230] sm:$0xff]   ;;  %v6897_v20 = vld [vmem:[%s11611_s0 + $0x38] sm:$0xff]   ;;  %v6899_v22 = vld [vmem:[%s11611_s0 + $0x40] sm:$0xff]  }
   0x7   :  { %6619 = vmatpush3.bf16.msra.mxu0 %v1323_v6  ;;  %6879 = vmatpush3.bf16.msra.mxu1 %v1323_v6  ;;  %v6898_v21 = vld [vmem:[%s11611_s0 + $0x238] sm:$0xff]   ;;  %v6900_v23 = vld [vmem:[%s11611_s0 + $0x240] sm:$0xff]   ;;  %v6901_v24 = vld [vmem:[%s11611_s0 + $0x48] sm:$0xff]  }
   0x8   :  { %v6902_v25 = vld [vmem:[%s11611_s0 + $0x248] sm:$0xff]   ;;  %v6903_v26 = vld [vmem:[%s11611_s0 + $0x50] sm:$0xff]   ;;  %v6905_v28 = vld [vmem:[%s11611_s0 + $0x58] sm:$0xff]  }
   0x9   :  { %v6904_v27 = vld [vmem:[%s11611_s0 + $0x250] sm:$0xff]   ;;  %v6906_v29 = vld [vmem:[%s11611_s0 + $0x258] sm:$0xff]   ;;  %v6907_v30 = vld [vmem:[%s11611_s0 + $0x60] sm:$0xff]  }
   0xa   :  { %6621 = vmatmul.mubr.msk.bf16.vlgmr.msra.gmra.mrb[0].mxu0 %vm933_vm2, %v6885_v8  ;;  %6749 = vmatmul.mubr.msk.bf16.vlgmr.msra.gmra.mrb[0].mxu1 %vm933_vm2, %v6886_v9  ;;  %v6908_v31 = vld [vmem:[%s11611_s0 + $0x260] sm:$0xff]   ;;  %v6909_v32 = vld [vmem:[%s11611_s0 + $0x68] sm:$0xff]   ;;  %v6911_v34 = vld [vmem:[%s11611_s0 + $0x70] sm:$0xff]  }
   0xb   :  { %6624 = vmatprep.mubr.msk.bf16.mxu0 %vm933_vm2, %v6887_v10  ;;  %6752 = vmatprep.mubr.msk.bf16.mxu1 %vm933_vm2, %v6888_v11  ;;  %v6910_v33 = vld [vmem:[%s11611_s0 + $0x268] sm:$0xff]   ;;  %v6912_v35 = vld [vmem:[%s11611_s0 + $0x270] sm:$0xff]   ;;  %v6913_v36 = vld [vmem:[%s11611_s0 + $0x78] sm:$0xff]  }
   0xc   :  { %v6914_v37 = vld [vmem:[%s11611_s0 + $0x278] sm:$0xff]   ;;  %v6915_v38 = vld [vmem:[%s11611_s0 + $0x80] sm:$0xff]   ;;  %v6917_v40 = vld [vmem:[%s11611_s0 + $0x88] sm:$0xff]  }
   0xd   :  { %v6916_v39 = vld [vmem:[%s11611_s0 + $0x280] sm:$0xff]   ;;  %v6918_v41 = vld [vmem:[%s11611_s0 + $0x288] sm:$0xff]   ;;  %v6919_v42 = vld [vmem:[%s11611_s0 + $0x90] sm:$0xff]  }
   0xe   :  { %v6920_v43 = vld [vmem:[%s11611_s0 + $0x290] sm:$0xff]   ;;  %v6921_v44 = vld [vmem:[%s11611_s0 + $0x98] sm:$0xff]   ;;  %v6923_v46 = vld [vmem:[%s11611_s0 + $0xa0] sm:$0xff]  }
   0xf   :  { %v6922_v45 = vld [vmem:[%s11611_s0 + $0x298] sm:$0xff]   ;;  %v6924_v47 = vld [vmem:[%s11611_s0 + $0x2a0] sm:$0xff]   ;;  %v6925_v48 = vld [vmem:[%s11611_s0 + $0xa8] sm:$0xff]  }
  0x10   :  { %v6926_v49 = vld [vmem:[%s11611_s0 + $0x2a8] sm:$0xff]   ;;  %v6927_v50 = vld [vmem:[%s11611_s0 + $0xb0] sm:$0xff]   ;;  %v6929_v52 = vld [vmem:[%s11611_s0 + $0xb8] sm:$0xff]  }
  0x11   :  { %v6928_v51 = vld [vmem:[%s11611_s0 + $0x2b0] sm:$0xff]   ;;  %v6930_v53 = vld [vmem:[%s11611_s0 + $0x2b8] sm:$0xff]   ;;  %v6931_v54 = vld [vmem:[%s11611_s0 + $0xc0] sm:$0xff]  }
  0x12   :  { %6625 = vmatmul.mubr.msk.bf16.gmra.mrb[4].mxu0 %vm933_vm2, %v6889_v12  ;;  %6753 = vmatmul.mubr.msk.bf16.gmra.mrb[4].mxu1 %vm933_vm2, %v6890_v13  ;;  %v6932_v55 = vld [vmem:[%s11611_s0 + $0x2c0] sm:$0xff]   ;;  %v6933_v56 = vld [vmem:[%s11611_s0 + $0xc8] sm:$0xff]   ;;  %v6935_v58 = vld [vmem:[%s11611_s0 + $0xd0] sm:$0xff]  }
  0x13   :  { %6628 = vmatprep.mubr.msk.bf16.mxu0 %vm933_vm2, %v6891_v14  ;;  %6756 = vmatprep.mubr.msk.bf16.mxu1 %vm933_vm2, %v6892_v15  ;;  %v6934_v57 = vld [vmem:[%s11611_s0 + $0x2c8] sm:$0xff]   ;;  %v6936_v59 = vld [vmem:[%s11611_s0 + $0x2d0] sm:$0xff]   ;;  %v6937_v60 = vld [vmem:[%s11611_s0 + $0xd8] sm:$0xff]  }
  0x14   :  { %v6938_v61 = vld [vmem:[%s11611_s0 + $0x2d8] sm:$0xff]   ;;  %v6939_v62 = vld [vmem:[%s11611_s0 + $0xe0] sm:$0xff]   ;;  %v6941_v0 = vld [vmem:[%s11611_s0 + $0xe8] sm:$0xff]  }
  0x15   :  { %v6940_v63 = vld [vmem:[%s11611_s0 + $0x2e0] sm:$0xff]   ;;  %v6942_v1 = vld [vmem:[%s11611_s0 + $0x2e8] sm:$0xff]   ;;  %v6943_v2 = vld [vmem:[%s11611_s0 + $0xf0] sm:$0xff]  }
  0x16   :  { %v6944_v3 = vld [vmem:[%s11611_s0 + $0x2f0] sm:$0xff]   ;;  %v6945_v4 = vld [vmem:[%s11611_s0 + $0xf8] sm:$0xff]   ;;  %v6947_v6 = vld [vmem:[%s11611_s0 + $0x100] sm:$0xff]  }
  0x17   :  { %v6946_v5 = vld [vmem:[%s11611_s0 + $0x2f8] sm:$0xff]   ;;  %v6948_v7 = vld [vmem:[%s11611_s0 + $0x300] sm:$0xff]   ;;  %v6949_v8 = vld [vmem:[%s11611_s0 + $0x108] sm:$0xff]  }
  0x18   :  { %v6950_v9 = vld [vmem:[%s11611_s0 + $0x308] sm:$0xff]   ;;  %v6951_v10 = vld [vmem:[%s11611_s0 + $0x110] sm:$0xff]   ;;  %v6953_v12 = vld [vmem:[%s11611_s0 + $0x118] sm:$0xff]  }
  0x19   :  { %v6952_v11 = vld [vmem:[%s11611_s0 + $0x310] sm:$0xff]   ;;  %v6954_v13 = vld [vmem:[%s11611_s0 + $0x318] sm:$0xff]   ;;  %v6955_v14 = vld [vmem:[%s11611_s0 + $0x120] sm:$0xff]  }
  0x1a   :  { %6629 = vmatmul.mubr.msk.bf16.gmra.mrb[8].mxu0 %vm933_vm2, %v6893_v16  ;;  %6757 = vmatmul.mubr.msk.bf16.gmra.mrb[8].mxu1 %vm933_vm2, %v6894_v17  ;;  %v6956_v15 = vld [vmem:[%s11611_s0 + $0x320] sm:$0xff]   ;;  %v6957_v16 = vld [vmem:[%s11611_s0 + $0x128] sm:$0xff]  }
  0x1b   :  { %6632 = vmatprep.mubr.msk.bf16.mxu0 %vm933_vm2, %v6895_v18  ;;  %6760 = vmatprep.mubr.msk.bf16.mxu1 %vm933_vm2, %v6896_v19  ;;  %v6958_v17 = vld [vmem:[%s11611_s0 + $0x328] sm:$0xff]   ;;  %v6959_v18 = vld [vmem:[%s11611_s0 + $0x130] sm:$0xff]  }
  0x1c   :  { %v6960_v19 = vld [vmem:[%s11611_s0 + $0x330] sm:$0xff]  }
  0x22   :  { %6633 = vmatmul.mubr.msk.bf16.gmra.mrb[12].mxu0 %vm933_vm2, %v6897_v20  ;;  %6761 = vmatmul.mubr.msk.bf16.gmra.mrb[12].mxu1 %vm933_vm2, %v6898_v21  ;;  %v6961_v20 = vld [vmem:[%s11611_s0 + $0x138] sm:$0xff]  }
  0x23   :  { %6636 = vmatprep.mubr.msk.bf16.mxu0 %vm933_vm2, %v6899_v22  ;;  %6764 = vmatprep.mubr.msk.bf16.mxu1 %vm933_vm2, %v6900_v23  ;;  %v6962_v21 = vld [vmem:[%s11611_s0 + $0x338] sm:$0xff]   ;;  %v6963_v22 = vld [vmem:[%s11611_s0 + $0x140] sm:$0xff]  }
  0x24   :  { %v6964_v23 = vld [vmem:[%s11611_s0 + $0x340] sm:$0xff]  }
  0x2a   :  { %6637 = vmatmul.mubr.msk.bf16.gmra.mrb[16].mxu0 %vm933_vm2, %v6901_v24  ;;  %6765 = vmatmul.mubr.msk.bf16.gmra.mrb[16].mxu1 %vm933_vm2, %v6902_v25  ;;  %v6965_v24 = vld [vmem:[%s11611_s0 + $0x148] sm:$0xff]  }
  0x2b   :  { %6640 = vmatprep.mubr.msk.bf16.mxu0 %vm933_vm2, %v6903_v26  ;;  %6768 = vmatprep.mubr.msk.bf16.mxu1 %vm933_vm2, %v6904_v27  ;;  %v6966_v25 = vld [vmem:[%s11611_s0 + $0x348] sm:$0xff]   ;;  %v6967_v26 = vld [vmem:[%s11611_s0 + $0x150] sm:$0xff]  }
  0x2c   :  { %v6968_v27 = vld [vmem:[%s11611_s0 + $0x350] sm:$0xff]  }
  0x32   :  { %6641 = vmatmul.mubr.msk.bf16.gmra.mrb[20].mxu0 %vm933_vm2, %v6905_v28  ;;  %6769 = vmatmul.mubr.msk.bf16.gmra.mrb[20].mxu1 %vm933_vm2, %v6906_v29  ;;  %v6969_v28 = vld [vmem:[%s11611_s0 + $0x158] sm:$0xff]  }
  0x33   :  { %6644 = vmatprep.mubr.msk.bf16.mxu0 %vm933_vm2, %v6907_v30  ;;  %6772 = vmatprep.mubr.msk.bf16.mxu1 %vm933_vm2, %v6908_v31  ;;  %v6970_v29 = vld [vmem:[%s11611_s0 + $0x358] sm:$0xff]   ;;  %v6971_v30 = vld [vmem:[%s11611_s0 + $0x160] sm:$0xff]  }
  0x34   :  { %v6972_v31 = vld [vmem:[%s11611_s0 + $0x360] sm:$0xff]  }
  0x3a   :  { %6645 = vmatmul.mubr.msk.bf16.gmra.mrb[24].mxu0 %vm933_vm2, %v6909_v32  ;;  %6773 = vmatmul.mubr.msk.bf16.gmra.mrb[24].mxu1 %vm933_vm2, %v6910_v33  ;;  %v6973_v32 = vld [vmem:[%s11611_s0 + $0x168] sm:$0xff]  }
  0x3b   :  { %6648 = vmatprep.mubr.msk.bf16.mxu0 %vm933_vm2, %v6911_v34  ;;  %6776 = vmatprep.mubr.msk.bf16.mxu1 %vm933_vm2, %v6912_v35  ;;  %v6974_v33 = vld [vmem:[%s11611_s0 + $0x368] sm:$0xff]   ;;  %v6975_v34 = vld [vmem:[%s11611_s0 + $0x170] sm:$0xff]  }
  0x3c   :  { %v6976_v35 = vld [vmem:[%s11611_s0 + $0x370] sm:$0xff]  }
  0x42   :  { %6649 = vmatmul.mubr.msk.bf16.gmra.mrb[28].mxu0 %vm933_vm2, %v6913_v36  ;;  %6777 = vmatmul.mubr.msk.bf16.gmra.mrb[28].mxu1 %vm933_vm2, %v6914_v37  ;;  %v6977_v36 = vld [vmem:[%s11611_s0 + $0x178] sm:$0xff]  }
  0x43   :  { %6652 = vmatprep.mubr.msk.bf16.mxu0 %vm933_vm2, %v6915_v38  ;;  %6780 = vmatprep.mubr.msk.bf16.mxu1 %vm933_vm2, %v6916_v39  ;;  %v6978_v37 = vld [vmem:[%s11611_s0 + $0x378] sm:$0xff]   ;;  %v6979_v38 = vld [vmem:[%s11611_s0 + $0x180] sm:$0xff]  }
  0x44   :  { %v6980_v39 = vld [vmem:[%s11611_s0 + $0x380] sm:$0xff]  }
  0x4a   :  { %6653 = vmatmul.mubr.msk.bf16.gmra.mrb[32].mxu0 %vm933_vm2, %v6917_v40  ;;  %6781 = vmatmul.mubr.msk.bf16.gmra.mrb[32].mxu1 %vm933_vm2, %v6918_v41  ;;  %v6981_v40 = vld [vmem:[%s11611_s0 + $0x188] sm:$0xff]  }
  0x4b   :  { %6656 = vmatprep.mubr.msk.bf16.mxu0 %vm933_vm2, %v6919_v42  ;;  %6784 = vmatprep.mubr.msk.bf16.mxu1 %vm933_vm2, %v6920_v43  ;;  %v6982_v41 = vld [vmem:[%s11611_s0 + $0x388] sm:$0xff]   ;;  %v6983_v42 = vld [vmem:[%s11611_s0 + $0x190] sm:$0xff]  }
  0x4c   :  { %v6984_v43 = vld [vmem:[%s11611_s0 + $0x390] sm:$0xff]  }
  0x52   :  { %6657 = vmatmul.mubr.msk.bf16.gmra.mrb[36].mxu0 %vm933_vm2, %v6921_v44  ;;  %6785 = vmatmul.mubr.msk.bf16.gmra.mrb[36].mxu1 %vm933_vm2, %v6922_v45  ;;  %v6985_v44 = vld [vmem:[%s11611_s0 + $0x198] sm:$0xff]  }
  0x53   :  { %6660 = vmatprep.mubr.msk.bf16.mxu0 %vm933_vm2, %v6923_v46  ;;  %6788 = vmatprep.mubr.msk.bf16.mxu1 %vm933_vm2, %v6924_v47  ;;  %v6986_v45 = vld [vmem:[%s11611_s0 + $0x398] sm:$0xff]   ;;  %v6987_v46 = vld [vmem:[%s11611_s0 + $0x1a0] sm:$0xff]  }
  0x54   :  { %v6988_v47 = vld [vmem:[%s11611_s0 + $0x3a0] sm:$0xff]  }
  0x5a   :  { %6661 = vmatmul.mubr.msk.bf16.gmra.mrb[40].mxu0 %vm933_vm2, %v6925_v48  ;;  %6789 = vmatmul.mubr.msk.bf16.gmra.mrb[40].mxu1 %vm933_vm2, %v6926_v49  ;;  %v6989_v48 = vld [vmem:[%s11611_s0 + $0x1a8] sm:$0xff]  }
  0x5b   :  { %6664 = vmatprep.mubr.msk.bf16.mxu0 %vm933_vm2, %v6927_v50  ;;  %6792 = vmatprep.mubr.msk.bf16.mxu1 %vm933_vm2, %v6928_v51  ;;  %v6990_v49 = vld [vmem:[%s11611_s0 + $0x3a8] sm:$0xff]   ;;  %v6991_v50 = vld [vmem:[%s11611_s0 + $0x1b0] sm:$0xff]  }
  0x5c   :  { %v6992_v51 = vld [vmem:[%s11611_s0 + $0x3b0] sm:$0xff]  }
  0x62   :  { %6665 = vmatmul.mubr.msk.bf16.gmra.mrb[44].mxu0 %vm933_vm2, %v6929_v52  ;;  %6793 = vmatmul.mubr.msk.bf16.gmra.mrb[44].mxu1 %vm933_vm2, %v6930_v53  ;;  %v8508_v52 = vld [vmem:[%s11612_s2] ss:$0 sm:$0xff] }
  0x63   :  { %6668 = vmatprep.mubr.msk.bf16.mxu0 %vm933_vm2, %v6931_v54  ;;  %6796 = vmatprep.mubr.msk.bf16.mxu1 %vm933_vm2, %v6932_v55 }
  0x6a   :  { %6669 = vmatmul.mubr.msk.bf16.gmra.mrb[48].mxu0 %vm933_vm2, %v6933_v56  ;;  %6797 = vmatmul.mubr.msk.bf16.gmra.mrb[48].mxu1 %vm933_vm2, %v6934_v57 }
  0x6b   :  { %6672 = vmatprep.mubr.msk.bf16.mxu0 %vm933_vm2, %v6935_v58  ;;  %6800 = vmatprep.mubr.msk.bf16.mxu1 %vm933_vm2, %v6936_v59  ;;  %v6993_v59 = vld [vmem:[%s11611_s0 + $0x1b8] sm:$0xff]  }
  0x72   :  { %6673 = vmatmul.mubr.msk.bf16.gmra.mrb[52].mxu0 %vm933_vm2, %v6937_v60  ;;  %6801 = vmatmul.mubr.msk.bf16.gmra.mrb[52].mxu1 %vm933_vm2, %v6938_v61  ;;  %v6994_v60 = vld [vmem:[%s11611_s0 + $0x3b8] sm:$0xff]  }
  0x73   :  { %6676 = vmatprep.mubr.msk.bf16.mxu0 %vm933_vm2, %v6939_v62  ;;  %6804 = vmatprep.mubr.msk.bf16.mxu1 %vm933_vm2, %v6940_v63 }
  0x7a   :  { %6677 = vmatmul.mubr.msk.bf16.gmra.mrb[56].mxu0 %vm933_vm2, %v6941_v0  ;;  %6805 = vmatmul.mubr.msk.bf16.gmra.mrb[56].mxu1 %vm933_vm2, %v6942_v1  ;;  %v6995_v1 = vld [vmem:[%s11611_s0 + $0x1c0] sm:$0xff]  }
  0x7b   :  { %6680 = vmatprep.mubr.msk.bf16.mxu0 %vm933_vm2, %v6943_v2  ;;  %6808 = vmatprep.mubr.msk.bf16.mxu1 %vm933_vm2, %v6944_v3  ;;  %v6996_v2 = vld [vmem:[%s11611_s0 + $0x3c0] sm:$0xff]  }
  0x82   :  { %6681 = vmatmul.mubr.msk.bf16.gmra.mrb[60].mxu0 %vm933_vm2, %v6945_v4  ;;  %6809 = vmatmul.mubr.msk.bf16.gmra.mrb[60].mxu1 %vm933_vm2, %v6946_v5 }
  0x83   :  { %6684 = vmatprep.mubr.msk.bf16.mxu0 %vm933_vm2, %v6947_v6  ;;  %6812 = vmatprep.mubr.msk.bf16.mxu1 %vm933_vm2, %v6948_v7 }
  0x8a   :  { %6685 = vmatmul.mubr.msk.bf16.gmra.mrb[64].mxu0 %vm933_vm2, %v6949_v8  ;;  %6813 = vmatmul.mubr.msk.bf16.gmra.mrb[64].mxu1 %vm933_vm2, %v6950_v9 }
  0x8b   :  { %6688 = vmatprep.mubr.msk.bf16.mxu0 %vm933_vm2, %v6951_v10  ;;  %6816 = vmatprep.mubr.msk.bf16.mxu1 %vm933_vm2, %v6952_v11 }
  0x92   :  { %6689 = vmatmul.mubr.msk.bf16.gmra.mrb[68].mxu0 %vm933_vm2, %v6953_v12  ;;  %6817 = vmatmul.mubr.msk.bf16.gmra.mrb[68].mxu1 %vm933_vm2, %v6954_v13 }
  0x93   :  { %6692 = vmatprep.mubr.msk.bf16.mxu0 %vm933_vm2, %v6955_v14  ;;  %6820 = vmatprep.mubr.msk.bf16.mxu1 %vm933_vm2, %v6956_v15 }
  0x9a   :  { %6693 = vmatmul.mubr.msk.bf16.gmra.mrb[72].mxu0 %vm933_vm2, %v6957_v16  ;;  %6821 = vmatmul.mubr.msk.bf16.gmra.mrb[72].mxu1 %vm933_vm2, %v6958_v17 }
  0x9b   :  { %6696 = vmatprep.mubr.msk.bf16.mxu0 %vm933_vm2, %v6959_v18  ;;  %6824 = vmatprep.mubr.msk.bf16.mxu1 %vm933_vm2, %v6960_v19 }
  0xa2   :  { %6697 = vmatmul.mubr.msk.bf16.gmra.mrb[76].mxu0 %vm933_vm2, %v6961_v20  ;;  %6825 = vmatmul.mubr.msk.bf16.gmra.mrb[76].mxu1 %vm933_vm2, %v6962_v21 }
  0xa3   :  { %6700 = vmatprep.mubr.msk.bf16.mxu0 %vm933_vm2, %v6963_v22  ;;  %6828 = vmatprep.mubr.msk.bf16.mxu1 %vm933_vm2, %v6964_v23  ;;  %v6997_v23 = vld [vmem:[%s11611_s0 + $0x1c8] sm:$0xff]  }
  0xaa   :  { %6701 = vmatmul.mubr.msk.bf16.gmra.mrb[80].mxu0 %vm933_vm2, %v6965_v24  ;;  %6829 = vmatmul.mubr.msk.bf16.gmra.mrb[80].mxu1 %vm933_vm2, %v6966_v25  ;;  %v6998_v24 = vld [vmem:[%s11611_s0 + $0x3c8] sm:$0xff]  }
  0xab   :  { %6704 = vmatprep.mubr.msk.bf16.mxu0 %vm933_vm2, %v6967_v26  ;;  %6832 = vmatprep.mubr.msk.bf16.mxu1 %vm933_vm2, %v6968_v27 }
  0xb2   :  { %6705 = vmatmul.mubr.msk.bf16.gmra.mrb[84].mxu0 %vm933_vm2, %v6969_v28  ;;  %6833 = vmatmul.mubr.msk.bf16.gmra.mrb[84].mxu1 %vm933_vm2, %v6970_v29  ;;  %v6999_v29 = vld [vmem:[%s11611_s0 + $0x1d0] sm:$0xff]  }
  0xb3   :  { %6708 = vmatprep.mubr.msk.bf16.mxu0 %vm933_vm2, %v6971_v30  ;;  %6836 = vmatprep.mubr.msk.bf16.mxu1 %vm933_vm2, %v6972_v31  ;;  %v7000_v30 = vld [vmem:[%s11611_s0 + $0x3d0] sm:$0xff]  }
  0xba   :  { %6709 = vmatmul.mubr.msk.bf16.gmra.mrb[88].mxu0 %vm933_vm2, %v6973_v32  ;;  %6837 = vmatmul.mubr.msk.bf16.gmra.mrb[88].mxu1 %vm933_vm2, %v6974_v33 }
  0xbb   :  { %6712 = vmatprep.mubr.msk.bf16.mxu0 %vm933_vm2, %v6975_v34  ;;  %6840 = vmatprep.mubr.msk.bf16.mxu1 %vm933_vm2, %v6976_v35 }
  0xc2   :  { %6713 = vmatmul.mubr.msk.bf16.gmra.mrb[92].mxu0 %vm933_vm2, %v6977_v36  ;;  %6841 = vmatmul.mubr.msk.bf16.gmra.mrb[92].mxu1 %vm933_vm2, %v6978_v37 }
  0xc3   :  { %6716 = vmatprep.mubr.msk.bf16.mxu0 %vm933_vm2, %v6979_v38  ;;  %6844 = vmatprep.mubr.msk.bf16.mxu1 %vm933_vm2, %v6980_v39 }
  0xca   :  { %6717 = vmatmul.mubr.msk.bf16.gmra.mrb[96].mxu0 %vm933_vm2, %v6981_v40  ;;  %6845 = vmatmul.mubr.msk.bf16.gmra.mrb[96].mxu1 %vm933_vm2, %v6982_v41 }
  0xcb   :  { %6720 = vmatprep.mubr.msk.bf16.mxu0 %vm933_vm2, %v6983_v42  ;;  %6848 = vmatprep.mubr.msk.bf16.mxu1 %vm933_vm2, %v6984_v43 }
  0xd2   :  { %6721 = vmatmul.mubr.msk.bf16.gmra.mrb[100].mxu0 %vm933_vm2, %v6985_v44  ;;  %6849 = vmatmul.mubr.msk.bf16.gmra.mrb[100].mxu1 %vm933_vm2, %v6986_v45 }
  0xd3   :  { %6724 = vmatprep.mubr.msk.bf16.mxu0 %vm933_vm2, %v6987_v46  ;;  %6852 = vmatprep.mubr.msk.bf16.mxu1 %vm933_vm2, %v6988_v47 }
  0xda   :  { %6725 = vmatmul.mubr.msk.bf16.gmra.mrb[104].mxu0 %vm933_vm2, %v6989_v48  ;;  %6853 = vmatmul.mubr.msk.bf16.gmra.mrb[104].mxu1 %vm933_vm2, %v6990_v49  ;;  %v7001_v48 = vld [vmem:[%s11611_s0 + $0x1d8] sm:$0xff]  }
  0xdb   :  { %6728 = vmatprep.mubr.msk.bf16.mxu0 %vm933_vm2, %v6991_v50  ;;  %6856 = vmatprep.mubr.msk.bf16.mxu1 %vm933_vm2, %v6992_v51  ;;  %v7002_v49 = vld [vmem:[%s11611_s0 + $0x3d8] sm:$0xff]  }
  0xdd   :  { %v6622_v53 = vpop.f32.mrb[0].mxu0  ;;  %v6750_v54 = vpop.f32.mrb[0].mxu1 }
  0xde   :  { %v8513_v55 = vadd.f32 %v6622_v53, %v8508_v52  ;;  %v8516_v56 = vadd.f32 %v6750_v54, %v8508_v52  ;;  %v1359_v57 = vpop.f32.mrb[1].mxu0  ;;  %v1871_v58 = vpop.f32.mrb[1].mxu1 }
  0xdf   :  { %v8525_v61 = vadd.f32 %v8508_v52, %v1359_v57  ;;  %v8528_v62 = vadd.f32 %v8508_v52, %v1871_v58  ;;  %v6623_v63 = vpop.f32.mrb[2].mxu0  ;;  %v6751_v0 = vpop.f32.mrb[2].mxu1  ;;  %v7003_v57 = vld [vmem:[%s11611_s0 + $0x1e0] sm:$0xff]  }
  0xe0   :  { %v5720_v3 = vmul.f32 -1.442695, %v8513_v55  ;;  %v5848_v4 = vmul.f32 -1.442695, %v8516_v56  ;;  %v8539_v5 = vadd.f32 %v6623_v63, %v8508_v52  ;;  %v8542_v6 = vadd.f32 %v6751_v0, %v8508_v52  ;;  %v1362_v7 = vpop.f32.mrb[3].mxu0  ;;  %v1874_v8 = vpop.f32.mrb[3].mxu1 }
  0xe1   :  { %v5718_v9 = vmul.f32 -1.442695, %v8525_v61  ;;  %v5846_v10 = vmul.f32 -1.442695, %v8528_v62  ;;  %v8547_v11 = vadd.f32 %v8508_v52, %v1362_v7  ;;  %v8550_v12 = vadd.f32 %v8508_v52, %v1874_v8  ;;  %v7004_v58 = vld [vmem:[%s11611_s0 + $0x3e0] sm:$0xff]  }
  0xe2   :  { %7011 = vpow2.f32 %v5720_v3  ;;  %v5721_v13 = vmul.f32 -1.442695, %v8539_v5  ;;  %6729 = vmatmul.mubr.msk.bf16.gmra.mrb[108].mxu0 %vm933_vm2, %v6993_v59  ;;  %6857 = vmatmul.mubr.msk.bf16.gmra.mrb[108].mxu1 %vm933_vm2, %v6994_v60  ;;  %v5849_v14 = vmul.f32 -1.442695, %v8542_v6 }
  0xe3   :  { %7013 = vpow2.f32 %v5848_v4  ;;  %6732 = vmatprep.mubr.msk.bf16.mxu0 %vm933_vm2, %v6995_v1  ;;  %6860 = vmatprep.mubr.msk.bf16.mxu1 %vm933_vm2, %v6996_v2  ;;  %v5719_v15 = vmul.f32 -1.442695, %v8547_v11  ;;  %v5847_v16 = vmul.f32 -1.442695, %v8550_v12 }
  0xe4   :  { %7015 = vpow2.f32 %v5718_v9 }
  0xe5   :  { %7017 = vpow2.f32 %v5846_v10  ;;  %v6626_v17 = vpop.f32.mrb[4].mxu0  ;;  %v6754_v18 = vpop.f32.mrb[4].mxu1 }
  0xe6   :  { %7019 = vpow2.f32 %v5721_v13  ;;  %v8561_v19 = vadd.f32 %v6626_v17, %v8508_v52  ;;  %v8564_v20 = vadd.f32 %v6754_v18, %v8508_v52  ;;  %v1375_v21 = vpop.f32.mrb[5].mxu0  ;;  %v1887_v22 = vpop.f32.mrb[5].mxu1 }
  0xe7   :  { %7021 = vpow2.f32 %v5849_v14  ;;  %v8573_v25 = vadd.f32 %v8508_v52, %v1375_v21  ;;  %v8576_v26 = vadd.f32 %v8508_v52, %v1887_v22  ;;  %v6627_v27 = vpop.f32.mrb[6].mxu0  ;;  %v6755_v28 = vpop.f32.mrb[6].mxu1 }
  0xe8   :  { %7023 = vpow2.f32 %v5719_v15  ;;  %v5724_v31 = vmul.f32 -1.442695, %v8561_v19  ;;  %v5852_v32 = vmul.f32 -1.442695, %v8564_v20  ;;  %v8587_v33 = vadd.f32 %v6627_v27, %v8508_v52  ;;  %v1378_v34 = vpop.f32.mrb[7].mxu0  ;;  %v1890_v35 = vpop.f32.mrb[7].mxu1 }
  0xe9   :  { %7025 = vpow2.f32 %v5847_v16  ;;  %v5722_v36 = vmul.f32 -1.442695, %v8573_v25  ;;  %v5850_v37 = vmul.f32 -1.442695, %v8576_v26  ;;  %v8615_v2 = vadd.f32 %v6755_v28, %v8508_v52  ;;  %v7006_v27 = vld [vmem:[%s11611_s0 + $0x3e8] sm:$0xff]  }
  0xea   :  { %7027 = vpow2.f32 %v5724_v31  ;;  %v5725_v38 = vmul.f32 -1.442695, %v8587_v33  ;;  %6733 = vmatmul.mubr.msk.bf16.gmra.mrb[112].mxu0 %vm933_vm2, %v6997_v23  ;;  %6861 = vmatmul.mubr.msk.bf16.gmra.mrb[112].mxu1 %vm933_vm2, %v6998_v24  ;;  %v8620_v8 = vadd.f32 %v8508_v52, %v1378_v34  ;;  %v8625_v13 = vadd.f32 %v8508_v52, %v1890_v35  ;;  %v7005_v24 = vld [vmem:[%s11611_s0 + $0x1e8] sm:$0xff]   ;;  %v7007_v35 = vld [vmem:[%s11611_s0 + $0x1f0] sm:$0xff]  }
  0xeb   :  { %7029 = vpow2.f32 %v5852_v32  ;;  %6736 = vmatprep.mubr.msk.bf16.mxu0 %vm933_vm2, %v6999_v29  ;;  %6864 = vmatprep.mubr.msk.bf16.mxu1 %vm933_vm2, %v7000_v30  ;;  %v5853_v21 = vmul.f32 -1.442695, %v8615_v2 }
  0xec   :  { %v7012_v39 = vpop.eup %7011  ;;  %7031 = vpow2.f32 %v5722_v36  ;;  %v5723_v30 = vmul.f32 -1.442695, %v8620_v8 }
  0xed   :  { %v7014_v40 = vpop.eup %7013  ;;  %v3152_v41 = vadd.f32 1.0, %v7012_v39  ;;  %7033 = vpow2.f32 %v5850_v37  ;;  %v6630_v42 = vpop.f32.mrb[8].mxu0 }
  0xee   :  { %v6758_v43 = vpop.f32.mrb[8].mxu1  ;;  %v7016_v44 = vpop.eup %7015  ;;  %v3280_v45 = vadd.f32 1.0, %v7014_v40  ;;  %7035 = vpow2.f32 %v5725_v38  ;;  %v8630_v16 = vadd.f32 %v6630_v42, %v8508_v52  ;;  %v5851_v38 = vmul.f32 -1.442695, %v8625_v13  ;;  %v7008_v42 = vld [vmem:[%s11611_s0 + $0x3f0] sm:$0xff]  }
  0xef   :  { %v1391_v46 = vpop.f32.mrb[9].mxu0  ;;  %v1903_v47 = vpop.f32.mrb[9].mxu1  ;;  %7037 = vrcp.f32 %v3152_v41  ;;  %v3150_v51 = vadd.f32 1.0, %v7016_v44  ;;  %v8634_v22 = vadd.f32 %v6758_v43, %v8508_v52 }
  0xf0   :  { %v7018_v50 = vpop.eup %7017  ;;  %v8602_v53 = vpop.f32.mrb[10].mxu0  ;;  %7039 = vrcp.f32 %v3280_v45  ;;  %v8646_v31 = vadd.f32 %v8508_v52, %v1391_v46  ;;  %v8657_v39 = vadd.f32 %v8508_v52, %v1903_v47  ;;  %v5728_v45 = vmul.f32 -1.442695, %v8630_v16 }
  0xf1   :  { %v8604_v54 = vpop.f32.mrb[10].mxu1  ;;  %v7020_v59 = vpop.eup %7019  ;;  %v3278_v60 = vadd.f32 1.0, %v7018_v50  ;;  %7041 = vrcp.f32 %v3150_v51  ;;  %v5856_v50 = vmul.f32 -1.442695, %v8634_v22  ;;  %v8674_v51 = vadd.f32 %v8602_v53, %v8508_v52 }
  0xf2   :  { %v8612_v63 = vpop.f32.mrb[11].mxu0  ;;  %v7022_v0 = vpop.eup %7021  ;;  %v3153_v1 = vadd.f32 1.0, %v7020_v59  ;;  %6737 = vmatmul.mubr.msk.bf16.gmra.mrb[116].mxu0 %vm933_vm2, %v7001_v48  ;;  %6865 = vmatmul.mubr.msk.bf16.gmra.mrb[116].mxu1 %vm933_vm2, %v7002_v49 }
  0xf3   :  { %v8617_v3 = vpop.f32.mrb[11].mxu1  ;;  %v7024_v4 = vpop.eup %7023  ;;  %7043 = vrcp.f32 %v3278_v60  ;;  %v3281_v7 = vadd.f32 1.0, %v7022_v0  ;;  %6740 = vmatprep.mubr.msk.bf16.mxu0 %vm933_vm2, %v7003_v57  ;;  %6868 = vmatprep.mubr.msk.bf16.mxu1 %vm933_vm2, %v7004_v58  ;;  %v5726_v60 = vmul.f32 -1.442695, %v8646_v31  ;;  %v8682_v0 = vadd.f32 %v8604_v54, %v8508_v52 }
  0xf4   :  { %v7026_v9 = vpop.eup %7025  ;;  %7045 = vrcp.f32 %v3153_v1  ;;  %v3151_v10 = vadd.f32 1.0, %v7024_v4  ;;  %v5854_v4 = vmul.f32 -1.442695, %v8657_v39 }
  0xf5   :  { %v7028_v14 = vpop.eup %7027  ;;  %7047 = vrcp.f32 %v3281_v7  ;;  %v3279_v15 = vadd.f32 1.0, %v7026_v9  ;;  %v8636_v23 = vpop.f32.mrb[12].mxu0 }
  0xf6   :  { %v7030_v17 = vpop.eup %7029  ;;  %7049 = vrcp.f32 %v3151_v10  ;;  %v3156_v18 = vadd.f32 1.0, %v7028_v14  ;;  %v8648_v32 = vpop.f32.mrb[12].mxu1  ;;  %v8697_v10 = vadd.f32 %v8508_v52, %v8617_v3 }
  0xf7   :  { %v7032_v28 = vpop.eup %7031  ;;  %7051 = vrcp.f32 %v3279_v15  ;;  %v3284_v29 = vadd.f32 1.0, %v7030_v17  ;;  %v8650_v34 = vpop.f32.mrb[13].mxu0 }
  0xf8   :  { %v7034_v36 = vpop.eup %7033  ;;  %7053 = vrcp.f32 %v3156_v18  ;;  %v3154_v37 = vadd.f32 1.0, %v7032_v28  ;;  %v8659_v40 = vpop.f32.mrb[13].mxu1  ;;  %v7009_v28 = vld [vmem:[%s11611_s0 + $0x1f8] sm:$0xff]  }
  0xf9   :  { %v8661_v41 = vpop.f32.mrb[14].mxu0  ;;  %v7036_v43 = vpop.eup %7035  ;;  %7055 = vrcp.f32 %v3284_v29  ;;  %v3282_v44 = vadd.f32 1.0, %v7034_v36  ;;  %v7010_v29 = vld [vmem:[%s11611_s0 + $0x3f8] sm:$0xff]   ;;  %v8728_v36 = vadd.f32 %v8636_v23, %v8508_v52 }
  0xfa   :  { %v8667_v46 = vpop.f32.mrb[14].mxu1  ;;  %v8669_v48 = vpop.f32.mrb[15].mxu0  ;;  %7057 = vrcp.f32 %v3154_v37  ;;  %v3157_v49 = vadd.f32 1.0, %v7036_v43  ;;  %6741 = vmatmul.mubr.msk.bf16.gmra.mrb[120].mxu0 %vm933_vm2, %v7005_v24  ;;  %6869 = vmatmul.mubr.msk.bf16.gmra.mrb[120].mxu1 %vm933_vm2, %v7006_v27 }
  0xfb   :  { %v7038_v47 = vpop.eup %7037  ;;  %v8676_v57 = vpop.f32.mrb[15].mxu1  ;;  %7059 = vrcp.f32 %v3282_v44  ;;  %6744 = vmatprep.mubr.msk.bf16.mxu0 %vm933_vm2, %v7007_v35  ;;  %6872 = vmatprep.mubr.msk.bf16.mxu1 %vm933_vm2, %v7008_v42 }
  0xfc   :  { %v7040_v58 = vpop.eup %7039  ;;  %v3920_v59 = vmul.f32 %v7038_v47, %v8513_v55  ;;  %7061 = vrcp.f32 %v3157_v49  ;;  %v8690_v55 = vadd.f32 %v8508_v52, %v8612_v63  ;;  %v5729_v63 = vmul.f32 -1.442695, %v8674_v51 }
  0xfd   :  { %v7042_v1 = vpop.eup %7041  ;;  %v4048_v53 = vmul.f32 %v7040_v58, %v8516_v56  ;;  %7063 = vpow2.f32 %v5853_v21  ;;  %v8701_v17 = vpop.f32.mrb[16].mxu0  ;;  %v5857_v21 = vmul.f32 -1.442695, %v8682_v0 }
  0xfe   :  { %v7044_v54 = vpop.eup %7043  ;;  %v6232_v7 = vpack.c.bf16 %v3920_v59, %v3920_v59  ;;  %v3918_v9 = vmul.f32 %v7042_v1, %v8525_v61  ;;  %7065 = vpow2.f32 %v5723_v30  ;;  %v8703_v18 = vpop.f32.mrb[16].mxu1  ;;  %v5855_v1 = vmul.f32 -1.442695, %v8697_v10 }
  0xff   :  { %v7046_v56 = vpop.eup %7045  ;;  %v6360_v14 = vpack.c.bf16 %v4048_v53, %v4048_v53  ;;  %v4046_v15 = vmul.f32 %v7044_v54, %v8528_v62  ;;  %7067 = vpow2.f32 %v5851_v38  ;;  %v8711_v62 = vpop.f32.mrb[17].mxu0  ;;  %v5732_v54 = vmul.f32 -1.442695, %v8728_v36 }
 0x100   :  { %v7048_v24 = vpop.eup %7047  ;;  %5201 = vst.msk [vmem:[%s11613_s3 + $0x8] sm:$0xf] %vm5198_vm3, %v6232_v7  ;;  %v6230_v61 = vpack.c.bf16 %v3918_v9, %v3918_v9  ;;  %v3921_v3 = vmul.f32 %v7046_v56, %v8539_v5  ;;  %v8713_v27 = vpop.f32.mrb[17].mxu1  ;;  %7069 = vpow2.f32 %v5728_v45 }
 0x101   :  { %v7050_v30 = vpop.eup %7049  ;;  %5329 = vst.msk [vmem:[%s11613_s3 + $0x208] sm:$0xf] %vm5198_vm3, %v6360_v14  ;;  %v6358_v5 = vpack.c.bf16 %v4046_v15, %v4046_v15  ;;  %v4049_v35 = vmul.f32 %v7048_v24, %v8542_v6  ;;  %v8730_v37 = vpop.f32.mrb[18].mxu0  ;;  %7071 = vpow2.f32 %v5856_v50  ;;  %v8741_v6 = vadd.f32 %v8648_v32, %v8508_v52 }
 0x102   :  { %v8732_v38 = vpop.f32.mrb[18].mxu1  ;;  %v7052_v42 = vpop.eup %7051  ;;  %5199 = vst.msk [vmem:[%s11613_s3] sm:$0xf] %vm5198_vm3, %v6230_v61  ;;  %v6233_v43 = vpack.c.bf16 %v3921_v3, %v3921_v3  ;;  %v3919_v44 = vmul.f32 %v7050_v30, %v8547_v11  ;;  %7073 = vpow2.f32 %v5726_v60  ;;  %v5727_v11 = vmul.f32 -1.442695, %v8690_v55  ;;  %6745 = vmatmul.mubr.msk.bf16.gmra.mrb[124].mxu0 %vm933_vm2, %v7009_v28  ;;  %6873 = vmatmul.mubr.msk.bf16.gmra.mrb[124].mxu1 %vm933_vm2, %v7010_v29 }
 0x103   :  { %v8743_v23 = vpop.f32.mrb[19].mxu0  ;;  %v8745_v45 = vpop.f32.mrb[19].mxu1  ;;  %5327 = vst.msk [vmem:[%s11613_s3 + $0x200] sm:$0xf] %vm5198_vm3, %v6358_v5  ;;  %v6361_v49 = vpack.c.bf16 %v4049_v35, %v4049_v35  ;;  %v4047_v58 = vmul.f32 %v7052_v42, %v8550_v12  ;;  %7075 = vpow2.f32 %v5854_v4  ;;  %v5860_v9 = vmul.f32 -1.442695, %v8741_v6 }
 0x104   :  { %v7054_v47 = vpop.eup %7053  ;;  %5202 = vst.msk [vmem:[%s11613_s3 + $0xc] sm:$0xf] %vm5198_vm3, %v6233_v43  ;;  %v6231_v32 = vpack.c.bf16 %v3919_v44, %v3919_v44  ;;  %7077 = vpow2.f32 %v5729_v63 }
 0x105   :  { %v7056_v50 = vpop.eup %7055  ;;  %v3924_v59 = vmul.f32 %v7054_v47, %v8561_v19  ;;  %5330 = vst.msk [vmem:[%s11613_s3 + $0x20c] sm:$0xf] %vm5198_vm3, %v6361_v49  ;;  %v6359_v60 = vpack.c.bf16 %v4047_v58, %v4047_v58  ;;  %7079 = vpow2.f32 %v5857_v21  ;;  %v8778_v15 = vpop.f32.mrb[20].mxu0 }
 0x106   :  { %v7058_v12 = vpop.eup %7057  ;;  %v4052_v53 = vmul.f32 %v7056_v50, %v8564_v20  ;;  %5200 = vst.msk [vmem:[%s11613_s3 + $0x4] sm:$0xf] %vm5198_vm3, %v6231_v32  ;;  %7081 = vpow2.f32 %v5727_v11  ;;  %v8780_v63 = vpop.f32.mrb[20].mxu1  ;;  %v8817_v50 = vadd.f32 %v8508_v52, %v8650_v34  ;;  %v8826_v34 = vadd.f32 %v8508_v52, %v8659_v40 }
 0x107   :  { %v7060_v19 = vpop.eup %7059  ;;  %v6236_v4 = vpack.c.bf16 %v3924_v59, %v3924_v59  ;;  %v3922_v7 = vmul.f32 %v7058_v12, %v8573_v25  ;;  %5328 = vst.msk [vmem:[%s11613_s3 + $0x204] sm:$0xf] %vm5198_vm3, %v6359_v60  ;;  %7083 = vpow2.f32 %v5855_v1  ;;  %v8787_v3 = vpop.f32.mrb[21].mxu0 }
 0x108   :  { %v7062_v56 = vpop.eup %7061  ;;  %v6364_v20 = vpack.c.bf16 %v4052_v53, %v4052_v53  ;;  %v4050_v14 = vmul.f32 %v7060_v19, %v8576_v26  ;;  %v8789_v21 = vpop.f32.mrb[21].mxu1  ;;  %7085 = vpow2.f32 %v5732_v54 }
 0x109   :  { %v7064_v24 = vpop.eup %7063  ;;  %5205 = vst.msk [vmem:[%s11613_s3 + $0x18] sm:$0xf] %vm5198_vm3, %v6236_v4  ;;  %v6234_v25 = vpack.c.bf16 %v3922_v7, %v3922_v7  ;;  %v3925_v61 = vmul.f32 %v7062_v56, %v8587_v33  ;;  %v8795_v30 = vpop.f32.mrb[22].mxu0  ;;  %7087 = vpow2.f32 %v5860_v9  ;;  %v5730_v9 = vmul.f32 -1.442695, %v8817_v50 }
 0x10a   :  { %v7066_v26 = vpop.eup %7065  ;;  %5333 = vst.msk [vmem:[%s11613_s3 + $0x218] sm:$0xf] %vm5198_vm3, %v6364_v20  ;;  %v6362_v28 = vpack.c.bf16 %v4050_v14, %v4050_v14  ;;  %v3285_v29 = vadd.f32 1.0, %v7064_v24  ;;  %v8797_v5 = vpop.f32.mrb[22].mxu1 }
 0x10b   :  { %v7068_v35 = vpop.eup %7067  ;;  %5203 = vst.msk [vmem:[%s11613_s3 + $0x10] sm:$0xf] %vm5198_vm3, %v6234_v25  ;;  %v6237_v33 = vpack.c.bf16 %v3925_v61, %v3925_v61  ;;  %v3155_v42 = vadd.f32 1.0, %v7066_v26  ;;  %v8803_v43 = vpop.f32.mrb[23].mxu0  ;;  %v8834_v25 = vadd.f32 %v8661_v41, %v8508_v52  ;;  %v8838_v61 = vadd.f32 %v8667_v46, %v8508_v52 }
 0x10c   :  { %v8805_v44 = vpop.f32.mrb[23].mxu1  ;;  %v7070_v47 = vpop.eup %7069  ;;  %5331 = vst.msk [vmem:[%s11613_s3 + $0x210] sm:$0xf] %vm5198_vm3, %v6362_v28  ;;  %7089 = vrcp.f32 %v3285_v29  ;;  %v3283_v49 = vadd.f32 1.0, %v7068_v35  ;;  %v8846_v35 = vadd.f32 %v8508_v52, %v8669_v48 }
 0x10d   :  { %v7072_v58 = vpop.eup %7071  ;;  %5206 = vst.msk [vmem:[%s11613_s3 + $0x1c] sm:$0xf] %vm5198_vm3, %v6237_v33  ;;  %7091 = vrcp.f32 %v3155_v42  ;;  %v3160_v11 = vadd.f32 1.0, %v7070_v47  ;;  %v8819_v54 = vpop.f32.mrb[24].mxu0  ;;  %v8850_v33 = vadd.f32 %v8508_v52, %v8676_v57  ;;  %v5858_v57 = vmul.f32 -1.442695, %v8826_v34 }
 0x10e   :  { %v7074_v32 = vpop.eup %7073  ;;  %7093 = vrcp.f32 %v3283_v49  ;;  %v3288_v59 = vadd.f32 1.0, %v7072_v58  ;;  %v8821_v19 = vpop.f32.mrb[24].mxu1  ;;  %v8858_v49 = vadd.f32 %v8701_v17, %v8508_v52  ;;  %v8862_v58 = vadd.f32 %v8703_v18, %v8508_v52 }
 0x10f   :  { %v7076_v1 = vpop.eup %7075  ;;  %7095 = vrcp.f32 %v3160_v11  ;;  %v3158_v12 = vadd.f32 1.0, %v7074_v32  ;;  %v8828_v56 = vpop.f32.mrb[25].mxu0  ;;  %v8867_v32 = vadd.f32 %v8508_v52, %v8711_v62  ;;  %v5861_v17 = vmul.f32 -1.442695, %v8838_v61 }
 0x110   :  { %v7078_v60 = vpop.eup %7077  ;;  %7097 = vrcp.f32 %v3288_v59  ;;  %v3286_v53 = vadd.f32 1.0, %v7076_v1  ;;  %v8830_v20 = vpop.f32.mrb[25].mxu1  ;;  %v5736_v62 = vmul.f32 -1.442695, %v8858_v49 }
 0x111   :  { %v7080_v4 = vpop.eup %7079  ;;  %7099 = vrcp.f32 %v3158_v12  ;;  %v3161_v7 = vadd.f32 1.0, %v7078_v60  ;;  %v8840_v26 = vpop.f32.mrb[26].mxu0  ;;  %v5733_v12 = vmul.f32 -1.442695, %v8834_v25 }
 0x112   :  { %v7082_v14 = vpop.eup %7081  ;;  %7101 = vrcp.f32 %v3286_v53  ;;  %v3289_v24 = vadd.f32 1.0, %v7080_v4  ;;  %v8842_v28 = vpop.f32.mrb[26].mxu1  ;;  %v5731_v53 = vmul.f32 -1.442695, %v8846_v35  ;;  %v5859_v4 = vmul.f32 -1.442695, %v8850_v33 }
 0x113   :  { %v7084_v40 = vpop.eup %7083  ;;  %7103 = vrcp.f32 %v3161_v7  ;;  %v3159_v29 = vadd.f32 1.0, %v7082_v14  ;;  %v8852_v41 = vpop.f32.mrb[27].mxu0 }
 0x114   :  { %v8854_v42 = vpop.f32.mrb[27].mxu1  ;;  %v7086_v46 = vpop.eup %7085  ;;  %7105 = vrcp.f32 %v3289_v24  ;;  %v3287_v47 = vadd.f32 1.0, %v7084_v40  ;;  %v5864_v24 = vmul.f32 -1.442695, %v8862_v58 }
 0x115   :  { %v7088_v48 = vpop.eup %7087  ;;  %7107 = vrcp.f32 %v3159_v29  ;;  %v3164_v11 = vadd.f32 1.0, %v7086_v46  ;;  %v8877_v40 = vpop.f32.mrb[28].mxu0 }
 0x116   :  { %v7090_v59 = vpop.eup %7089  ;;  %7109 = vrcp.f32 %v3287_v47  ;;  %v3292_v1 = vadd.f32 1.0, %v7088_v48  ;;  %11614 = vst [vmem:[#allocation2_spill] sm:$0xff] %v8877_v40  ;;  %v8879_v29 = vpop.f32.mrb[28].mxu1  ;;  %v5734_v48 = vmul.f32 -1.442695, %v8867_v32  ;;  %v8890_v40 = vadd.f32 %v8508_v52, %v8713_v27 }
 0x117   :  { %v7092_v60 = vpop.eup %7091  ;;  %v4053_v18 = vmul.f32 %v7090_v59, %v8615_v2  ;;  %7111 = vrcp.f32 %v3164_v11  ;;  %11615 = vst [vmem:[#allocation3_spill] sm:$0xff] %v8879_v29  ;;  %v8883_v11 = vpop.f32.mrb[29].mxu0 }
 0x118   :  { %v7094_v7 = vpop.eup %7093  ;;  %v3923_v14 = vmul.f32 %v7092_v60, %v8620_v8  ;;  %7113 = vrcp.f32 %v3292_v1  ;;  %v8885_v59 = vpop.f32.mrb[29].mxu1 }
 0x119   :  { %v7096_v46 = vpop.eup %7095  ;;  %v6365_v47 = vpack.c.bf16 %v4053_v18, %v4053_v18  ;;  %v4051_v2 = vmul.f32 %v7094_v7, %v8625_v13  ;;  %7115 = vpow2.f32 %v5730_v9  ;;  %v8892_v29 = vpop.f32.mrb[30].mxu0 }
 0x11a   :  { %v7098_v8 = vpop.eup %7097  ;;  %v6235_v1 = vpack.c.bf16 %v3923_v14, %v3923_v14  ;;  %v3928_v60 = vmul.f32 %v7096_v46, %v8630_v16  ;;  %7117 = vpow2.f32 %v5858_v57  ;;  %v8894_v18 = vpop.f32.mrb[30].mxu1  ;;  %v8903_v16 = vadd.f32 %v8730_v37, %v8508_v52 }
 0x11b   :  { %v7100_v13 = vpop.eup %7099  ;;  %5334 = vst.msk [vmem:[%s11613_s3 + $0x21c] sm:$0xf] %vm5198_vm3, %v6365_v47  ;;  %v6363_v9 = vpack.c.bf16 %v4051_v2, %v4051_v2  ;;  %v4056_v7 = vmul.f32 %v7098_v8, %v8634_v22  ;;  %7119 = vpow2.f32 %v5733_v12  ;;  %v8905_v27 = vpop.f32.mrb[31].mxu0  ;;  %v8916_v22 = vadd.f32 %v8732_v38, %v8508_v52 }
 0x11c   :  { %v8907_v57 = vpop.f32.mrb[31].mxu1  ;;  %v7102_v14 = vpop.eup %7101  ;;  %5204 = vst.msk [vmem:[%s11613_s3 + $0x14] sm:$0xf] %vm5198_vm3, %v6235_v1  ;;  %v6240_v46 = vpack.c.bf16 %v3928_v60, %v3928_v60  ;;  %v3926_v47 = vmul.f32 %v7100_v13, %v8646_v31  ;;  %7121 = vpow2.f32 %v5861_v17  ;;  %v8925_v8 = vadd.f32 %v8508_v52, %v8743_v23 }
 0x11d   :  { %v7104_v37 = vpop.eup %7103  ;;  %5332 = vst.msk [vmem:[%s11613_s3 + $0x214] sm:$0xf] %vm5198_vm3, %v6363_v9  ;;  %v6368_v12 = vpack.c.bf16 %v4056_v7, %v4056_v7  ;;  %v4054_v2 = vmul.f32 %v7102_v14, %v8657_v39  ;;  %7123 = vpow2.f32 %v5731_v53  ;;  %v5862_v1 = vmul.f32 -1.442695, %v8890_v40  ;;  %v8945_v7 = vpop.f32.mrb[32].mxu0 }
 0x11e   :  { %v7106_v31 = vpop.eup %7105  ;;  %5209 = vst.msk [vmem:[%s11613_s3 + $0x28] sm:$0xf] %vm5198_vm3, %v6240_v46  ;;  %v6238_v38 = vpack.c.bf16 %v3926_v47, %v3926_v47  ;;  %v3929_v17 = vmul.f32 %v7104_v37, %v8674_v51  ;;  %7125 = vpow2.f32 %v5859_v4  ;;  %v5737_v53 = vmul.f32 -1.442695, %v8903_v16  ;;  %v8947_v14 = vpop.f32.mrb[32].mxu1 }
 0x11f   :  { %v7108_v60 = vpop.eup %7107  ;;  %5337 = vst.msk [vmem:[%s11613_s3 + $0x228] sm:$0xf] %vm5198_vm3, %v6368_v12  ;;  %v6366_v39 = vpack.c.bf16 %v4054_v2, %v4054_v2  ;;  %v4057_v23 = vmul.f32 %v7106_v31, %v8682_v0  ;;  %7127 = vpow2.f32 %v5736_v62  ;;  %v5865_v9 = vmul.f32 -1.442695, %v8916_v22 }
 0x120   :  { %v7110_v13 = vpop.eup %7109  ;;  %5207 = vst.msk [vmem:[%s11613_s3 + $0x20] sm:$0xf] %vm5198_vm3, %v6238_v38  ;;  %v6241_v51 = vpack.c.bf16 %v3929_v17, %v3929_v17  ;;  %v3927_v4 = vmul.f32 %v7108_v60, %v8690_v55  ;;  %7129 = vpow2.f32 %v5864_v24  ;;  %v5735_v47 = vmul.f32 -1.442695, %v8925_v8  ;;  %v8955_v55 = vpop.f32.mrb[33].mxu0 }
 0x121   :  { %v7112_v0 = vpop.eup %7111  ;;  %5335 = vst.msk [vmem:[%s11613_s3 + $0x220] sm:$0xf] %vm5198_vm3, %v6366_v39  ;;  %v6369_v62 = vpack.c.bf16 %v4057_v23, %v4057_v23  ;;  %v4055_v46 = vmul.f32 %v7110_v13, %v8697_v10  ;;  %7131 = vpow2.f32 %v5734_v48  ;;  %v8957_v24 = vpop.f32.mrb[33].mxu1 }
 0x122   :  { %v7114_v37 = vpop.eup %7113  ;;  %5210 = vst.msk [vmem:[%s11613_s3 + $0x2c] sm:$0xf] %vm5198_vm3, %v6241_v51  ;;  %v6239_v12 = vpack.c.bf16 %v3927_v4, %v3927_v4  ;;  %v3932_v2 = vmul.f32 %v7112_v0, %v8728_v36  ;;  %7133 = vpow2.f32 %v5862_v1  ;;  %v8964_v31 = vpop.f32.mrb[34].mxu0 }
 0x123   :  { %v8966_v10 = vpop.f32.mrb[34].mxu1  ;;  %v7116_v48 = vpop.eup %7115  ;;  %5338 = vst.msk [vmem:[%s11613_s3 + $0x22c] sm:$0xf] %vm5198_vm3, %v6369_v62  ;;  %v6367_v38 = vpack.c.bf16 %v4055_v46, %v4055_v46  ;;  %v4060_v17 = vmul.f32 %v7114_v37, %v8741_v6  ;;  %7135 = vpow2.f32 %v5737_v53 }
 0x124   :  { %v8973_v60 = vpop.f32.mrb[35].mxu0  ;;  %v8975_v39 = vpop.f32.mrb[35].mxu1  ;;  %5208 = vst.msk [vmem:[%s11613_s3 + $0x24] sm:$0xf] %vm5198_vm3, %v6239_v12  ;;  %v6244_v1 = vpack.c.bf16 %v3932_v2, %v3932_v2  ;;  %v3162_v23 = vadd.f32 1.0, %v7116_v48  ;;  %7137 = vpow2.f32 %v5865_v9 }
 0x125   :  { %11616 = vst [vmem:[#allocation4_spill] sm:$0xff] %v8975_v39  ;;  %v7118_v36 = vpop.eup %7117  ;;  %5336 = vst.msk [vmem:[%s11613_s3 + $0x224] sm:$0xf] %vm5198_vm3, %v6367_v38  ;;  %v6372_v6 = vpack.c.bf16 %v4060_v17, %v4060_v17  ;;  %7139 = vpow2.f32 %v5735_v47  ;;  %v8995_v47 = vadd.f32 %v8508_v52, %v8745_v45  ;;  %v8997_v37 = vpop.f32.mrb[36].mxu0 }
 0x126   :  { %v7120_v13 = vpop.eup %7119  ;;  %v3290_v53 = vadd.f32 1.0, %v7118_v36  ;;  %5213 = vst.msk [vmem:[%s11613_s3 + $0x38] sm:$0xf] %vm5198_vm3, %v6244_v1  ;;  %7141 = vrcp.f32 %v3162_v23  ;;  %11617 = vst [vmem:[#allocation5_spill] sm:$0xff] %v8997_v37  ;;  %v8999_v12 = vpop.f32.mrb[36].mxu1 }
 0x127   :  { %v7122_v51 = vpop.eup %7121  ;;  %v3165_v4 = vadd.f32 1.0, %v7120_v13  ;;  %5341 = vst.msk [vmem:[%s11613_s3 + $0x238] sm:$0xf] %vm5198_vm3, %v6372_v6  ;;  %11618 = vst [vmem:[#allocation6_spill] sm:$0xff] %v8999_v12  ;;  %v9001_v38 = vpop.f32.mrb[37].mxu0  ;;  %v9009_v6 = vadd.f32 %v8778_v15, %v8508_v52 }
 0x128   :  { %v7124_v0 = vpop.eup %7123  ;;  %7143 = vrcp.f32 %v3290_v53  ;;  %v3293_v9 = vadd.f32 1.0, %v7122_v51  ;;  %11619 = vst [vmem:[#allocation7_spill] sm:$0xff] %v9001_v38  ;;  %v9003_v1 = vpop.f32.mrb[37].mxu1  ;;  %v9013_v53 = vadd.f32 %v8780_v63, %v8508_v52  ;;  %v9028_v63 = vadd.f32 %v8508_v52, %v8789_v21 }
 0x129   :  { %v7126_v62 = vpop.eup %7125  ;;  %7145 = vrcp.f32 %v3165_v4  ;;  %v3163_v46 = vadd.f32 1.0, %v7124_v0  ;;  %11620 = vst [vmem:[#allocation8_spill] sm:$0xff] %v9003_v1  ;;  %v9005_v23 = vpop.f32.mrb[38].mxu0  ;;  %v5740_v21 = vmul.f32 -1.442695, %v9009_v6 }
 0x12a   :  { %v7128_v2 = vpop.eup %7127  ;;  %7147 = vrcp.f32 %v3293_v9  ;;  %v3291_v48 = vadd.f32 1.0, %v7126_v62  ;;  %11621 = vst [vmem:[#allocation9_spill] sm:$0xff] %v9005_v23  ;;  %v9015_v51 = vpop.f32.mrb[38].mxu1  ;;  %v5863_v62 = vmul.f32 -1.442695, %v8995_v47 }
 0x12b   :  { %v7130_v17 = vpop.eup %7129  ;;  %7149 = vrcp.f32 %v3163_v46  ;;  %v3168_v36 = vadd.f32 1.0, %v7128_v2  ;;  %11622 = vst [vmem:[#allocation10_spill] sm:$0xff] %v9015_v51  ;;  %v9017_v4 = vpop.f32.mrb[39].mxu0  ;;  %v9022_v46 = vadd.f32 %v8508_v52, %v8787_v3  ;;  %v9036_v3 = vadd.f32 %v8797_v5, %v8508_v52 }
 0x12c   :  { %v7132_v13 = vpop.eup %7131  ;;  %7151 = vrcp.f32 %v3291_v48  ;;  %v3296_v45 = vadd.f32 1.0, %v7130_v17  ;;  %11623 = vst [vmem:[#allocation11_spill] sm:$0xff] %v9017_v4  ;;  %v9024_v2 = vpop.f32.mrb[39].mxu1  ;;  %v9032_v17 = vadd.f32 %v8795_v30, %v8508_v52  ;;  %v5868_v4 = vmul.f32 -1.442695, %v9013_v53 }
 0x12d   :  { %v7134_v0 = vpop.eup %7133  ;;  %7153 = vrcp.f32 %v3168_v36  ;;  %v3166_v9 = vadd.f32 1.0, %v7132_v13  ;;  %11624 = vst [vmem:[#allocation12_spill] sm:$0xff] %v9024_v2  ;;  %v9040_v2 = vadd.f32 %v8508_v52, %v8803_v43  ;;  %v9047_v5 = vadd.f32 %v8508_v52, %v8805_v44  ;;  %v9051_v43 = vpop.f32.mrb[40].mxu1 }
 0x12e   :  { %v7136_v15 = vpop.eup %7135  ;;  %7155 = vrcp.f32 %v3296_v45  ;;  %v3294_v48 = vadd.f32 1.0, %v7134_v0  ;;  %11626 = vst [vmem:[#allocation14_spill] sm:$0xff] %v9051_v43  ;;  %v5741_v1 = vmul.f32 -1.442695, %v9032_v17 }
 0x12f   :  { %v7138_v36 = vpop.eup %7137  ;;  %7157 = vrcp.f32 %v3166_v9  ;;  %v3169_v13 = vadd.f32 1.0, %v7136_v15  ;;  %v5738_v9 = vmul.f32 -1.442695, %v9022_v46  ;;  %v9049_v15 = vpop.f32.mrb[40].mxu0  ;;  %v5739_v43 = vmul.f32 -1.442695, %v9040_v2 }
 0x130   :  { %v7140_v45 = vpop.eup %7139  ;;  %7159 = vrcp.f32 %v3294_v48  ;;  %v3297_v0 = vadd.f32 1.0, %v7138_v36  ;;  %11625 = vst [vmem:[#allocation13_spill] sm:$0xff] %v9049_v15  ;;  %v5866_v36 = vmul.f32 -1.442695, %v9028_v63  ;;  %v5869_v15 = vmul.f32 -1.442695, %v9036_v3 }
 0x131   :  { %v7142_v30 = vpop.eup %7141  ;;  %7161 = vrcp.f32 %v3169_v13  ;;  %v3167_v51 = vadd.f32 1.0, %v7140_v45  ;;  %v9056_v13 = vpop.f32.mrb[41].mxu0 }
 0x132   :  { %v7144_v23 = vpop.eup %7143  ;;  %v3930_v48 = vmul.f32 %v7142_v30, %v8817_v50  ;;  %7163 = vrcp.f32 %v3297_v0  ;;  %11627 = vst [vmem:[#allocation15_spill] sm:$0xff] %v9056_v13  ;;  %v9058_v45 = vpop.f32.mrb[41].mxu1 }
 0x133   :  { %11628 = vst [vmem:[#allocation16_spill] sm:$0xff] %v9058_v45  ;;  %v7146_v38 = vpop.eup %7145  ;;  %v4058_v44 = vmul.f32 %v7144_v23, %v8826_v34  ;;  %7165 = vrcp.f32 %v3167_v51  ;;  %v9063_v12 = vpop.f32.mrb[42].mxu0  ;;  %v9070_v45 = vadd.f32 %v8819_v54, %v8508_v52 }
 0x134   :  { %11629 = vst [vmem:[#allocation17_spill] sm:$0xff] %v9063_v12  ;;  %v9065_v50 = vpop.f32.mrb[42].mxu1  ;;  %v7148_v0 = vpop.eup %7147  ;;  %v6242_v30 = vpack.c.bf16 %v3930_v48, %v3930_v48  ;;  %v3933_v37 = vmul.f32 %v7146_v38, %v8834_v25  ;;  %7167 = vpow2.f32 %v5863_v62  ;;  %v9085_v38 = vadd.f32 %v8821_v19, %v8508_v52 }
 0x135   :  { %11630 = vst [vmem:[#allocation18_spill] sm:$0xff] %v9065_v50  ;;  %v9072_v13 = vpop.f32.mrb[43].mxu0  ;;  %v9074_v34 = vpop.f32.mrb[43].mxu1  ;;  %v6370_v51 = vpack.c.bf16 %v4058_v44, %v4058_v44  ;;  %v4061_v39 = vmul.f32 %v7148_v0, %v8838_v61  ;;  %7169 = vpow2.f32 %v5740_v21  ;;  %v5867_v50 = vmul.f32 -1.442695, %v9047_v5 }
 0x136   :  { %v7150_v23 = vpop.eup %7149  ;;  %5211 = vst.msk [vmem:[%s11613_s3 + $0x30] sm:$0xf] %vm5198_vm3, %v6242_v30  ;;  %v6245_v25 = vpack.c.bf16 %v3933_v37, %v3933_v37  ;;  %7171 = vpow2.f32 %v5868_v4  ;;  %v9094_v37 = vadd.f32 %v8508_v52, %v8828_v56  ;;  %v9118_v48 = vpop.f32.mrb[44].mxu1  ;;  %v5872_v0 = vmul.f32 -1.442695, %v9085_v38 }
 0x137   :  { %v7152_v12 = vpop.eup %7151  ;;  %v3931_v54 = vmul.f32 %v7150_v23, %v8846_v35  ;;  %5339 = vst.msk [vmem:[%s11613_s3 + $0x230] sm:$0xf] %vm5198_vm3, %v6370_v51  ;;  %v6373_v61 = vpack.c.bf16 %v4061_v39, %v4061_v39  ;;  %7173 = vpow2.f32 %v5738_v9  ;;  %v9104_v39 = vld [vmem:[%s11612_s2] ss:$0 sm:$0xff]  ;;  %v9116_v9 = vpop.f32.mrb[44].mxu0 }
 0x138   :  { %v7154_v62 = vpop.eup %7153  ;;  %v4059_v21 = vmul.f32 %v7152_v12, %v8850_v33  ;;  %5214 = vst.msk [vmem:[%s11613_s3 + $0x3c] sm:$0xf] %vm5198_vm3, %v6245_v25  ;;  %7175 = vpow2.f32 %v5866_v36  ;;  %v9108_v33 = vadd.f32 %v9104_v39, %v8830_v20  ;;  %v5742_v25 = vmul.f32 -1.442695, %v9094_v37 }
 0x139   :  { %v7156_v35 = vpop.eup %7155  ;;  %v6243_v19 = vpack.c.bf16 %v3931_v54, %v3931_v54  ;;  %v3936_v4 = vmul.f32 %v7154_v62, %v8858_v49  ;;  %5342 = vst.msk [vmem:[%s11613_s3 + $0x23c] sm:$0xf] %vm5198_vm3, %v6373_v61  ;;  %7177 = vpow2.f32 %v5741_v1  ;;  %v5744_v49 = vmul.f32 -1.442695, %v9070_v45  ;;  %v9128_v1 = vpop.f32.mrb[45].mxu1 }
 0x13a   :  { %v7158_v52 = vpop.eup %7157  ;;  %v6371_v56 = vpack.c.bf16 %v4059_v21, %v4059_v21  ;;  %v4064_v12 = vmul.f32 %v7156_v35, %v8862_v58  ;;  %7179 = vpow2.f32 %v5869_v15  ;;  %v9126_v58 = vpop.f32.mrb[45].mxu0  ;;  %v5870_v21 = vmul.f32 -1.442695, %v9108_v33 }
 0x13b   :  { %v7160_v36 = vpop.eup %7159  ;;  %5212 = vst.msk [vmem:[%s11613_s3 + $0x34] sm:$0xf] %vm5198_vm3, %v6243_v19  ;;  %v6248_v20 = vpack.c.bf16 %v3936_v4, %v3936_v4  ;;  %v3934_v44 = vmul.f32 %v7158_v52, %v8867_v32  ;;  %7181 = vpow2.f32 %v5739_v43  ;;  %v9136_v32 = vpop.f32.mrb[46].mxu0 }
 0x13c   :  { %v7162_v30 = vpop.eup %7161  ;;  %5340 = vst.msk [vmem:[%s11613_s3 + $0x234] sm:$0xf] %vm5198_vm3, %v6371_v56  ;;  %v6376_v23 = vpack.c.bf16 %v4064_v12, %v4064_v12  ;;  %v4062_v51 = vmul.f32 %v7160_v36, %v8890_v40  ;;  %v9138_v15 = vpop.f32.mrb[46].mxu1  ;;  %7183 = vpow2.f32 %v5867_v50 }
 0x13d   :  { %v7164_v54 = vpop.eup %7163  ;;  %5217 = vst.msk [vmem:[%s11613_s3 + $0x48] sm:$0xf] %vm5198_vm3, %v6248_v20  ;;  %v6246_v62 = vpack.c.bf16 %v3934_v44, %v3934_v44  ;;  %v3937_v61 = vmul.f32 %v7162_v30, %v8903_v16  ;;  %v9146_v40 = vpop.f32.mrb[47].mxu0  ;;  %7185 = vpow2.f32 %v5744_v49 }
 0x13e   :  { %v9148_v43 = vpop.f32.mrb[47].mxu1  ;;  %v7166_v35 = vpop.eup %7165  ;;  %5345 = vst.msk [vmem:[%s11613_s3 + $0x248] sm:$0xf] %vm5198_vm3, %v6376_v23  ;;  %v6374_v19 = vpack.c.bf16 %v4062_v51, %v4062_v51  ;;  %v4065_v4 = vmul.f32 %v7164_v54, %v8916_v22  ;;  %7187 = vpow2.f32 %v5872_v0 }
 0x13f   :  { %v7168_v52 = vpop.eup %7167  ;;  %5215 = vst.msk [vmem:[%s11613_s3 + $0x40] sm:$0xf] %vm5198_vm3, %v6246_v62  ;;  %v6249_v16 = vpack.c.bf16 %v3937_v61, %v3937_v61  ;;  %v3935_v50 = vmul.f32 %v7166_v35, %v8925_v8  ;;  %7189 = vpow2.f32 %v5742_v25  ;;  %v9172_v0 = vpop.f32.mrb[48].mxu0  ;;  %v9182_v25 = vadd.f32 %v9104_v39, %v8840_v26 }
 0x140   :  { %v7170_v56 = vpop.eup %7169  ;;  %5343 = vst.msk [vmem:[%s11613_s3 + $0x240] sm:$0xf] %vm5198_vm3, %v6374_v19  ;;  %v6377_v12 = vpack.c.bf16 %v4065_v4, %v4065_v4  ;;  %v3295_v36 = vadd.f32 1.0, %v7168_v52  ;;  %7191 = vpow2.f32 %v5870_v21  ;;  %v9174_v30 = vpop.f32.mrb[48].mxu1  ;;  %v9190_v35 = vadd.f32 %v9104_v39, %v8842_v28 }
 0x141   :  { %v7172_v22 = vpop.eup %7171  ;;  %5218 = vst.msk [vmem:[%s11613_s3 + $0x4c] sm:$0xf] %vm5198_vm3, %v6249_v16  ;;  %v6247_v49 = vpack.c.bf16 %v3935_v50, %v3935_v50  ;;  %v3172_v20 = vadd.f32 1.0, %v7170_v56  ;;  %v9184_v54 = vpop.f32.mrb[49].mxu0  ;;  %v9198_v26 = vadd.f32 %v9104_v39, %v8852_v41 }
 0x142   :  { %v7174_v8 = vpop.eup %7173  ;;  %5346 = vst.msk [vmem:[%s11613_s3 + $0x24c] sm:$0xf] %vm5198_vm3, %v6377_v12  ;;  %7193 = vrcp.f32 %v3295_v36  ;;  %v3300_v44 = vadd.f32 1.0, %v7172_v22  ;;  %11631 = vst [vmem:[#allocation19_spill] sm:$0xff] %v9184_v54  ;;  %v9186_v62 = vpop.f32.mrb[49].mxu1 }
 0x143   :  { %v7176_v23 = vpop.eup %7175  ;;  %5216 = vst.msk [vmem:[%s11613_s3 + $0x44] sm:$0xf] %vm5198_vm3, %v6247_v49  ;;  %7195 = vrcp.f32 %v3172_v20  ;;  %v3170_v51 = vadd.f32 1.0, %v7174_v8  ;;  %11632 = vst [vmem:[#allocation20_spill] sm:$0xff] %v9186_v62  ;;  %v9192_v19 = vpop.f32.mrb[50].mxu0  ;;  %v9207_v20 = vadd.f32 %v9104_v39, %v8854_v42 }
 0x144   :  { %v7178_v61 = vpop.eup %7177  ;;  %7197 = vrcp.f32 %v3300_v44  ;;  %v3298_v21 = vadd.f32 1.0, %v7176_v23  ;;  %11633 = vst [vmem:[#allocation21_spill] sm:$0xff] %v9192_v19  ;;  %v9194_v4 = vpop.f32.mrb[50].mxu1  ;;  %v5745_v49 = vmul.f32 -1.442695, %v9182_v25  ;;  %v11637_v23 = vld [vmem:[#allocation2_spill] sm:$0xff] }
 0x145   :  { %11634 = vst [vmem:[#allocation22_spill] sm:$0xff] %v9194_v4  ;;  %v7180_v52 = vpop.eup %7179  ;;  %7199 = vrcp.f32 %v3170_v51  ;;  %v3173_v16 = vadd.f32 1.0, %v7178_v61  ;;  %v9200_v50 = vpop.f32.mrb[51].mxu0  ;;  %v5873_v44 = vmul.f32 -1.442695, %v9190_v35  ;;  %v9212_v51 = vadd.f32 %v9104_v39, %v11637_v23 }
 0x146   :  { %11635 = vst [vmem:[#allocation23_spill] sm:$0xff] %v9200_v50  ;;  %v9202_v56 = vpop.f32.mrb[51].mxu1  ;;  %v7182_v12 = vpop.eup %7181  ;;  %7201 = vrcp.f32 %v3298_v21  ;;  %v3301_v36 = vadd.f32 1.0, %v7180_v52  ;;  %v5743_v52 = vmul.f32 -1.442695, %v9198_v26 }
 0x147   :  { %11636 = vst [vmem:[#allocation24_spill] sm:$0xff] %v9202_v56  ;;  %v7184_v28 = vpop.eup %7183  ;;  %7203 = vrcp.f32 %v3173_v16  ;;  %v3171_v22 = vadd.f32 1.0, %v7182_v12  ;;  %v11638_v16 = vld [vmem:[#allocation3_spill] sm:$0xff]  ;;  %v9227_v23 = vpop.f32.mrb[52].mxu0  ;;  %v5748_v19 = vmul.f32 -1.442695, %v9212_v51 }
 0x148   :  { %v7186_v8 = vpop.eup %7185  ;;  %7205 = vrcp.f32 %v3301_v36  ;;  %v3299_v41 = vadd.f32 1.0, %v7184_v28  ;;  %v9217_v12 = vadd.f32 %v9104_v39, %v11638_v16  ;;  %v9221_v36 = vadd.f32 %v9104_v39, %v8883_v11  ;;  %11639 = vst [vmem:[#allocation2_spill] sm:$0xff] %v9227_v23  ;;  %v9232_v4 = vpop.f32.mrb[53].mxu0 }
 0x149   :  { %v7188_v61 = vpop.eup %7187  ;;  %7207 = vrcp.f32 %v3171_v22  ;;  %v3176_v21 = vadd.f32 1.0, %v7186_v8  ;;  %v9225_v28 = vadd.f32 %v9104_v39, %v8885_v59  ;;  %v9229_v22 = vpop.f32.mrb[52].mxu1  ;;  %v5871_v16 = vmul.f32 -1.442695, %v9207_v20  ;;  %11641 = vst [vmem:[#allocation25_spill] sm:$0xff] %v9232_v4 }
 0x14a   :  { %v7190_v42 = vpop.eup %7189  ;;  %7209 = vrcp.f32 %v3299_v41  ;;  %v3304_v56 = vadd.f32 1.0, %v7188_v61  ;;  %11640 = vst [vmem:[#allocation3_spill] sm:$0xff] %v9229_v22  ;;  %v9234_v41 = vpop.f32.mrb[53].mxu1 }
 0x14b   :  { %v7192_v8 = vpop.eup %7191  ;;  %7211 = vrcp.f32 %v3176_v21  ;;  %v3174_v50 = vadd.f32 1.0, %v7190_v42  ;;  %11642 = vst [vmem:[#allocation26_spill] sm:$0xff] %v9234_v41  ;;  %v9237_v59 = vpop.f32.mrb[54].mxu0  ;;  %v5876_v21 = vmul.f32 -1.442695, %v9217_v12  ;;  %v9245_v42 = vadd.f32 %v9104_v39, %v8892_v29 }
 0x14c   :  { %v7194_v61 = vpop.eup %7193  ;;  %7213 = vrcp.f32 %v3304_v56  ;;  %v3302_v11 = vadd.f32 1.0, %v7192_v8  ;;  %11643 = vst [vmem:[#allocation27_spill] sm:$0xff] %v9237_v59  ;;  %v9239_v62 = vpop.f32.mrb[54].mxu1  ;;  %v5874_v59 = vmul.f32 -1.442695, %v9225_v28  ;;  %v9257_v29 = vadd.f32 %v9104_v39, %v8894_v18 }
 0x14d   :  { %11644 = vst [vmem:[#allocation28_spill] sm:$0xff] %v9239_v62  ;;  %v7196_v23 = vpop.eup %7195  ;;  %v4063_v22 = vmul.f32 %v7194_v61, %v8995_v47  ;;  %7215 = vrcp.f32 %v3174_v50  ;;  %v9247_v41 = vpop.f32.mrb[55].mxu0  ;;  %v5746_v62 = vmul.f32 -1.442695, %v9221_v36  ;;  %v5749_v18 = vmul.f32 -1.442695, %v9245_v42 }
 0x14e   :  { %11645 = vst [vmem:[#allocation29_spill] sm:$0xff] %v9247_v41  ;;  %v9249_v56 = vpop.f32.mrb[55].mxu1  ;;  %v7198_v8 = vpop.eup %7197  ;;  %v3940_v4 = vmul.f32 %v7196_v23, %v9009_v6  ;;  %7217 = vrcp.f32 %v3302_v11  ;;  %v9262_v6 = vadd.f32 %v9104_v39, %v8905_v27 }
 0x14f   :  { %11646 = vst [vmem:[#allocation30_spill] sm:$0xff] %v9249_v56  ;;  %v7200_v47 = vpop.eup %7199  ;;  %v6375_v50 = vpack.c.bf16 %v4063_v22, %v4063_v22  ;;  %v4068_v61 = vmul.f32 %v7198_v8, %v9013_v53  ;;  %7219 = vpow2.f32 %v5745_v49  ;;  %v9279_v22 = vpop.f32.mrb[56].mxu0 }
 0x150   :  { %v7202_v41 = vpop.eup %7201  ;;  %v6252_v54 = vpack.c.bf16 %v3940_v4, %v3940_v4  ;;  %v3938_v56 = vmul.f32 %v7200_v47, %v9022_v46  ;;  %7221 = vpow2.f32 %v5873_v44  ;;  %v9277_v44 = vadd.f32 %v9104_v39, %v8907_v57  ;;  %v9292_v57 = vpop.f32.mrb[57].mxu0 }
 0x151   :  { %v7204_v23 = vpop.eup %7203  ;;  %5344 = vst.msk [vmem:[%s11613_s3 + $0x244] sm:$0xf] %vm5198_vm3, %v6375_v50  ;;  %v6380_v53 = vpack.c.bf16 %v4068_v61, %v4068_v61  ;;  %v4066_v49 = vmul.f32 %v7202_v41, %v9028_v63  ;;  %7223 = vpow2.f32 %v5743_v52  ;;  %v9281_v63 = vpop.f32.mrb[56].mxu1 }
 0x152   :  { %v7206_v4 = vpop.eup %7205  ;;  %5221 = vst.msk [vmem:[%s11613_s3 + $0x58] sm:$0xf] %vm5198_vm3, %v6252_v54  ;;  %v6250_v27 = vpack.c.bf16 %v3938_v56, %v3938_v56  ;;  %v3941_v46 = vmul.f32 %v7204_v23, %v9032_v17  ;;  %7225 = vpow2.f32 %v5871_v16  ;;  %v9290_v17 = vadd.f32 %v9104_v39, %v8945_v7  ;;  %v9294_v16 = vpop.f32.mrb[57].mxu1 }
 0x153   :  { %v7208_v52 = vpop.eup %7207  ;;  %5349 = vst.msk [vmem:[%s11613_s3 + $0x258] sm:$0xf] %vm5198_vm3, %v6380_v53  ;;  %v6378_v41 = vpack.c.bf16 %v4066_v49, %v4066_v49  ;;  %v4069_v54 = vmul.f32 %v7206_v4, %v9036_v3  ;;  %7227 = vpow2.f32 %v5748_v19  ;;  %v5877_v3 = vmul.f32 -1.442695, %v9257_v29  ;;  %v9302_v19 = vpop.f32.mrb[58].mxu0 }
 0x154   :  { %v7210_v11 = vpop.eup %7209  ;;  %5219 = vst.msk [vmem:[%s11613_s3 + $0x50] sm:$0xf] %vm5198_vm3, %v6250_v27  ;;  %v6253_v56 = vpack.c.bf16 %v3941_v46, %v3941_v46  ;;  %v3939_v8 = vmul.f32 %v7208_v52, %v9040_v2  ;;  %7229 = vpow2.f32 %v5876_v21  ;;  %v9304_v7 = vpop.f32.mrb[58].mxu1  ;;  %v5747_v23 = vmul.f32 -1.442695, %v9262_v6 }
 0x155   :  { %v7212_v47 = vpop.eup %7211  ;;  %5347 = vst.msk [vmem:[%s11613_s3 + $0x250] sm:$0xf] %vm5198_vm3, %v6378_v41  ;;  %v6381_v50 = vpack.c.bf16 %v4069_v54, %v4069_v54  ;;  %v4067_v61 = vmul.f32 %v7210_v11, %v9047_v5  ;;  %7231 = vpow2.f32 %v5746_v62  ;;  %v9312_v2 = vpop.f32.mrb[59].mxu0  ;;  %v5875_v27 = vmul.f32 -1.442695, %v9277_v44 }
 0x156   :  { %v9314_v21 = vpop.f32.mrb[59].mxu1  ;;  %v7214_v53 = vpop.eup %7213  ;;  %5222 = vst.msk [vmem:[%s11613_s3 + $0x5c] sm:$0xf] %vm5198_vm3, %v6253_v56  ;;  %v6251_v49 = vpack.c.bf16 %v3939_v8, %v3939_v8  ;;  %v3944_v4 = vmul.f32 %v7212_v47, %v9070_v45  ;;  %7233 = vpow2.f32 %v5874_v59  ;;  %v5752_v52 = vmul.f32 -1.442695, %v9290_v17 }
 0x157   :  { %v7216_v5 = vpop.eup %7215  ;;  %5350 = vst.msk [vmem:[%s11613_s3 + $0x25c] sm:$0xf] %vm5198_vm3, %v6381_v50  ;;  %v6379_v62 = vpack.c.bf16 %v4067_v61, %v4067_v61  ;;  %v4072_v46 = vmul.f32 %v7214_v53, %v9085_v38  ;;  %7235 = vpow2.f32 %v5749_v18 }
 0x158   :  { %v7218_v41 = vpop.eup %7217  ;;  %5220 = vst.msk [vmem:[%s11613_s3 + $0x54] sm:$0xf] %vm5198_vm3, %v6251_v49  ;;  %v6256_v45 = vpack.c.bf16 %v3944_v4, %v3944_v4  ;;  %v3942_v59 = vmul.f32 %v7216_v5, %v9094_v37  ;;  %7237 = vpow2.f32 %v5877_v3  ;;  %v9342_v37 = vpop.f32.mrb[60].mxu0 }
 0x159   :  { %v7220_v54 = vpop.eup %7219  ;;  %5348 = vst.msk [vmem:[%s11613_s3 + $0x254] sm:$0xf] %vm5198_vm3, %v6379_v62  ;;  %v6384_v38 = vpack.c.bf16 %v4072_v46, %v4072_v46  ;;  %v4070_v18 = vmul.f32 %v7218_v41, %v9108_v33  ;;  %7239 = vpow2.f32 %v5747_v23  ;;  %11647 = vst [vmem:[#allocation31_spill] sm:$0xff] %v9342_v37  ;;  %v9344_v3 = vpop.f32.mrb[60].mxu1 }
 0x15a   :  { %v7222_v11 = vpop.eup %7221  ;;  %5225 = vst.msk [vmem:[%s11613_s3 + $0x68] sm:$0xf] %vm5198_vm3, %v6256_v45  ;;  %v6254_v56 = vpack.c.bf16 %v3942_v59, %v3942_v59  ;;  %v3177_v8 = vadd.f32 1.0, %v7220_v54  ;;  %7241 = vpow2.f32 %v5875_v27  ;;  %11648 = vst [vmem:[#allocation32_spill] sm:$0xff] %v9344_v3  ;;  %v9350_v61 = vpop.f32.mrb[61].mxu0  ;;  %v9372_v59 = vadd.f32 %v9104_v39, %v8947_v14 }
 0x15b   :  { %v7224_v47 = vpop.eup %7223  ;;  %5353 = vst.msk [vmem:[%s11613_s3 + $0x268] sm:$0xf] %vm5198_vm3, %v6384_v38  ;;  %v6382_v33 = vpack.c.bf16 %v4070_v18, %v4070_v18  ;;  %v3305_v50 = vadd.f32 1.0, %v7222_v11  ;;  %7243 = vpow2.f32 %v5752_v52  ;;  %11649 = vst [vmem:[#allocation33_spill] sm:$0xff] %v9350_v61  ;;  %v9352_v23 = vpop.f32.mrb[61].mxu1 }
 0x15c   :  { %11650 = vst [vmem:[#allocation34_spill] sm:$0xff] %v9352_v23  ;;  %v7226_v53 = vpop.eup %7225  ;;  %5223 = vst.msk [vmem:[%s11613_s3 + $0x60] sm:$0xf] %vm5198_vm3, %v6254_v56  ;;  %7245 = vrcp.f32 %v3177_v8  ;;  %v3175_v49 = vadd.f32 1.0, %v7224_v47  ;;  %v9358_v4 = vpop.f32.mrb[62].mxu0  ;;  %v9376_v47 = vadd.f32 %v9104_v39, %v8955_v55 }
 0x15d   :  { %11651 = vst [vmem:[#allocation35_spill] sm:$0xff] %v9358_v4  ;;  %v9360_v27 = vpop.f32.mrb[62].mxu1  ;;  %v7228_v5 = vpop.eup %7227  ;;  %5351 = vst.msk [vmem:[%s11613_s3 + $0x260] sm:$0xf] %vm5198_vm3, %v6382_v33  ;;  %7247 = vrcp.f32 %v3305_v50  ;;  %v3303_v62 = vadd.f32 1.0, %v7226_v53  ;;  %v9380_v33 = vadd.f32 %v9104_v39, %v8957_v24  ;;  %v9393_v24 = vadd.f32 %v9104_v39, %v8966_v10 }
 0x15e   :  { %11652 = vst [vmem:[#allocation36_spill] sm:$0xff] %v9360_v27  ;;  %v9366_v46 = vpop.f32.mrb[63].mxu0  ;;  %v9368_v52 = vpop.f32.mrb[63].mxu1  ;;  %7249 = vrcp.f32 %v3175_v49  ;;  %v3180_v45 = vadd.f32 1.0, %v7228_v5  ;;  %v5880_v53 = vmul.f32 -1.442695, %v9372_v59  ;;  %v9385_v49 = vadd.f32 %v9104_v39, %v8964_v31 }
 0x15f   :  { %11653 = vst [vmem:[#allocation37_spill] sm:$0xff] %v9366_v46  ;;  %11654 = vst [vmem:[#allocation38_spill] sm:$0xff] %v9368_v52  ;;  %v7230_v41 = vpop.eup %7229  ;;  %7251 = vrcp.f32 %v3303_v62  ;;  %v9387_v5 = vpop.f32.mrb[64].mxu0 }
 0x160   :  { %v7232_v54 = vpop.eup %7231  ;;  %v3308_v38 = vadd.f32 1.0, %v7230_v41  ;;  %7253 = vrcp.f32 %v3180_v45  ;;  %11655 = vst [vmem:[#allocation39_spill] sm:$0xff] %v9387_v5  ;;  %v9389_v62 = vpop.f32.mrb[64].mxu1  ;;  %v9397_v45 = vadd.f32 %v9104_v39, %v8973_v60  ;;  %v11660_v60 = vld [vmem:[#allocation6_spill] sm:$0xff] }
 0x161   :  { %v7234_v18 = vpop.eup %7233  ;;  %v3178_v11 = vadd.f32 1.0, %v7232_v54  ;;  %11656 = vst [vmem:[#allocation40_spill] sm:$0xff] %v9389_v62  ;;  %v9399_v54 = vpop.f32.mrb[65].mxu0  ;;  %v5750_v62 = vmul.f32 -1.442695, %v9376_v47  ;;  %v9412_v5 = vadd.f32 %v9104_v39, %v11660_v60 }
 0x162   :  { %v7236_v56 = vpop.eup %7235  ;;  %7255 = vrcp.f32 %v3308_v38  ;;  %v3306_v8 = vadd.f32 1.0, %v7234_v18  ;;  %11657 = vst [vmem:[#allocation41_spill] sm:$0xff] %v9399_v54  ;;  %v11658_v18 = vld [vmem:[#allocation4_spill] sm:$0xff]  ;;  %v9416_v52 = vpop.f32.mrb[65].mxu1 }
 0x163   :  { %v7238_v50 = vpop.eup %7237  ;;  %7257 = vrcp.f32 %v3178_v11  ;;  %v3181_v14 = vadd.f32 1.0, %v7236_v56  ;;  %v9403_v11 = vadd.f32 %v9104_v39, %v11658_v18  ;;  %v11659_v56 = vld [vmem:[#allocation5_spill] sm:$0xff]  ;;  %v5753_v18 = vmul.f32 -1.442695, %v9385_v49  ;;  %11661 = vst [vmem:[#allocation4_spill] sm:$0xff] %v9416_v52  ;;  %v9424_v4 = vpop.f32.mrb[66].mxu0 }
 0x164   :  { %v7240_v41 = vpop.eup %7239  ;;  %7259 = vrcp.f32 %v3306_v8  ;;  %v3309_v55 = vadd.f32 1.0, %v7238_v50  ;;  %v9407_v8 = vadd.f32 %v9104_v39, %v11659_v56  ;;  %11662 = vst [vmem:[#allocation5_spill] sm:$0xff] %v9424_v4  ;;  %v9426_v23 = vpop.f32.mrb[66].mxu1 }
 0x165   :  { %v7242_v38 = vpop.eup %7241  ;;  %7261 = vrcp.f32 %v3181_v14  ;;  %v3179_v31 = vadd.f32 1.0, %v7240_v41  ;;  %v5878_v41 = vmul.f32 -1.442695, %v9380_v33  ;;  %11663 = vst [vmem:[#allocation6_spill] sm:$0xff] %v9426_v23  ;;  %v9435_v37 = vpop.f32.mrb[67].mxu0 }
 0x166   :  { %v7244_v50 = vpop.eup %7243  ;;  %7263 = vrcp.f32 %v3309_v55  ;;  %v3307_v10 = vadd.f32 1.0, %v7242_v38  ;;  %v5881_v55 = vmul.f32 -1.442695, %v9393_v24  ;;  %v5751_v38 = vmul.f32 -1.442695, %v9397_v45  ;;  %v9437_v4 = vpop.f32.mrb[67].mxu1 }
 0x167   :  { %v7246_v54 = vpop.eup %7245  ;;  %7265 = vrcp.f32 %v3179_v31  ;;  %v3184_v14 = vadd.f32 1.0, %v7244_v50  ;;  %v5879_v31 = vmul.f32 -1.442695, %v9403_v11  ;;  %v5756_v50 = vmul.f32 -1.442695, %v9407_v8 }
 0x168   :  { %v7248_v56 = vpop.eup %7247  ;;  %v3945_v46 = vmul.f32 %v7246_v54, %v9182_v25  ;;  %7267 = vrcp.f32 %v3307_v10  ;;  %v5884_v54 = vmul.f32 -1.442695, %v9412_v5 }
 0x169   :  { %v7250_v27 = vpop.eup %7249  ;;  %v4073_v60 = vmul.f32 %v7248_v56, %v9190_v35  ;;  %7269 = vrcp.f32 %v3184_v14  ;;  %v11664_v14 = vld [vmem:[#allocation7_spill] sm:$0xff] }
 0x16a   :  { %v7252_v52 = vpop.eup %7251  ;;  %v6257_v61 = vpack.c.bf16 %v3945_v46, %v3945_v46  ;;  %v3943_v25 = vmul.f32 %v7250_v27, %v9198_v26  ;;  %7271 = vpow2.f32 %v5880_v53  ;;  %v9433_v56 = vadd.f32 %v9104_v39, %v11664_v14 }
 0x16b   :  { %v7254_v10 = vpop.eup %7253  ;;  %v6385_v3 = vpack.c.bf16 %v4073_v60, %v4073_v60  ;;  %v4071_v35 = vmul.f32 %v7252_v52, %v9207_v20  ;;  %7273 = vpow2.f32 %v5750_v62  ;;  %v11665_v20 = vld [vmem:[#allocation8_spill] sm:$0xff]  ;;  %v11666_v60 = vld [vmem:[#allocation9_spill] sm:$0xff] }
 0x16c   :  { %v7256_v23 = vpop.eup %7255  ;;  %5226 = vst.msk [vmem:[%s11613_s3 + $0x6c] sm:$0xf] %vm5198_vm3, %v6257_v61  ;;  %v6255_v26 = vpack.c.bf16 %v3943_v25, %v3943_v25  ;;  %v3948_v27 = vmul.f32 %v7254_v10, %v9212_v51  ;;  %7275 = vpow2.f32 %v5878_v41  ;;  %v9446_v46 = vadd.f32 %v9104_v39, %v11665_v20  ;;  %v11667_v10 = vld [vmem:[#allocation10_spill] sm:$0xff] }
 0x16d   :  { %v7258_v52 = vpop.eup %7257  ;;  %5354 = vst.msk [vmem:[%s11613_s3 + $0x26c] sm:$0xf] %vm5198_vm3, %v6385_v3  ;;  %v6383_v53 = vpack.c.bf16 %v4071_v35, %v4071_v35  ;;  %v4076_v62 = vmul.f32 %v7256_v23, %v9217_v12  ;;  %7277 = vpow2.f32 %v5753_v18  ;;  %v9455_v61 = vadd.f32 %v9104_v39, %v11666_v60 }
 0x16e   :  { %v7260_v51 = vpop.eup %7259  ;;  %5224 = vst.msk [vmem:[%s11613_s3 + $0x64] sm:$0xf] %vm5198_vm3, %v6255_v26  ;;  %v6260_v41 = vpack.c.bf16 %v3948_v27, %v3948_v27  ;;  %v3946_v25 = vmul.f32 %v7258_v52, %v9221_v36  ;;  %7279 = vpow2.f32 %v5881_v55  ;;  %v9464_v3 = vadd.f32 %v9104_v39, %v11667_v10  ;;  %v9484_v52 = vpop.f32.mrb[68].mxu0 }
 0x16f   :  { %v7262_v12 = vpop.eup %7261  ;;  %5352 = vst.msk [vmem:[%s11613_s3 + $0x264] sm:$0xf] %vm5198_vm3, %v6383_v53  ;;  %v6388_v23 = vpack.c.bf16 %v4076_v62, %v4076_v62  ;;  %v4074_v18 = vmul.f32 %v7260_v51, %v9225_v28  ;;  %7281 = vpow2.f32 %v5751_v38  ;;  %v5754_v35 = vmul.f32 -1.442695, %v9433_v56  ;;  %v9486_v53 = vpop.f32.mrb[68].mxu1 }
 0x170   :  { %v7264_v14 = vpop.eup %7263  ;;  %5229 = vst.msk [vmem:[%s11613_s3 + $0x78] sm:$0xf] %vm5198_vm3, %v6260_v41  ;;  %v6258_v36 = vpack.c.bf16 %v3946_v25, %v3946_v25  ;;  %v3949_v55 = vmul.f32 %v7262_v12, %v9245_v42  ;;  %7283 = vpow2.f32 %v5879_v31  ;;  %v5882_v26 = vmul.f32 -1.442695, %v9446_v46  ;;  %11668 = vst [vmem:[#allocation7_spill] sm:$0xff] %v9486_v53 }
 0x171   :  { %v7266_v27 = vpop.eup %7265  ;;  %5357 = vst.msk [vmem:[%s11613_s3 + $0x278] sm:$0xf] %vm5198_vm3, %v6388_v23  ;;  %v6386_v28 = vpack.c.bf16 %v4074_v18, %v4074_v18  ;;  %v4077_v38 = vmul.f32 %v7264_v14, %v9257_v29  ;;  %7285 = vpow2.f32 %v5756_v50  ;;  %v5757_v20 = vmul.f32 -1.442695, %v9455_v61  ;;  %v9494_v29 = vpop.f32.mrb[69].mxu0 }
 0x172   :  { %v7268_v42 = vpop.eup %7267  ;;  %5227 = vst.msk [vmem:[%s11613_s3 + $0x70] sm:$0xf] %vm5198_vm3, %v6258_v36  ;;  %v6261_v31 = vpack.c.bf16 %v3949_v55, %v3949_v55  ;;  %v3947_v62 = vmul.f32 %v7266_v27, %v9262_v6  ;;  %7287 = vpow2.f32 %v5884_v54  ;;  %v5885_v60 = vmul.f32 -1.442695, %v9464_v3  ;;  %11669 = vst [vmem:[#allocation8_spill] sm:$0xff] %v9494_v29  ;;  %v9496_v50 = vpop.f32.mrb[69].mxu1 }
 0x173   :  { %11670 = vst [vmem:[#allocation9_spill] sm:$0xff] %v9496_v50  ;;  %v7270_v51 = vpop.eup %7269  ;;  %5355 = vst.msk [vmem:[%s11613_s3 + $0x270] sm:$0xf] %vm5198_vm3, %v6386_v28  ;;  %v6389_v41 = vpack.c.bf16 %v4077_v38, %v4077_v38  ;;  %v4075_v25 = vmul.f32 %v7268_v42, %v9277_v44  ;;  %7289 = vpow2.f32 %v5754_v35  ;;  %v9503_v10 = vpop.f32.mrb[70].mxu0 }
 0x174   :  { %11671 = vst [vmem:[#allocation10_spill] sm:$0xff] %v9503_v10  ;;  %v9505_v6 = vpop.f32.mrb[70].mxu1  ;;  %v7272_v54 = vpop.eup %7271  ;;  %5230 = vst.msk [vmem:[%s11613_s3 + $0x7c] sm:$0xf] %vm5198_vm3, %v6261_v31  ;;  %v6259_v12 = vpack.c.bf16 %v3947_v62, %v3947_v62  ;;  %v3952_v23 = vmul.f32 %v7270_v51, %v9290_v17  ;;  %7291 = vpow2.f32 %v5882_v26  ;;  %v11675_v62 = vld [vmem:[#allocation11_spill] sm:$0xff] }
 0x175   :  { %11672 = vst [vmem:[#allocation42_spill] sm:$0xff] %v9505_v6  ;;  %v9512_v18 = vpop.f32.mrb[71].mxu0  ;;  %v9514_v14 = vpop.f32.mrb[71].mxu1  ;;  %5358 = vst.msk [vmem:[%s11613_s3 + $0x27c] sm:$0xf] %vm5198_vm3, %v6389_v41  ;;  %v6387_v35 = vpack.c.bf16 %v4075_v25, %v4075_v25  ;;  %v3312_v36 = vadd.f32 1.0, %v7272_v54  ;;  %7293 = vpow2.f32 %v5757_v20 }
 0x176   :  { %11673 = vst [vmem:[#allocation43_spill] sm:$0xff] %v9512_v18  ;;  %11674 = vst [vmem:[#allocation44_spill] sm:$0xff] %v9514_v14  ;;  %v7274_v44 = vpop.eup %7273  ;;  %v6264_v17 = vpack.c.bf16 %v3952_v23, %v3952_v23  ;;  %7295 = vpow2.f32 %v5885_v60  ;;  %v9534_v60 = vadd.f32 %v9104_v39, %v11675_v62 }
 0x177   :  { %v7276_v55 = vpop.eup %7275  ;;  %5228 = vst.msk [vmem:[%s11613_s3 + $0x74] sm:$0xf] %vm5198_vm3, %v6259_v12  ;;  %v3182_v26 = vadd.f32 1.0, %v7274_v44  ;;  %5356 = vst.msk [vmem:[%s11613_s3 + $0x274] sm:$0xf] %vm5198_vm3, %v6387_v35  ;;  %7297 = vrcp.f32 %v3312_v36  ;;  %v11676_v44 = vld [vmem:[#allocation12_spill] sm:$0xff] }
 0x178   :  { %v7278_v27 = vpop.eup %7277  ;;  %v3310_v28 = vadd.f32 1.0, %v7276_v55  ;;  %5233 = vst.msk [vmem:[%s11613_s3 + $0x88] sm:$0xf] %vm5198_vm3, %v6264_v17  ;;  %v9538_v35 = vadd.f32 %v9104_v39, %v11676_v44  ;;  %v11677_v36 = vld [vmem:[#allocation13_spill] sm:$0xff] }
 0x179   :  { %v7280_v38 = vpop.eup %7279  ;;  %7299 = vrcp.f32 %v3182_v26  ;;  %v3185_v20 = vadd.f32 1.0, %v7278_v27  ;;  %v9542_v55 = vadd.f32 %v9104_v39, %v11677_v36  ;;  %v5755_v27 = vmul.f32 -1.442695, %v9534_v60  ;;  %v11682_v36 = vld [vmem:[#allocation18_spill] sm:$0xff] }
 0x17a   :  { %v7282_v42 = vpop.eup %7281  ;;  %7301 = vrcp.f32 %v3310_v28  ;;  %v3313_v31 = vadd.f32 1.0, %v7280_v38  ;;  %v11678_v28 = vld [vmem:[#allocation14_spill] sm:$0xff] }
 0x17b   :  { %v7284_v51 = vpop.eup %7283  ;;  %7303 = vrcp.f32 %v3185_v20  ;;  %v3183_v41 = vadd.f32 1.0, %v7282_v42  ;;  %v9547_v38 = vadd.f32 %v9104_v39, %v11678_v28  ;;  %v9563_v28 = vadd.f32 %v9104_v39, %v11682_v36 }
 0x17c   :  { %v7286_v25 = vpop.eup %7285  ;;  %7305 = vrcp.f32 %v3313_v31  ;;  %v3311_v54 = vadd.f32 1.0, %v7284_v51  ;;  %v11679_v31 = vld [vmem:[#allocation15_spill] sm:$0xff]  ;;  %v11680_v51 = vld [vmem:[#allocation16_spill] sm:$0xff]  ;;  %v5760_v14 = vmul.f32 -1.442695, %v9542_v55 }
 0x17d   :  { %v7288_v12 = vpop.eup %7287  ;;  %7307 = vrcp.f32 %v3183_v41  ;;  %v3188_v23 = vadd.f32 1.0, %v7286_v25  ;;  %v9551_v62 = vadd.f32 %v9104_v39, %v11679_v31  ;;  %v9555_v41 = vadd.f32 %v9104_v39, %v11680_v51 }
 0x17e   :  { %v7290_v17 = vpop.eup %7289  ;;  %7309 = vrcp.f32 %v3311_v54  ;;  %v3316_v26 = vadd.f32 1.0, %v7288_v12  ;;  %v11681_v12 = vld [vmem:[#allocation17_spill] sm:$0xff]  ;;  %v5883_v31 = vmul.f32 -1.442695, %v9538_v35 }
 0x17f   :  { %v7292_v20 = vpop.eup %7291  ;;  %7311 = vrcp.f32 %v3188_v23  ;;  %v3186_v42 = vadd.f32 1.0, %v7290_v17  ;;  %v9559_v44 = vadd.f32 %v9104_v39, %v11681_v12 }
 0x180   :  { %v7294_v25 = vpop.eup %7293  ;;  %7313 = vrcp.f32 %v3316_v26  ;;  %v3314_v54 = vadd.f32 1.0, %v7292_v20  ;;  %v5888_v26 = vmul.f32 -1.442695, %v9547_v38  ;;  %v9570_v20 = vadd.f32 %v9104_v39, %v9072_v13 }
 0x181   :  { %v7296_v23 = vpop.eup %7295  ;;  %7315 = vrcp.f32 %v3186_v42  ;;  %v3189_v17 = vadd.f32 1.0, %v7294_v25  ;;  %v5758_v42 = vmul.f32 -1.442695, %v9551_v62  ;;  %v5886_v25 = vmul.f32 -1.442695, %v9555_v41 }
 0x182   :  { %v7298_v51 = vpop.eup %7297  ;;  %7317 = vrcp.f32 %v3314_v54  ;;  %v3317_v18 = vadd.f32 1.0, %v7296_v23  ;;  %v5761_v54 = vmul.f32 -1.442695, %v9559_v44  ;;  %v5889_v23 = vmul.f32 -1.442695, %v9563_v28 }
 0x183   :  { %v7300_v12 = vpop.eup %7299  ;;  %v4080_v36 = vmul.f32 %v7298_v51, %v9372_v59  ;;  %7319 = vrcp.f32 %v3189_v17  ;;  %v9581_v59 = vadd.f32 %v9104_v39, %v9074_v34  ;;  %v9592_v34 = vadd.f32 %v9104_v39, %v9116_v9 }
 0x184   :  { %v7302_v6 = vpop.eup %7301  ;;  %v3950_v10 = vmul.f32 %v7300_v12, %v9376_v47  ;;  %7321 = vrcp.f32 %v3317_v18  ;;  %v5759_v47 = vmul.f32 -1.442695, %v9570_v20 }
 0x185   :  { %v7304_v50 = vpop.eup %7303  ;;  %v6392_v29 = vpack.c.bf16 %v4080_v36, %v4080_v36  ;;  %v4078_v13 = vmul.f32 %v7302_v6, %v9380_v33  ;;  %7323 = vpow2.f32 %v5755_v27 }
 0x186   :  { %v7306_v17 = vpop.eup %7305  ;;  %v6262_v51 = vpack.c.bf16 %v3950_v10, %v3950_v10  ;;  %v3953_v53 = vmul.f32 %v7304_v50, %v9385_v49  ;;  %7325 = vpow2.f32 %v5883_v31  ;;  %v9594_v10 = vpop.f32.mrb[72].mxu0 }
 0x187   :  { %v7308_v18 = vpop.eup %7307  ;;  %5361 = vst.msk [vmem:[%s11613_s3 + $0x288] sm:$0xf] %vm5198_vm3, %v6392_v29  ;;  %v6390_v12 = vpack.c.bf16 %v4078_v13, %v4078_v13  ;;  %v4081_v33 = vmul.f32 %v7306_v17, %v9393_v24  ;;  %7327 = vpow2.f32 %v5760_v14  ;;  %v9596_v49 = vpop.f32.mrb[72].mxu1  ;;  %v9605_v24 = vadd.f32 %v9104_v39, %v9118_v48 }
 0x188   :  { %v7310_v50 = vpop.eup %7309  ;;  %5231 = vst.msk [vmem:[%s11613_s3 + $0x80] sm:$0xf] %vm5198_vm3, %v6262_v51  ;;  %v6265_v6 = vpack.c.bf16 %v3953_v53, %v3953_v53  ;;  %v3951_v29 = vmul.f32 %v7308_v18, %v9397_v45  ;;  %7329 = vpow2.f32 %v5888_v26  ;;  %v9607_v9 = vpop.f32.mrb[73].mxu0  ;;  %v9618_v45 = vadd.f32 %v9104_v39, %v9126_v58 }
 0x189   :  { %v9609_v14 = vpop.f32.mrb[73].mxu1  ;;  %v7312_v27 = vpop.eup %7311  ;;  %5359 = vst.msk [vmem:[%s11613_s3 + $0x280] sm:$0xf] %vm5198_vm3, %v6390_v12  ;;  %v6393_v31 = vpack.c.bf16 %v4081_v33, %v4081_v33  ;;  %v4079_v53 = vmul.f32 %v7310_v50, %v9403_v11  ;;  %7331 = vpow2.f32 %v5758_v42  ;;  %v5887_v11 = vmul.f32 -1.442695, %v9581_v59 }
 0x18a   :  { %v9620_v48 = vpop.f32.mrb[74].mxu0  ;;  %v9622_v26 = vpop.f32.mrb[74].mxu1  ;;  %5234 = vst.msk [vmem:[%s11613_s3 + $0x8c] sm:$0xf] %vm5198_vm3, %v6265_v6  ;;  %v6263_v13 = vpack.c.bf16 %v3951_v29, %v3951_v29  ;;  %v3956_v17 = vmul.f32 %v7312_v27, %v9407_v8  ;;  %7333 = vpow2.f32 %v5886_v25  ;;  %v5764_v12 = vmul.f32 -1.442695, %v9592_v34 }
 0x18b   :  { %v7314_v36 = vpop.eup %7313  ;;  %v9630_v42 = vpop.f32.mrb[75].mxu0  ;;  %5362 = vst.msk [vmem:[%s11613_s3 + $0x28c] sm:$0xf] %vm5198_vm3, %v6393_v31  ;;  %v6391_v51 = vpack.c.bf16 %v4079_v53, %v4079_v53  ;;  %7335 = vpow2.f32 %v5761_v54  ;;  %v5892_v50 = vmul.f32 -1.442695, %v9605_v24 }
 0x18c   :  { %v9632_v39 = vpop.f32.mrb[75].mxu1  ;;  %v7316_v58 = vpop.eup %7315  ;;  %v4084_v18 = vmul.f32 %v7314_v36, %v9412_v5  ;;  %5232 = vst.msk [vmem:[%s11613_s3 + $0x84] sm:$0xf] %vm5198_vm3, %v6263_v13  ;;  %v6268_v25 = vpack.c.bf16 %v3956_v17, %v3956_v17  ;;  %7337 = vpow2.f32 %v5889_v23  ;;  %v5762_v29 = vmul.f32 -1.442695, %v9618_v45 }
 0x18d   :  { %v7318_v8 = vpop.eup %7317  ;;  %v3954_v33 = vmul.f32 %v7316_v58, %v9433_v56  ;;  %5360 = vst.msk [vmem:[%s11613_s3 + $0x284] sm:$0xf] %vm5198_vm3, %v6391_v51  ;;  %7339 = vpow2.f32 %v5759_v47  ;;  %v9662_v53 = vpop.f32.mrb[76].mxu0 }
 0x18e   :  { %v7320_v6 = vpop.eup %7319  ;;  %v6396_v5 = vpack.c.bf16 %v4084_v18, %v4084_v18  ;;  %v4082_v54 = vmul.f32 %v7318_v8, %v9446_v46  ;;  %5237 = vst.msk [vmem:[%s11613_s3 + $0x98] sm:$0xf] %vm5198_vm3, %v6268_v25  ;;  %7341 = vpow2.f32 %v5887_v11  ;;  %v9664_v36 = vpop.f32.mrb[76].mxu1 }
 0x18f   :  { %v7322_v27 = vpop.eup %7321  ;;  %v6266_v56 = vpack.c.bf16 %v3954_v33, %v3954_v33  ;;  %v3957_v23 = vmul.f32 %v7320_v6, %v9455_v61  ;;  %7343 = vpow2.f32 %v5764_v12  ;;  %11683 = vst [vmem:[#allocation11_spill] sm:$0xff] %v9664_v36  ;;  %v9670_v11 = vpop.f32.mrb[77].mxu0 }
 0x190   :  { %v7324_v31 = vpop.eup %7323  ;;  %5365 = vst.msk [vmem:[%s11613_s3 + $0x298] sm:$0xf] %vm5198_vm3, %v6396_v5  ;;  %v6394_v46 = vpack.c.bf16 %v4082_v54, %v4082_v54  ;;  %v4085_v47 = vmul.f32 %v7322_v27, %v9464_v3  ;;  %7345 = vpow2.f32 %v5892_v50  ;;  %11684 = vst [vmem:[#allocation12_spill] sm:$0xff] %v9670_v11  ;;  %v9672_v58 = vpop.f32.mrb[77].mxu1  ;;  %v9691_v27 = vld [vmem:[%s11612_s2] ss:$0 sm:$0xff] }
 0x191   :  { %v7326_v13 = vpop.eup %7325  ;;  %5235 = vst.msk [vmem:[%s11613_s3 + $0x90] sm:$0xf] %vm5198_vm3, %v6266_v56  ;;  %v6269_v61 = vpack.c.bf16 %v3957_v23, %v3957_v23  ;;  %v3187_v17 = vadd.f32 1.0, %v7324_v31  ;;  %11685 = vst [vmem:[#allocation13_spill] sm:$0xff] %v9672_v58  ;;  %7347 = vpow2.f32 %v5762_v29  ;;  %v9678_v12 = vpop.f32.mrb[78].mxu0  ;;  %v9695_v56 = vadd.f32 %v9691_v27, %v9128_v1  ;;  %v11691_v58 = vld [vmem:[#allocation21_spill] sm:$0xff] }
 0x192   :  { %v7328_v51 = vpop.eup %7327  ;;  %5363 = vst.msk [vmem:[%s11613_s3 + $0x290] sm:$0xf] %vm5198_vm3, %v6394_v46  ;;  %v6397_v3 = vpack.c.bf16 %v4085_v47, %v4085_v47  ;;  %v3315_v18 = vadd.f32 1.0, %v7326_v13  ;;  %11686 = vst [vmem:[#allocation14_spill] sm:$0xff] %v9678_v12  ;;  %v9699_v13 = vadd.f32 %v9691_v27, %v9136_v32  ;;  %v9707_v1 = vadd.f32 %v9691_v27, %v9146_v40  ;;  %v9741_v12 = vpop.f32.mrb[79].mxu0 }
 0x193   :  { %v7330_v8 = vpop.eup %7329  ;;  %5238 = vst.msk [vmem:[%s11613_s3 + $0x9c] sm:$0xf] %vm5198_vm3, %v6269_v61  ;;  %7349 = vrcp.f32 %v3187_v17  ;;  %v3192_v25 = vadd.f32 1.0, %v7328_v51  ;;  %v9703_v61 = vadd.f32 %v9691_v27, %v9138_v15  ;;  %v5890_v32 = vmul.f32 -1.442695, %v9695_v56  ;;  %11690 = vst [vmem:[#allocation16_spill] sm:$0xff] %v9741_v12 }
 0x194   :  { %v7332_v33 = vpop.eup %7331  ;;  %5366 = vst.msk [vmem:[%s11613_s3 + $0x29c] sm:$0xf] %vm5198_vm3, %v6397_v3  ;;  %7351 = vrcp.f32 %v3315_v18  ;;  %v3320_v50 = vadd.f32 1.0, %v7330_v8  ;;  %v9711_v3 = vadd.f32 %v9691_v27, %v9148_v43  ;;  %v9716_v15 = vadd.f32 %v9691_v27, %v9172_v0 }
 0x195   :  { %v7334_v6 = vpop.eup %7333  ;;  %7353 = vrcp.f32 %v3192_v25  ;;  %v3190_v5 = vadd.f32 1.0, %v7332_v33  ;;  %v9720_v40 = vadd.f32 %v9691_v27, %v9174_v30  ;;  %v9730_v30 = vpop.f32.mrb[78].mxu1 }
 0x196   :  { %v7336_v54 = vpop.eup %7335  ;;  %7355 = vrcp.f32 %v3320_v50  ;;  %v3318_v29 = vadd.f32 1.0, %v7334_v6  ;;  %v11687_v50 = vld [vmem:[#allocation19_spill] sm:$0xff]  ;;  %11688 = vst [vmem:[#allocation15_spill] sm:$0xff] %v9730_v30  ;;  %v9743_v30 = vpop.f32.mrb[79].mxu1 }
 0x197   :  { %v7338_v23 = vpop.eup %7337  ;;  %7357 = vrcp.f32 %v3190_v5  ;;  %v3193_v31 = vadd.f32 1.0, %v7336_v54  ;;  %v9724_v43 = vadd.f32 %v9691_v27, %v11687_v50  ;;  %v5765_v54 = vmul.f32 -1.442695, %v9699_v13 }
 0x198   :  { %v7340_v46 = vpop.eup %7339  ;;  %7359 = vrcp.f32 %v3318_v29  ;;  %v3321_v47 = vadd.f32 1.0, %v7338_v23  ;;  %v5893_v29 = vmul.f32 -1.442695, %v9703_v61  ;;  %v5896_v50 = vmul.f32 -1.442695, %v9720_v40 }
 0x199   :  { %v7342_v17 = vpop.eup %7341  ;;  %7361 = vrcp.f32 %v3193_v31  ;;  %v3191_v51 = vadd.f32 1.0, %v7340_v46  ;;  %v5763_v31 = vmul.f32 -1.442695, %v9707_v1  ;;  %v5891_v46 = vmul.f32 -1.442695, %v9711_v3 }
 0x19a   :  { %v7344_v18 = vpop.eup %7343  ;;  %7363 = vrcp.f32 %v3321_v47  ;;  %v3319_v8 = vadd.f32 1.0, %v7342_v17 }
 0x19b   :  { %v7346_v25 = vpop.eup %7345  ;;  %7365 = vrcp.f32 %v3191_v51  ;;  %v3196_v33 = vadd.f32 1.0, %v7344_v18  ;;  %v5768_v51 = vmul.f32 -1.442695, %v9716_v15  ;;  %v11689_v18 = vld [vmem:[#allocation20_spill] sm:$0xff] }
 0x19c   :  { %v7348_v6 = vpop.eup %7347  ;;  %7367 = vrcp.f32 %v3319_v8  ;;  %v3324_v5 = vadd.f32 1.0, %v7346_v25  ;;  %v9736_v8 = vadd.f32 %v9691_v27, %v11689_v18  ;;  %v9748_v18 = vadd.f32 %v9691_v27, %v11691_v58 }
 0x19d   :  { %v7350_v0 = vpop.eup %7349  ;;  %7369 = vrcp.f32 %v3196_v33  ;;  %v3194_v23 = vadd.f32 1.0, %v7348_v6  ;;  %v5766_v6 = vmul.f32 -1.442695, %v9724_v43 }
 0x19e   :  { %v7352_v47 = vpop.eup %7351  ;;  %v3955_v17 = vmul.f32 %v7350_v0, %v9534_v60  ;;  %7371 = vrcp.f32 %v3324_v5  ;;  %v5894_v58 = vmul.f32 -1.442695, %v9736_v8 }
 0x19f   :  { %v7354_v25 = vpop.eup %7353  ;;  %v4083_v33 = vmul.f32 %v7352_v47, %v9538_v35  ;;  %7373 = vrcp.f32 %v3194_v23  ;;  %v11692_v47 = vld [vmem:[#allocation22_spill] sm:$0xff] }
 0x1a0   :  { %v7356_v60 = vpop.eup %7355  ;;  %v6267_v5 = vpack.c.bf16 %v3955_v17, %v3955_v17  ;;  %v3960_v0 = vmul.f32 %v7354_v25, %v9542_v55  ;;  %7375 = vpow2.f32 %v5890_v32  ;;  %v9753_v36 = vadd.f32 %v9691_v27, %v11692_v47  ;;  %v11693_v25 = vld [vmem:[#allocation23_spill] sm:$0xff] }
 0x1a1   :  { %v7358_v11 = vpop.eup %7357  ;;  %v6395_v35 = vpack.c.bf16 %v4083_v33, %v4083_v33  ;;  %v4088_v23 = vmul.f32 %v7356_v60, %v9547_v38  ;;  %7377 = vpow2.f32 %v5765_v54  ;;  %v9768_v33 = vadd.f32 %v9691_v27, %v11693_v25 }
 0x1a2   :  { %v7360_v12 = vpop.eup %7359  ;;  %5236 = vst.msk [vmem:[%s11613_s3 + $0x94] sm:$0xf] %vm5198_vm3, %v6267_v5  ;;  %v6272_v55 = vpack.c.bf16 %v3960_v0, %v3960_v0  ;;  %v3958_v32 = vmul.f32 %v7358_v11, %v9551_v62  ;;  %7379 = vpow2.f32 %v5893_v29  ;;  %v11694_v29 = vld [vmem:[#allocation24_spill] sm:$0xff]  ;;  %v5769_v0 = vmul.f32 -1.442695, %v9748_v18 }
 0x1a3   :  { %v7362_v17 = vpop.eup %7361  ;;  %5364 = vst.msk [vmem:[%s11613_s3 + $0x294] sm:$0xf] %vm5198_vm3, %v6395_v35  ;;  %v6400_v38 = vpack.c.bf16 %v4088_v23, %v4088_v23  ;;  %v4086_v54 = vmul.f32 %v7360_v12, %v9555_v41  ;;  %7381 = vpow2.f32 %v5763_v31  ;;  %v9777_v5 = vadd.f32 %v9691_v27, %v11694_v29  ;;  %v9785_v35 = vpop.f32.mrb[80].mxu0 }
 0x1a4   :  { %v7364_v60 = vpop.eup %7363  ;;  %5241 = vst.msk [vmem:[%s11613_s3 + $0xa8] sm:$0xf] %vm5198_vm3, %v6272_v55  ;;  %v6270_v62 = vpack.c.bf16 %v3958_v32, %v3958_v32  ;;  %v3961_v11 = vmul.f32 %v7362_v17, %v9559_v44  ;;  %7383 = vpow2.f32 %v5891_v46  ;;  %v9787_v44 = vpop.f32.mrb[80].mxu1  ;;  %v5897_v55 = vmul.f32 -1.442695, %v9753_v36 }
 0x1a5   :  { %v7366_v41 = vpop.eup %7365  ;;  %5369 = vst.msk [vmem:[%s11613_s3 + $0x2a8] sm:$0xf] %vm5198_vm3, %v6400_v38  ;;  %v6398_v12 = vpack.c.bf16 %v4086_v54, %v4086_v54  ;;  %v4089_v31 = vmul.f32 %v7364_v60, %v9563_v28  ;;  %7385 = vpow2.f32 %v5768_v51  ;;  %11695 = vst [vmem:[#allocation17_spill] sm:$0xff] %v9787_v44  ;;  %v9795_v28 = vpop.f32.mrb[81].mxu0  ;;  %v5767_v54 = vmul.f32 -1.442695, %v9768_v33 }
 0x1a6   :  { %v7368_v46 = vpop.eup %7367  ;;  %5239 = vst.msk [vmem:[%s11613_s3 + $0xa0] sm:$0xf] %vm5198_vm3, %v6270_v62  ;;  %v6273_v23 = vpack.c.bf16 %v3961_v11, %v3961_v11  ;;  %v3959_v47 = vmul.f32 %v7366_v41, %v9570_v20  ;;  %7387 = vpow2.f32 %v5896_v50  ;;  %11696 = vst [vmem:[#allocation18_spill] sm:$0xff] %v9795_v28  ;;  %v9797_v51 = vpop.f32.mrb[81].mxu1  ;;  %v5895_v11 = vmul.f32 -1.442695, %v9777_v5 }
 0x1a7   :  { %11697 = vst [vmem:[#allocation19_spill] sm:$0xff] %v9797_v51  ;;  %v7370_v32 = vpop.eup %7369  ;;  %5367 = vst.msk [vmem:[%s11613_s3 + $0x2a0] sm:$0xf] %vm5198_vm3, %v6398_v12  ;;  %v6401_v17 = vpack.c.bf16 %v4089_v31, %v4089_v31  ;;  %v4087_v38 = vmul.f32 %v7368_v46, %v9581_v59  ;;  %7389 = vpow2.f32 %v5766_v6  ;;  %v9805_v20 = vpop.f32.mrb[82].mxu0 }
 0x1a8   :  { %11698 = vst [vmem:[#allocation20_spill] sm:$0xff] %v9805_v20  ;;  %v9807_v50 = vpop.f32.mrb[82].mxu1  ;;  %v7372_v25 = vpop.eup %7371  ;;  %5242 = vst.msk [vmem:[%s11613_s3 + $0xac] sm:$0xf] %vm5198_vm3, %v6273_v23  ;;  %v6271_v60 = vpack.c.bf16 %v3959_v47, %v3959_v47  ;;  %v3964_v62 = vmul.f32 %v7370_v32, %v9592_v34  ;;  %7391 = vpow2.f32 %v5894_v58 }
 0x1a9   :  { %11699 = vst [vmem:[#allocation21_spill] sm:$0xff] %v9807_v50  ;;  %v9815_v59 = vpop.f32.mrb[83].mxu0  ;;  %v9817_v6 = vpop.f32.mrb[83].mxu1  ;;  %5370 = vst.msk [vmem:[%s11613_s3 + $0x2ac] sm:$0xf] %vm5198_vm3, %v6401_v17  ;;  %v6399_v41 = vpack.c.bf16 %v4087_v38, %v4087_v38  ;;  %v4092_v12 = vmul.f32 %v7372_v25, %v9605_v24  ;;  %7393 = vpow2.f32 %v5769_v0 }
 0x1aa   :  { %11700 = vst [vmem:[#allocation22_spill] sm:$0xff] %v9815_v59  ;;  %11701 = vst [vmem:[#allocation23_spill] sm:$0xff] %v9817_v6  ;;  %v7374_v29 = vpop.eup %7373  ;;  %v6276_v34 = vpack.c.bf16 %v3964_v62, %v3964_v62  ;;  %7395 = vpow2.f32 %v5897_v55  ;;  %v9841_v17 = vpop.f32.mrb[84].mxu0 }
 0x1ab   :  { %v7376_v31 = vpop.eup %7375  ;;  %5240 = vst.msk [vmem:[%s11613_s3 + $0xa4] sm:$0xf] %vm5198_vm3, %v6271_v60  ;;  %v3962_v58 = vmul.f32 %v7374_v29, %v9618_v45  ;;  %5368 = vst.msk [vmem:[%s11613_s3 + $0x2a4] sm:$0xf] %vm5198_vm3, %v6399_v41  ;;  %v6404_v23 = vpack.c.bf16 %v4092_v12, %v4092_v12  ;;  %7397 = vpow2.f32 %v5767_v54  ;;  %v9843_v38 = vpop.f32.mrb[84].mxu1 }
 0x1ac   :  { %v7378_v46 = vpop.eup %7377  ;;  %v3322_v47 = vadd.f32 1.0, %v7376_v31  ;;  %5245 = vst.msk [vmem:[%s11613_s3 + $0xb8] sm:$0xf] %vm5198_vm3, %v6276_v34  ;;  %7399 = vpow2.f32 %v5895_v11  ;;  %11702 = vst [vmem:[#allocation24_spill] sm:$0xff] %v9841_v17  ;;  %v11704_v11 = vld [vmem:[#allocation2_spill] sm:$0xff]  ;;  %v9892_v59 = vpop.f32.mrb[85].mxu0 }
 0x1ad   :  { %v7380_v24 = vpop.eup %7379  ;;  %v6274_v0 = vpack.c.bf16 %v3962_v58, %v3962_v58  ;;  %v3197_v32 = vadd.f32 1.0, %v7378_v46  ;;  %5373 = vst.msk [vmem:[%s11613_s3 + $0x2b8] sm:$0xf] %vm5198_vm3, %v6404_v23  ;;  %11703 = vst [vmem:[#allocation45_spill] sm:$0xff] %v9843_v38  ;;  %v9851_v29 = vadd.f32 %v9691_v27, %v11704_v11  ;;  %v11705_v23 = vld [vmem:[#allocation3_spill] sm:$0xff]  ;;  %v9894_v50 = vpop.f32.mrb[85].mxu1 }
 0x1ae   :  { %v7382_v45 = vpop.eup %7381  ;;  %7401 = vrcp.f32 %v3322_v47  ;;  %v3325_v55 = vadd.f32 1.0, %v7380_v24  ;;  %v9855_v47 = vadd.f32 %v9691_v27, %v11705_v23  ;;  %v11706_v24 = vld [vmem:[#allocation25_spill] sm:$0xff]  ;;  %v11708_v11 = vld [vmem:[#allocation27_spill] sm:$0xff]  ;;  %11712 = vst [vmem:[#allocation2_spill] sm:$0xff] %v9892_v59  ;;  %11713 = vst [vmem:[#allocation3_spill] sm:$0xff] %v9894_v50  ;;  %v9903_v59 = vpop.f32.mrb[86].mxu1 }
 0x1af   :  { %v7384_v54 = vpop.eup %7383  ;;  %5243 = vst.msk [vmem:[%s11613_s3 + $0xb0] sm:$0xf] %vm5198_vm3, %v6274_v0  ;;  %7403 = vrcp.f32 %v3197_v32  ;;  %v3195_v25 = vadd.f32 1.0, %v7382_v45  ;;  %v9859_v0 = vadd.f32 %v9691_v27, %v11706_v24 }
 0x1b0   :  { %v7386_v60 = vpop.eup %7385  ;;  %7405 = vrcp.f32 %v3325_v55  ;;  %v3323_v62 = vadd.f32 1.0, %v7384_v54  ;;  %v5772_v55 = vmul.f32 -1.442695, %v9851_v29  ;;  %v11707_v54 = vld [vmem:[#allocation26_spill] sm:$0xff] }
 0x1b1   :  { %v7388_v41 = vpop.eup %7387  ;;  %7407 = vrcp.f32 %v3195_v25  ;;  %v3200_v12 = vadd.f32 1.0, %v7386_v60  ;;  %v9864_v25 = vadd.f32 %v9691_v27, %v11707_v54  ;;  %v11711_v54 = vld [vmem:[#allocation30_spill] sm:$0xff] }
 0x1b2   :  { %v7390_v31 = vpop.eup %7389  ;;  %7409 = vrcp.f32 %v3323_v62  ;;  %v3328_v34 = vadd.f32 1.0, %v7388_v41  ;;  %v9868_v41 = vadd.f32 %v9691_v27, %v11708_v11  ;;  %v9880_v38 = vadd.f32 %v9691_v27, %v11711_v54 }
 0x1b3   :  { %v7392_v58 = vpop.eup %7391  ;;  %7411 = vrcp.f32 %v3200_v12  ;;  %v3198_v46 = vadd.f32 1.0, %v7390_v31  ;;  %v11709_v12 = vld [vmem:[#allocation28_spill] sm:$0xff]  ;;  %v5900_v11 = vmul.f32 -1.442695, %v9855_v47 }
 0x1b4   :  { %v7394_v32 = vpop.eup %7393  ;;  %7413 = vrcp.f32 %v3328_v34  ;;  %v3326_v45 = vadd.f32 1.0, %v7392_v58  ;;  %v9872_v31 = vadd.f32 %v9691_v27, %v11709_v12  ;;  %v11710_v58 = vld [vmem:[#allocation29_spill] sm:$0xff]  ;;  %v9885_v12 = vadd.f32 %v9691_v27, %v9279_v22 }
 0x1b5   :  { %v7396_v60 = vpop.eup %7395  ;;  %7415 = vrcp.f32 %v3198_v46  ;;  %v3201_v62 = vadd.f32 1.0, %v7394_v32  ;;  %v9876_v24 = vadd.f32 %v9691_v27, %v11710_v58  ;;  %v5898_v58 = vmul.f32 -1.442695, %v9864_v25 }
 0x1b6   :  { %v7398_v23 = vpop.eup %7397  ;;  %7417 = vrcp.f32 %v3326_v45  ;;  %v3329_v34 = vadd.f32 1.0, %v7396_v60  ;;  %v5770_v60 = vmul.f32 -1.442695, %v9859_v0  ;;  %v5899_v20 = vmul.f32 -1.442695, %v9880_v38 }
 0x1b7   :  { %v7400_v46 = vpop.eup %7399  ;;  %7419 = vrcp.f32 %v3201_v62  ;;  %v3199_v32 = vadd.f32 1.0, %v7398_v23  ;;  %v5773_v62 = vmul.f32 -1.442695, %v9868_v41  ;;  %v5901_v23 = vmul.f32 -1.442695, %v9872_v31 }
 0x1b8   :  { %v7402_v17 = vpop.eup %7401  ;;  %7421 = vrcp.f32 %v3329_v34  ;;  %v3327_v45 = vadd.f32 1.0, %v7400_v46  ;;  %v5771_v46 = vmul.f32 -1.442695, %v9876_v24 }
 0x1b9   :  { %v7404_v6 = vpop.eup %7403  ;;  %v4090_v54 = vmul.f32 %v7402_v17, %v9695_v56  ;;  %7423 = vrcp.f32 %v3199_v32  ;;  %v5776_v17 = vmul.f32 -1.442695, %v9885_v12  ;;  %v9901_v32 = vpop.f32.mrb[86].mxu0 }
 0x1ba   :  { %v7406_v22 = vpop.eup %7405  ;;  %v3965_v34 = vmul.f32 %v7404_v6, %v9699_v13  ;;  %7425 = vrcp.f32 %v3327_v45  ;;  %v9908_v6 = vadd.f32 %v9691_v27, %v9281_v63 }
 0x1bb   :  { %v7408_v51 = vpop.eup %7407  ;;  %v6402_v28 = vpack.c.bf16 %v4090_v54, %v4090_v54  ;;  %v4093_v56 = vmul.f32 %v7406_v22, %v9703_v61  ;;  %7427 = vpow2.f32 %v5772_v55  ;;  %v9917_v54 = vadd.f32 %v9691_v27, %v9292_v57 }
 0x1bc   :  { %v7410_v50 = vpop.eup %7409  ;;  %v6277_v44 = vpack.c.bf16 %v3965_v34, %v3965_v34  ;;  %v3963_v13 = vmul.f32 %v7408_v51, %v9707_v1  ;;  %7429 = vpow2.f32 %v5900_v11  ;;  %v9919_v1 = vpop.f32.mrb[87].mxu0  ;;  %v5904_v22 = vmul.f32 -1.442695, %v9908_v6 }
 0x1bd   :  { %v7412_v45 = vpop.eup %7411  ;;  %5371 = vst.msk [vmem:[%s11613_s3 + $0x2b0] sm:$0xf] %vm5198_vm3, %v6402_v28  ;;  %v6405_v61 = vpack.c.bf16 %v4093_v56, %v4093_v56  ;;  %v4091_v55 = vmul.f32 %v7410_v50, %v9711_v3  ;;  %7431 = vpow2.f32 %v5770_v60  ;;  %v9921_v51 = vpop.f32.mrb[87].mxu1  ;;  %v9930_v3 = vadd.f32 %v9691_v27, %v9294_v16 }
 0x1be   :  { %v7414_v63 = vpop.eup %7413  ;;  %5246 = vst.msk [vmem:[%s11613_s3 + $0xbc] sm:$0xf] %vm5198_vm3, %v6277_v44  ;;  %v6275_v11 = vpack.c.bf16 %v3963_v13, %v3963_v13  ;;  %v3968_v28 = vmul.f32 %v7412_v45, %v9716_v15  ;;  %7433 = vpow2.f32 %v5898_v58  ;;  %v9939_v44 = vadd.f32 %v9691_v27, %v9302_v19 }
 0x1bf   :  { %v7416_v57 = vpop.eup %7415  ;;  %5374 = vst.msk [vmem:[%s11613_s3 + $0x2bc] sm:$0xf] %vm5198_vm3, %v6405_v61  ;;  %v6403_v50 = vpack.c.bf16 %v4091_v55, %v4091_v55  ;;  %v4096_v60 = vmul.f32 %v7414_v63, %v9720_v40  ;;  %7435 = vpow2.f32 %v5773_v62  ;;  %v5774_v62 = vmul.f32 -1.442695, %v9917_v54  ;;  %v9965_v55 = vpop.f32.mrb[88].mxu0 }
 0x1c0   :  { %v7418_v15 = vpop.eup %7417  ;;  %5244 = vst.msk [vmem:[%s11613_s3 + $0xb4] sm:$0xf] %vm5198_vm3, %v6275_v11  ;;  %v6280_v16 = vpack.c.bf16 %v3968_v28, %v3968_v28  ;;  %v3966_v58 = vmul.f32 %v7416_v57, %v9724_v43  ;;  %7437 = vpow2.f32 %v5901_v23  ;;  %v5902_v13 = vmul.f32 -1.442695, %v9930_v3  ;;  %v9967_v63 = vpop.f32.mrb[88].mxu1 }
 0x1c1   :  { %v7420_v34 = vpop.eup %7419  ;;  %5372 = vst.msk [vmem:[%s11613_s3 + $0x2b4] sm:$0xf] %vm5198_vm3, %v6403_v50  ;;  %v6408_v19 = vpack.c.bf16 %v4096_v60, %v4096_v60  ;;  %v4094_v40 = vmul.f32 %v7418_v15, %v9736_v8  ;;  %7439 = vpow2.f32 %v5771_v46  ;;  %v5777_v61 = vmul.f32 -1.442695, %v9939_v44  ;;  %v9974_v28 = vpop.f32.mrb[89].mxu0 }
 0x1c2   :  { %v7422_v56 = vpop.eup %7421  ;;  %5249 = vst.msk [vmem:[%s11613_s3 + $0xc8] sm:$0xf] %vm5198_vm3, %v6280_v16  ;;  %v6278_v43 = vpack.c.bf16 %v3966_v58, %v3966_v58  ;;  %v3969_v23 = vmul.f32 %v7420_v34, %v9748_v18  ;;  %7441 = vpow2.f32 %v5899_v20  ;;  %v9983_v60 = vpop.f32.mrb[90].mxu0 }
 0x1c3   :  { %v7424_v45 = vpop.eup %7423  ;;  %5377 = vst.msk [vmem:[%s11613_s3 + $0x2c8] sm:$0xf] %vm5198_vm3, %v6408_v19  ;;  %v6406_v8 = vpack.c.bf16 %v4094_v40, %v4094_v40  ;;  %v4097_v46 = vmul.f32 %v7422_v56, %v9753_v36  ;;  %7443 = vpow2.f32 %v5776_v17  ;;  %v9976_v36 = vpop.f32.mrb[89].mxu1  ;;  %11715 = vst [vmem:[#allocation26_spill] sm:$0xff] %v9983_v60  ;;  %v11725_v60 = vld [vmem:[#allocation37_spill] sm:$0xff] }
 0x1c4   :  { %v7426_v18 = vpop.eup %7425  ;;  %5247 = vst.msk [vmem:[%s11613_s3 + $0xc0] sm:$0xf] %vm5198_vm3, %v6278_v43  ;;  %v6281_v20 = vpack.c.bf16 %v3969_v23, %v3969_v23  ;;  %v3967_v11 = vmul.f32 %v7424_v45, %v9768_v33  ;;  %7445 = vpow2.f32 %v5904_v22  ;;  %11714 = vst [vmem:[#allocation25_spill] sm:$0xff] %v9976_v36  ;;  %v9985_v15 = vpop.f32.mrb[90].mxu1  ;;  %v10007_v45 = vadd.f32 %v9691_v27, %v9304_v7 }
 0x1c5   :  { %v7428_v17 = vpop.eup %7427  ;;  %5375 = vst.msk [vmem:[%s11613_s3 + $0x2c0] sm:$0xf] %vm5198_vm3, %v6406_v8  ;;  %v6409_v57 = vpack.c.bf16 %v4097_v46, %v4097_v46  ;;  %v4095_v50 = vmul.f32 %v7426_v18, %v9777_v5  ;;  %7447 = vpow2.f32 %v5774_v62  ;;  %11716 = vst [vmem:[#allocation27_spill] sm:$0xff] %v9985_v15  ;;  %v9991_v22 = vpop.f32.mrb[91].mxu0 }
 0x1c6   :  { %v7430_v33 = vpop.eup %7429  ;;  %5250 = vst.msk [vmem:[%s11613_s3 + $0xcc] sm:$0xf] %vm5198_vm3, %v6281_v20  ;;  %v6279_v16 = vpack.c.bf16 %v3967_v11, %v3967_v11  ;;  %v3204_v58 = vadd.f32 1.0, %v7428_v17  ;;  %7449 = vpow2.f32 %v5902_v13  ;;  %11717 = vst [vmem:[#allocation28_spill] sm:$0xff] %v9991_v22  ;;  %v10011_v17 = vadd.f32 %v9691_v27, %v9312_v2 }
 0x1c7   :  { %v7432_v34 = vpop.eup %7431  ;;  %5378 = vst.msk [vmem:[%s11613_s3 + $0x2cc] sm:$0xf] %vm5198_vm3, %v6409_v57  ;;  %v6407_v5 = vpack.c.bf16 %v4095_v50, %v4095_v50  ;;  %v3332_v19 = vadd.f32 1.0, %v7430_v33  ;;  %7451 = vpow2.f32 %v5777_v61  ;;  %v10015_v57 = vadd.f32 %v9691_v27, %v9314_v21 }
 0x1c8   :  { %v7434_v40 = vpop.eup %7433  ;;  %5248 = vst.msk [vmem:[%s11613_s3 + $0xc4] sm:$0xf] %vm5198_vm3, %v6279_v16  ;;  %7453 = vrcp.f32 %v3204_v58  ;;  %v3202_v62 = vadd.f32 1.0, %v7432_v34  ;;  %v5905_v33 = vmul.f32 -1.442695, %v10007_v45  ;;  %v11718_v16 = vld [vmem:[#allocation31_spill] sm:$0xff] }
 0x1c9   :  { %v7436_v56 = vpop.eup %7435  ;;  %5376 = vst.msk [vmem:[%s11613_s3 + $0x2c4] sm:$0xf] %vm5198_vm3, %v6407_v5  ;;  %7455 = vrcp.f32 %v3332_v19  ;;  %v3330_v43 = vadd.f32 1.0, %v7434_v40  ;;  %v10020_v58 = vadd.f32 %v9691_v27, %v11718_v16  ;;  %v11719_v19 = vld [vmem:[#allocation32_spill] sm:$0xff]  ;;  %v11720_v40 = vld [vmem:[#allocation33_spill] sm:$0xff] }
 0x1ca   :  { %v7438_v23 = vpop.eup %7437  ;;  %7457 = vrcp.f32 %v3202_v62  ;;  %v3205_v13 = vadd.f32 1.0, %v7436_v56  ;;  %v10024_v2 = vadd.f32 %v9691_v27, %v11719_v19  ;;  %v10028_v21 = vadd.f32 %v9691_v27, %v11720_v40  ;;  %v11723_v16 = vld [vmem:[#allocation36_spill] sm:$0xff]  ;;  %v10045_v19 = vpop.f32.mrb[91].mxu1 }
 0x1cb   :  { %v7440_v8 = vpop.eup %7439  ;;  %7459 = vrcp.f32 %v3330_v43  ;;  %v3333_v46 = vadd.f32 1.0, %v7438_v23  ;;  %v11721_v43 = vld [vmem:[#allocation34_spill] sm:$0xff]  ;;  %11724 = vst [vmem:[#allocation29_spill] sm:$0xff] %v10045_v19 }
 0x1cc   :  { %v7442_v61 = vpop.eup %7441  ;;  %7461 = vrcp.f32 %v3205_v13  ;;  %v3203_v18 = vadd.f32 1.0, %v7440_v8  ;;  %v10032_v23 = vadd.f32 %v9691_v27, %v11721_v43  ;;  %v11722_v13 = vld [vmem:[#allocation35_spill] sm:$0xff] }
 0x1cd   :  { %v7444_v20 = vpop.eup %7443  ;;  %7463 = vrcp.f32 %v3333_v46  ;;  %v3331_v11 = vadd.f32 1.0, %v7442_v61  ;;  %v10036_v8 = vadd.f32 %v9691_v27, %v11722_v13 }
 0x1ce   :  { %v7446_v50 = vpop.eup %7445  ;;  %7465 = vrcp.f32 %v3203_v18  ;;  %v3208_v7 = vadd.f32 1.0, %v7444_v20  ;;  %v5775_v18 = vmul.f32 -1.442695, %v10011_v17  ;;  %v5903_v20 = vmul.f32 -1.442695, %v10015_v57 }
 0x1cf   :  { %v7448_v34 = vpop.eup %7447  ;;  %7467 = vrcp.f32 %v3331_v11  ;;  %v3336_v5 = vadd.f32 1.0, %v7446_v50  ;;  %v5781_v22 = vmul.f32 -1.442695, %v10036_v8 }
 0x1d0   :  { %v7450_v62 = vpop.eup %7449  ;;  %7469 = vrcp.f32 %v3208_v7  ;;  %v3206_v56 = vadd.f32 1.0, %v7448_v34  ;;  %v5780_v7 = vmul.f32 -1.442695, %v10020_v58  ;;  %v10043_v34 = vadd.f32 %v9691_v27, %v11723_v16 }
 0x1d1   :  { %v7452_v46 = vpop.eup %7451  ;;  %7471 = vrcp.f32 %v3336_v5  ;;  %v3334_v61 = vadd.f32 1.0, %v7450_v62  ;;  %v5908_v5 = vmul.f32 -1.442695, %v10024_v2  ;;  %v5778_v62 = vmul.f32 -1.442695, %v10028_v21 }
 0x1d2   :  { %v7454_v11 = vpop.eup %7453  ;;  %7473 = vrcp.f32 %v3206_v56  ;;  %v3209_v50 = vadd.f32 1.0, %v7452_v46  ;;  %v5906_v46 = vmul.f32 -1.442695, %v10032_v23 }
 0x1d3   :  { %v7456_v40 = vpop.eup %7455  ;;  %v3972_v43 = vmul.f32 %v7454_v11, %v9851_v29  ;;  %7475 = vrcp.f32 %v3334_v61  ;;  %v10056_v29 = vadd.f32 %v9691_v27, %v11725_v60 }
 0x1d4   :  { %v7458_v13 = vpop.eup %7457  ;;  %v4100_v56 = vmul.f32 %v7456_v40, %v9855_v47  ;;  %7477 = vrcp.f32 %v3209_v50  ;;  %v5909_v47 = vmul.f32 -1.442695, %v10043_v34 }
 0x1d5   :  { %v7460_v16 = vpop.eup %7459  ;;  %v6284_v15 = vpack.c.bf16 %v3972_v43, %v3972_v43  ;;  %v3970_v19 = vmul.f32 %v7458_v13, %v9859_v0  ;;  %7479 = vpow2.f32 %v5905_v33  ;;  %v11726_v33 = vld [vmem:[#allocation38_spill] sm:$0xff]  ;;  %v11727_v13 = vld [vmem:[#allocation39_spill] sm:$0xff] }
 0x1d6   :  { %v7462_v61 = vpop.eup %7461  ;;  %v6412_v11 = vpack.c.bf16 %v4100_v56, %v4100_v56  ;;  %v4098_v36 = vmul.f32 %v7460_v16, %v9864_v25  ;;  %7481 = vpow2.f32 %v5775_v18  ;;  %v10067_v60 = vadd.f32 %v9691_v27, %v11726_v33 }
 0x1d7   :  { %v7464_v50 = vpop.eup %7463  ;;  %5253 = vst.msk [vmem:[%s11613_s3 + $0xd8] sm:$0xf] %vm5198_vm3, %v6284_v15  ;;  %v6282_v40 = vpack.c.bf16 %v3970_v19, %v3970_v19  ;;  %v3973_v0 = vmul.f32 %v7462_v61, %v9868_v41  ;;  %7483 = vpow2.f32 %v5903_v20  ;;  %v10076_v15 = vadd.f32 %v9691_v27, %v11727_v13  ;;  %v10078_v41 = vpop.f32.mrb[92].mxu0 }
 0x1d8   :  { %v7466_v43 = vpop.eup %7465  ;;  %5381 = vst.msk [vmem:[%s11613_s3 + $0x2d8] sm:$0xf] %vm5198_vm3, %v6412_v11  ;;  %v6410_v25 = vpack.c.bf16 %v4098_v36, %v4098_v36  ;;  %v4101_v18 = vmul.f32 %v7464_v50, %v9872_v31  ;;  %7485 = vpow2.f32 %v5780_v7  ;;  %v10080_v20 = vpop.f32.mrb[92].mxu1  ;;  %v11728_v31 = vld [vmem:[#allocation40_spill] sm:$0xff] }
 0x1d9   :  { %v7468_v19 = vpop.eup %7467  ;;  %5251 = vst.msk [vmem:[%s11613_s3 + $0xd0] sm:$0xf] %vm5198_vm3, %v6282_v40  ;;  %v6285_v56 = vpack.c.bf16 %v3973_v0, %v3973_v0  ;;  %v3971_v36 = vmul.f32 %v7466_v43, %v9876_v24  ;;  %7487 = vpow2.f32 %v5908_v5  ;;  %v10089_v7 = vadd.f32 %v9691_v27, %v11728_v31  ;;  %v10091_v16 = vpop.f32.mrb[93].mxu0 }
 0x1da   :  { %11729 = vst [vmem:[#allocation30_spill] sm:$0xff] %v10091_v16  ;;  %v10093_v61 = vpop.f32.mrb[93].mxu1  ;;  %v7470_v11 = vpop.eup %7469  ;;  %5379 = vst.msk [vmem:[%s11613_s3 + $0x2d0] sm:$0xf] %vm5198_vm3, %v6410_v25  ;;  %v6413_v50 = vpack.c.bf16 %v4101_v18, %v4101_v18  ;;  %v4099_v40 = vmul.f32 %v7468_v19, %v9880_v38  ;;  %7489 = vpow2.f32 %v5778_v62  ;;  %v5779_v24 = vmul.f32 -1.442695, %v10056_v29 }
 0x1db   :  { %11730 = vst [vmem:[#allocation31_spill] sm:$0xff] %v10093_v61  ;;  %v10101_v5 = vpop.f32.mrb[94].mxu0  ;;  %v10103_v0 = vpop.f32.mrb[94].mxu1  ;;  %5254 = vst.msk [vmem:[%s11613_s3 + $0xdc] sm:$0xf] %vm5198_vm3, %v6285_v56  ;;  %v6283_v43 = vpack.c.bf16 %v3971_v36, %v3971_v36  ;;  %v3976_v13 = vmul.f32 %v7470_v11, %v9885_v12  ;;  %7491 = vpow2.f32 %v5906_v46 }
 0x1dc   :  { %11731 = vst [vmem:[#allocation32_spill] sm:$0xff] %v10101_v5  ;;  %11732 = vst [vmem:[#allocation33_spill] sm:$0xff] %v10103_v0  ;;  %v7472_v33 = vpop.eup %7471  ;;  %v5907_v25 = vmul.f32 -1.442695, %v10067_v60  ;;  %v10111_v38 = vpop.f32.mrb[95].mxu0  ;;  %v6411_v19 = vpack.c.bf16 %v4099_v40, %v4099_v40  ;;  %7493 = vpow2.f32 %v5781_v22  ;;  %v11747_v5 = vld [vmem:[#allocation9_spill] sm:$0xff] }
 0x1dd   :  { %11733 = vst [vmem:[#allocation34_spill] sm:$0xff] %v10111_v38  ;;  %v10113_v62 = vpop.f32.mrb[95].mxu1  ;;  %v7474_v18 = vpop.eup %7473  ;;  %5382 = vst.msk [vmem:[%s11613_s3 + $0x2dc] sm:$0xf] %vm5198_vm3, %v6413_v50  ;;  %v4104_v31 = vmul.f32 %v7472_v33, %v9908_v6  ;;  %v5784_v56 = vmul.f32 -1.442695, %v10076_v15  ;;  %v6288_v46 = vpack.c.bf16 %v3976_v13, %v3976_v13  ;;  %7495 = vpow2.f32 %v5909_v47 }
 0x1de   :  { %11734 = vst [vmem:[#allocation35_spill] sm:$0xff] %v10113_v62  ;;  %v7476_v12 = vpop.eup %7475  ;;  %5252 = vst.msk [vmem:[%s11613_s3 + $0xd4] sm:$0xf] %vm5198_vm3, %v6283_v43  ;;  %v3974_v36 = vmul.f32 %v7474_v18, %v9917_v54  ;;  %v5912_v11 = vmul.f32 -1.442695, %v10089_v7  ;;  %7497 = vpow2.f32 %v5779_v24  ;;  %v10143_v24 = vpop.f32.mrb[96].mxu1 }
 0x1df   :  { %v7478_v62 = vpop.eup %7477  ;;  %5380 = vst.msk [vmem:[%s11613_s3 + $0x2d4] sm:$0xf] %vm5198_vm3, %v6411_v19  ;;  %v6416_v6 = vpack.c.bf16 %v4104_v31, %v4104_v31  ;;  %v4102_v22 = vmul.f32 %v7476_v12, %v9930_v3  ;;  %5257 = vst.msk [vmem:[%s11613_s3 + $0xe8] sm:$0xf] %vm5198_vm3, %v6288_v46  ;;  %7499 = vpow2.f32 %v5907_v25  ;;  %v10141_v3 = vpop.f32.mrb[96].mxu0 }
 0x1e0   :  { %v7480_v50 = vpop.eup %7479  ;;  %v6286_v54 = vpack.c.bf16 %v3974_v36, %v3974_v36  ;;  %v3977_v47 = vmul.f32 %v7478_v62, %v9939_v44  ;;  %7501 = vpow2.f32 %v5784_v56  ;;  %11735 = vst [vmem:[#allocation36_spill] sm:$0xff] %v10141_v3  ;;  %11736 = vst [vmem:[#allocation37_spill] sm:$0xff] %v10143_v24  ;;  %v10149_v62 = vpop.f32.mrb[97].mxu0  ;;  %v11744_v24 = vld [vmem:[#allocation8_spill] sm:$0xff] }
 0x1e1   :  { %v7482_v40 = vpop.eup %7481  ;;  %5385 = vst.msk [vmem:[%s11613_s3 + $0x2e8] sm:$0xf] %vm5198_vm3, %v6416_v6  ;;  %v6414_v33 = vpack.c.bf16 %v4102_v22, %v4102_v22  ;;  %v3337_v43 = vadd.f32 1.0, %v7480_v50  ;;  %7503 = vpow2.f32 %v5912_v11  ;;  %11737 = vst [vmem:[#allocation38_spill] sm:$0xff] %v10149_v62  ;;  %v10151_v18 = vpop.f32.mrb[97].mxu1  ;;  %v11739_v22 = vld [vmem:[#allocation41_spill] sm:$0xff] }
 0x1e2   :  { %v7484_v13 = vpop.eup %7483  ;;  %5255 = vst.msk [vmem:[%s11613_s3 + $0xe0] sm:$0xf] %vm5198_vm3, %v6286_v54  ;;  %v6289_v44 = vpack.c.bf16 %v3977_v47, %v3977_v47  ;;  %v3207_v25 = vadd.f32 1.0, %v7482_v40  ;;  %11738 = vst [vmem:[#allocation39_spill] sm:$0xff] %v10151_v18  ;;  %v10163_v50 = vadd.f32 %v9691_v27, %v11739_v22  ;;  %v10184_v22 = vadd.f32 %v9691_v27, %v9437_v4  ;;  %v10206_v3 = vpop.f32.mrb[98].mxu1 }
 0x1e3   :  { %v7486_v19 = vpop.eup %7485  ;;  %5383 = vst.msk [vmem:[%s11613_s3 + $0x2e0] sm:$0xf] %vm5198_vm3, %v6414_v33  ;;  %7505 = vrcp.f32 %v3337_v43  ;;  %v3335_v31 = vadd.f32 1.0, %v7484_v13  ;;  %v11740_v43 = vld [vmem:[#allocation4_spill] sm:$0xff]  ;;  %11746 = vst [vmem:[#allocation41_spill] sm:$0xff] %v10206_v3  ;;  %v10218_v3 = vpop.f32.mrb[99].mxu1 }
 0x1e4   :  { %v7488_v56 = vpop.eup %7487  ;;  %5258 = vst.msk [vmem:[%s11613_s3 + $0xec] sm:$0xf] %vm5198_vm3, %v6289_v44  ;;  %7507 = vrcp.f32 %v3207_v25  ;;  %v3212_v12 = vadd.f32 1.0, %v7486_v19  ;;  %v10167_v13 = vadd.f32 %v9691_v27, %v11740_v43  ;;  %v11741_v44 = vld [vmem:[#allocation5_spill] sm:$0xff]  ;;  %v11743_v43 = vld [vmem:[#allocation7_spill] sm:$0xff] }
 0x1e5   :  { %v7490_v46 = vpop.eup %7489  ;;  %7509 = vrcp.f32 %v3335_v31  ;;  %v3340_v36 = vadd.f32 1.0, %v7488_v56  ;;  %v10171_v25 = vadd.f32 %v9691_v27, %v11741_v44  ;;  %v11742_v56 = vld [vmem:[#allocation6_spill] sm:$0xff] }
 0x1e6   :  { %v7492_v11 = vpop.eup %7491  ;;  %7511 = vrcp.f32 %v3212_v12  ;;  %v3210_v6 = vadd.f32 1.0, %v7490_v46  ;;  %v10175_v12 = vadd.f32 %v9691_v27, %v11742_v56  ;;  %v10179_v46 = vadd.f32 %v9691_v27, %v9435_v37 }
 0x1e7   :  { %v7494_v54 = vpop.eup %7493  ;;  %7513 = vrcp.f32 %v3340_v36  ;;  %v3338_v47 = vadd.f32 1.0, %v7492_v11  ;;  %v10192_v37 = vadd.f32 %v9691_v27, %v11743_v43  ;;  %v5785_v56 = vmul.f32 -1.442695, %v10171_v25 }
 0x1e8   :  { %v7496_v40 = vpop.eup %7495  ;;  %7515 = vrcp.f32 %v3210_v6  ;;  %v3213_v33 = vadd.f32 1.0, %v7494_v54  ;;  %v5782_v6 = vmul.f32 -1.442695, %v10163_v50  ;;  %v5911_v43 = vmul.f32 -1.442695, %v10184_v22 }
 0x1e9   :  { %v7498_v19 = vpop.eup %7497  ;;  %7517 = vrcp.f32 %v3338_v47  ;;  %v3341_v31 = vadd.f32 1.0, %v7496_v40  ;;  %v10188_v40 = vadd.f32 %v9691_v27, %v9484_v52  ;;  %v5916_v0 = vmul.f32 -1.442695, %v10192_v37 }
 0x1ea   :  { %v7500_v36 = vpop.eup %7499  ;;  %7519 = vrcp.f32 %v3213_v33  ;;  %v3211_v11 = vadd.f32 1.0, %v7498_v19  ;;  %v5910_v19 = vmul.f32 -1.442695, %v10167_v13 }
 0x1eb   :  { %v7502_v54 = vpop.eup %7501  ;;  %7521 = vrcp.f32 %v3341_v31  ;;  %v3339_v47 = vadd.f32 1.0, %v7500_v36  ;;  %v5913_v31 = vmul.f32 -1.442695, %v10175_v12  ;;  %v5783_v36 = vmul.f32 -1.442695, %v10179_v46 }
 0x1ec   :  { %v7504_v44 = vpop.eup %7503  ;;  %7523 = vrcp.f32 %v3211_v11  ;;  %v3216_v33 = vadd.f32 1.0, %v7502_v54  ;;  %v10202_v11 = vadd.f32 %v9691_v27, %v11744_v24  ;;  %v10204_v54 = vpop.f32.mrb[98].mxu0  ;;  %v5788_v38 = vmul.f32 -1.442695, %v10188_v40 }
 0x1ed   :  { %v7506_v4 = vpop.eup %7505  ;;  %7525 = vrcp.f32 %v3339_v47  ;;  %v3344_v18 = vadd.f32 1.0, %v7504_v44  ;;  %11745 = vst [vmem:[#allocation40_spill] sm:$0xff] %v10204_v54  ;;  %v10214_v24 = vadd.f32 %v9691_v27, %v11747_v5  ;;  %v10216_v54 = vpop.f32.mrb[99].mxu0 }
 0x1ee   :  { %v7508_v52 = vpop.eup %7507  ;;  %v4105_v62 = vmul.f32 %v7506_v4, %v10007_v45  ;;  %7527 = vrcp.f32 %v3216_v33 }
 0x1ef   :  { %v7510_v47 = vpop.eup %7509  ;;  %v3975_v44 = vmul.f32 %v7508_v52, %v10011_v17  ;;  %7529 = vrcp.f32 %v3344_v18  ;;  %v11748_v52 = vld [vmem:[#allocation10_spill] sm:$0xff] }
 0x1f0   :  { %v7512_v45 = vpop.eup %7511  ;;  %v6417_v33 = vpack.c.bf16 %v4105_v62, %v4105_v62  ;;  %v4103_v4 = vmul.f32 %v7510_v47, %v10015_v57  ;;  %7531 = vpow2.f32 %v5782_v6  ;;  %v10223_v16 = vadd.f32 %v9691_v27, %v11748_v52 }
 0x1f1   :  { %v7514_v61 = vpop.eup %7513  ;;  %v6287_v17 = vpack.c.bf16 %v3975_v44, %v3975_v44  ;;  %v3980_v18 = vmul.f32 %v7512_v45, %v10020_v58  ;;  %7533 = vpow2.f32 %v5910_v19  ;;  %v5786_v6 = vmul.f32 -1.442695, %v10202_v11  ;;  %v11749_v44 = vld [vmem:[#allocation42_spill] sm:$0xff] }
 0x1f2   :  { %v7516_v62 = vpop.eup %7515  ;;  %5386 = vst.msk [vmem:[%s11613_s3 + $0x2ec] sm:$0xf] %vm5198_vm3, %v6417_v33  ;;  %v6415_v57 = vpack.c.bf16 %v4103_v4, %v4103_v4  ;;  %v4108_v5 = vmul.f32 %v7514_v61, %v10024_v2  ;;  %7535 = vpow2.f32 %v5785_v56  ;;  %v10238_v45 = vadd.f32 %v9691_v27, %v11749_v44  ;;  %v11750_v56 = vld [vmem:[#allocation43_spill] sm:$0xff] }
 0x1f3   :  { %v7518_v47 = vpop.eup %7517  ;;  %5256 = vst.msk [vmem:[%s11613_s3 + $0xe4] sm:$0xf] %vm5198_vm3, %v6287_v17  ;;  %v6292_v58 = vpack.c.bf16 %v3980_v18, %v3980_v18  ;;  %v3978_v19 = vmul.f32 %v7516_v62, %v10028_v21  ;;  %7537 = vpow2.f32 %v5913_v31  ;;  %v10247_v4 = vadd.f32 %v9691_v27, %v11750_v56  ;;  %v10261_v62 = vpop.f32.mrb[100].mxu0 }
 0x1f4   :  { %v7520_v33 = vpop.eup %7519  ;;  %5384 = vst.msk [vmem:[%s11613_s3 + $0x2e4] sm:$0xf] %vm5198_vm3, %v6415_v57  ;;  %v6420_v2 = vpack.c.bf16 %v4108_v5, %v4108_v5  ;;  %v4106_v61 = vmul.f32 %v7518_v47, %v10032_v23  ;;  %7539 = vpow2.f32 %v5783_v36  ;;  %v5914_v18 = vmul.f32 -1.442695, %v10214_v24  ;;  %v10263_v57 = vpop.f32.mrb[100].mxu1 }
 0x1f5   :  { %v7522_v21 = vpop.eup %7521  ;;  %5261 = vst.msk [vmem:[%s11613_s3 + $0xf8] sm:$0xf] %vm5198_vm3, %v6292_v58  ;;  %v6290_v31 = vpack.c.bf16 %v3978_v19, %v3978_v19  ;;  %v3981_v17 = vmul.f32 %v7520_v33, %v10036_v8  ;;  %7541 = vpow2.f32 %v5911_v43  ;;  %v5789_v36 = vmul.f32 -1.442695, %v10223_v16 }
 0x1f6   :  { %v7524_v52 = vpop.eup %7523  ;;  %5389 = vst.msk [vmem:[%s11613_s3 + $0x2f8] sm:$0xf] %vm5198_vm3, %v6420_v2  ;;  %v6418_v27 = vpack.c.bf16 %v4106_v61, %v4106_v61  ;;  %v4109_v23 = vmul.f32 %v7522_v21, %v10043_v34  ;;  %7543 = vpow2.f32 %v5788_v38  ;;  %v5917_v47 = vmul.f32 -1.442695, %v10238_v45  ;;  %v10271_v34 = vpop.f32.mrb[101].mxu0 }
 0x1f7   :  { %v7526_v8 = vpop.eup %7525  ;;  %5259 = vst.msk [vmem:[%s11613_s3 + $0xf0] sm:$0xf] %vm5198_vm3, %v6290_v31  ;;  %v6293_v43 = vpack.c.bf16 %v3981_v17, %v3981_v17  ;;  %v3979_v5 = vmul.f32 %v7524_v52, %v10056_v29  ;;  %7545 = vpow2.f32 %v5916_v0  ;;  %v10273_v38 = vpop.f32.mrb[101].mxu1  ;;  %v5787_v33 = vmul.f32 -1.442695, %v10247_v4 }
 0x1f8   :  { %v7528_v58 = vpop.eup %7527  ;;  %5387 = vst.msk [vmem:[%s11613_s3 + $0x2f0] sm:$0xf] %vm5198_vm3, %v6418_v27  ;;  %v6421_v19 = vpack.c.bf16 %v4109_v23, %v4109_v23  ;;  %v4107_v44 = vmul.f32 %v7526_v8, %v10067_v60  ;;  %7547 = vpow2.f32 %v5786_v6  ;;  %v10281_v29 = vpop.f32.mrb[102].mxu0 }
 0x1f9   :  { %v10283_v0 = vpop.f32.mrb[102].mxu1  ;;  %v7530_v2 = vpop.eup %7529  ;;  %5262 = vst.msk [vmem:[%s11613_s3 + $0xfc] sm:$0xf] %vm5198_vm3, %v6293_v43  ;;  %v6291_v61 = vpack.c.bf16 %v3979_v5, %v3979_v5  ;;  %v3984_v56 = vmul.f32 %v7528_v58, %v10076_v15  ;;  %7549 = vpow2.f32 %v5914_v18 }
 0x1fa   :  { %v10290_v21 = vpop.f32.mrb[103].mxu0  ;;  %v10292_v60 = vpop.f32.mrb[103].mxu1  ;;  %5390 = vst.msk [vmem:[%s11613_s3 + $0x2fc] sm:$0xf] %vm5198_vm3, %v6421_v19  ;;  %v6419_v31 = vpack.c.bf16 %v4107_v44, %v4107_v44  ;;  %v4112_v17 = vmul.f32 %v7530_v2, %v10089_v7  ;;  %7551 = vpow2.f32 %v5789_v36  ;;  %v10320_v44 = vld [vmem:[%s11612_s2] ss:$0 sm:$0xff] }
 0x1fb   :  { %11751 = vst [vmem:[#allocation4_spill] sm:$0xff] %v10292_v60  ;;  %v7532_v6 = vpop.eup %7531  ;;  %5260 = vst.msk [vmem:[%s11613_s3 + $0xf4] sm:$0xf] %vm5198_vm3, %v6291_v61  ;;  %v6296_v15 = vpack.c.bf16 %v3984_v56, %v3984_v56  ;;  %7553 = vpow2.f32 %v5917_v47  ;;  %v10315_v47 = vpop.f32.mrb[104].mxu0 }
 0x1fc   :  { %v7534_v52 = vpop.eup %7533  ;;  %v3214_v18 = vadd.f32 1.0, %v7532_v6  ;;  %5388 = vst.msk [vmem:[%s11613_s3 + $0x2f4] sm:$0xf] %vm5198_vm3, %v6419_v31  ;;  %v6424_v23 = vpack.c.bf16 %v4112_v17, %v4112_v17  ;;  %7555 = vpow2.f32 %v5787_v33  ;;  %11752 = vst [vmem:[#allocation5_spill] sm:$0xff] %v10315_v47  ;;  %v11753_v33 = vld [vmem:[#allocation44_spill] sm:$0xff] }
 0x1fd   :  { %v7536_v27 = vpop.eup %7535  ;;  %v3342_v8 = vadd.f32 1.0, %v7534_v52  ;;  %5265 = vst.msk [vmem:[%s11613_s3 + $0x108] sm:$0xf] %vm5198_vm3, %v6296_v15  ;;  %v10324_v2 = vadd.f32 %v10320_v44, %v11753_v33  ;;  %v10328_v15 = vadd.f32 %v10320_v44, %v9594_v10  ;;  %v10341_v10 = vadd.f32 %v10320_v44, %v9609_v14 }
 0x1fe   :  { %v7538_v7 = vpop.eup %7537  ;;  %7557 = vrcp.f32 %v3214_v18  ;;  %v3217_v36 = vadd.f32 1.0, %v7536_v27  ;;  %5393 = vst.msk [vmem:[%s11613_s3 + $0x308] sm:$0xf] %vm5198_vm3, %v6424_v23  ;;  %v10332_v18 = vadd.f32 %v10320_v44, %v9596_v49  ;;  %v10345_v49 = vadd.f32 %v10320_v44, %v9620_v48 }
 0x1ff   :  { %v7540_v43 = vpop.eup %7539  ;;  %7559 = vrcp.f32 %v3342_v8  ;;  %v3345_v5 = vadd.f32 1.0, %v7538_v7  ;;  %v5915_v8 = vmul.f32 -1.442695, %v10324_v2  ;;  %v10337_v7 = vadd.f32 %v10320_v44, %v9607_v9 }
 0x200   :  { %v7542_v58 = vpop.eup %7541  ;;  %7561 = vrcp.f32 %v3217_v36  ;;  %v3215_v19 = vadd.f32 1.0, %v7540_v43  ;;  %v10353_v9 = vadd.f32 %v10320_v44, %v9630_v42  ;;  %v5792_v14 = vmul.f32 -1.442695, %v10328_v15 }
 0x201   :  { %v7544_v61 = vpop.eup %7543  ;;  %7563 = vrcp.f32 %v3345_v5  ;;  %v3343_v56 = vadd.f32 1.0, %v7542_v58  ;;  %v10358_v48 = vadd.f32 %v10320_v44, %v9632_v39 }
 0x202   :  { %v7546_v6 = vpop.eup %7545  ;;  %7565 = vrcp.f32 %v3215_v19  ;;  %v3220_v31 = vadd.f32 1.0, %v7544_v61  ;;  %v10349_v19 = vadd.f32 %v10320_v44, %v9622_v26  ;;  %v5790_v26 = vmul.f32 -1.442695, %v10337_v7 }
 0x203   :  { %v7548_v17 = vpop.eup %7547  ;;  %7567 = vrcp.f32 %v3343_v56  ;;  %v3348_v52 = vadd.f32 1.0, %v7546_v6 }
 0x204   :  { %v7550_v27 = vpop.eup %7549  ;;  %7569 = vrcp.f32 %v3220_v31  ;;  %v3218_v23 = vadd.f32 1.0, %v7548_v17  ;;  %v5920_v31 = vmul.f32 -1.442695, %v10332_v18  ;;  %v10362_v17 = vpop.f32.mrb[104].mxu1 }
 0x205   :  { %v7552_v36 = vpop.eup %7551  ;;  %7571 = vrcp.f32 %v3348_v52  ;;  %v3346_v43 = vadd.f32 1.0, %v7550_v27  ;;  %11754 = vst [vmem:[#allocation6_spill] sm:$0xff] %v10362_v17  ;;  %v5918_v27 = vmul.f32 -1.442695, %v10341_v10 }
 0x206   :  { %v7554_v5 = vpop.eup %7553  ;;  %7573 = vrcp.f32 %v3218_v23  ;;  %v3221_v58 = vadd.f32 1.0, %v7552_v36  ;;  %v5793_v23 = vmul.f32 -1.442695, %v10345_v49 }
 0x207   :  { %v7556_v33 = vpop.eup %7555  ;;  %7575 = vrcp.f32 %v3346_v43  ;;  %v3349_v61 = vadd.f32 1.0, %v7554_v5  ;;  %v5921_v43 = vmul.f32 -1.442695, %v10349_v19  ;;  %v5791_v5 = vmul.f32 -1.442695, %v10353_v9 }
 0x208   :  { %v7558_v56 = vpop.eup %7557  ;;  %7577 = vrcp.f32 %v3221_v58  ;;  %v3219_v6 = vadd.f32 1.0, %v7556_v33  ;;  %v10370_v58 = vpop.f32.mrb[105].mxu0 }
 0x209   :  { %v7560_v42 = vpop.eup %7559  ;;  %v3982_v52 = vmul.f32 %v7558_v56, %v10163_v50  ;;  %7579 = vrcp.f32 %v3349_v61  ;;  %11755 = vst [vmem:[#allocation7_spill] sm:$0xff] %v10370_v58  ;;  %v10372_v33 = vpop.f32.mrb[105].mxu1  ;;  %v5919_v61 = vmul.f32 -1.442695, %v10358_v48 }
 0x20a   :  { %v7562_v36 = vpop.eup %7561  ;;  %v4110_v39 = vmul.f32 %v7560_v42, %v10167_v13  ;;  %7581 = vrcp.f32 %v3219_v6  ;;  %11756 = vst [vmem:[#allocation8_spill] sm:$0xff] %v10372_v33  ;;  %v10379_v6 = vadd.f32 %v10320_v44, %v9662_v53  ;;  %v10381_v42 = vpop.f32.mrb[106].mxu0 }
 0x20b   :  { %v7564_v17 = vpop.eup %7563  ;;  %v6294_v47 = vpack.c.bf16 %v3982_v52, %v3982_v52  ;;  %v3985_v50 = vmul.f32 %v7562_v36, %v10171_v25  ;;  %7583 = vpow2.f32 %v5915_v8  ;;  %v10383_v58 = vpop.f32.mrb[106].mxu1  ;;  %v11758_v36 = vld [vmem:[#allocation12_spill] sm:$0xff] }
 0x20c   :  { %v7566_v56 = vpop.eup %7565  ;;  %v6422_v60 = vpack.c.bf16 %v4110_v39, %v4110_v39  ;;  %v4113_v13 = vmul.f32 %v7564_v17, %v10175_v12  ;;  %7585 = vpow2.f32 %v5792_v14  ;;  %v11757_v12 = vld [vmem:[#allocation11_spill] sm:$0xff] }
 0x20d   :  { %v7568_v33 = vpop.eup %7567  ;;  %5263 = vst.msk [vmem:[%s11613_s3 + $0x100] sm:$0xf] %vm5198_vm3, %v6294_v47  ;;  %v6297_v25 = vpack.c.bf16 %v3985_v50, %v3985_v50  ;;  %v3983_v8 = vmul.f32 %v7566_v56, %v10179_v46  ;;  %7587 = vpow2.f32 %v5920_v31  ;;  %v10392_v14 = vadd.f32 %v10320_v44, %v11757_v12  ;;  %v10403_v46 = vpop.f32.mrb[107].mxu0 }
 0x20e   :  { %v7570_v53 = vpop.eup %7569  ;;  %5391 = vst.msk [vmem:[%s11613_s3 + $0x300] sm:$0xf] %vm5198_vm3, %v6422_v60  ;;  %v6425_v17 = vpack.c.bf16 %v4113_v13, %v4113_v13  ;;  %v4111_v52 = vmul.f32 %v7568_v33, %v10184_v22  ;;  %7589 = vpow2.f32 %v5790_v26  ;;  %v10401_v47 = vadd.f32 %v10320_v44, %v11758_v36  ;;  %v10405_v31 = vpop.f32.mrb[107].mxu1  ;;  %v11760_v22 = vld [vmem:[#allocation13_spill] sm:$0xff] }
 0x20f   :  { %11759 = vst [vmem:[#allocation9_spill] sm:$0xff] %v10405_v31  ;;  %v7572_v39 = vpop.eup %7571  ;;  %5266 = vst.msk [vmem:[%s11613_s3 + $0x10c] sm:$0xf] %vm5198_vm3, %v6297_v25  ;;  %v6295_v50 = vpack.c.bf16 %v3983_v8, %v3983_v8  ;;  %v3988_v60 = vmul.f32 %v7570_v53, %v10188_v40  ;;  %7591 = vpow2.f32 %v5918_v27  ;;  %v10414_v26 = vadd.f32 %v10320_v44, %v11760_v22 }
 0x210   :  { %v7574_v33 = vpop.eup %7573  ;;  %5394 = vst.msk [vmem:[%s11613_s3 + $0x30c] sm:$0xf] %vm5198_vm3, %v6425_v17  ;;  %v6423_v56 = vpack.c.bf16 %v4111_v52, %v4111_v52  ;;  %v4116_v13 = vmul.f32 %v7572_v39, %v10192_v37  ;;  %7593 = vpow2.f32 %v5793_v23  ;;  %v5796_v25 = vmul.f32 -1.442695, %v10379_v6 }
 0x211   :  { %v7576_v8 = vpop.eup %7575  ;;  %5264 = vst.msk [vmem:[%s11613_s3 + $0x104] sm:$0xf] %vm5198_vm3, %v6295_v50  ;;  %v6300_v40 = vpack.c.bf16 %v3988_v60, %v3988_v60  ;;  %v3986_v27 = vmul.f32 %v7574_v33, %v10202_v11  ;;  %7595 = vpow2.f32 %v5921_v43  ;;  %v5924_v12 = vmul.f32 -1.442695, %v10392_v14  ;;  %v10445_v50 = vpop.f32.mrb[108].mxu0 }
 0x212   :  { %v7578_v53 = vpop.eup %7577  ;;  %5392 = vst.msk [vmem:[%s11613_s3 + $0x304] sm:$0xf] %vm5198_vm3, %v6423_v56  ;;  %v6428_v37 = vpack.c.bf16 %v4116_v13, %v4116_v13  ;;  %v4114_v23 = vmul.f32 %v7576_v8, %v10214_v24  ;;  %7597 = vpow2.f32 %v5791_v5  ;;  %v5794_v17 = vmul.f32 -1.442695, %v10401_v47  ;;  %11761 = vst [vmem:[#allocation10_spill] sm:$0xff] %v10445_v50  ;;  %v10447_v60 = vpop.f32.mrb[108].mxu1 }
 0x213   :  { %v7580_v52 = vpop.eup %7579  ;;  %5269 = vst.msk [vmem:[%s11613_s3 + $0x118] sm:$0xf] %vm5198_vm3, %v6300_v40  ;;  %v6298_v11 = vpack.c.bf16 %v3986_v27, %v3986_v27  ;;  %v3989_v43 = vmul.f32 %v7578_v53, %v10223_v16  ;;  %7599 = vpow2.f32 %v5919_v61  ;;  %v5922_v36 = vmul.f32 -1.442695, %v10414_v26  ;;  %11762 = vst [vmem:[#allocation42_spill] sm:$0xff] %v10447_v60  ;;  %v10454_v33 = vpop.f32.mrb[109].mxu0 }
 0x214   :  { %v7582_v39 = vpop.eup %7581  ;;  %5397 = vst.msk [vmem:[%s11613_s3 + $0x318] sm:$0xf] %vm5198_vm3, %v6428_v37  ;;  %v6426_v24 = vpack.c.bf16 %v4114_v23, %v4114_v23  ;;  %v4117_v5 = vmul.f32 %v7580_v52, %v10238_v45  ;;  %7601 = vpow2.f32 %v5796_v25  ;;  %11763 = vst [vmem:[#allocation43_spill] sm:$0xff] %v10454_v33  ;;  %v10456_v56 = vpop.f32.mrb[109].mxu1 }
 0x215   :  { %v7584_v22 = vpop.eup %7583  ;;  %5267 = vst.msk [vmem:[%s11613_s3 + $0x110] sm:$0xf] %vm5198_vm3, %v6298_v11  ;;  %v6301_v16 = vpack.c.bf16 %v3989_v43, %v3989_v43  ;;  %v3987_v61 = vmul.f32 %v7582_v39, %v10247_v4  ;;  %7603 = vpow2.f32 %v5924_v12  ;;  %11764 = vst [vmem:[#allocation44_spill] sm:$0xff] %v10456_v56  ;;  %v10462_v8 = vpop.f32.mrb[110].mxu0  ;;  %v11767_v43 = vld [vmem:[#allocation14_spill] sm:$0xff] }
 0x216   :  { %v7586_v45 = vpop.eup %7585  ;;  %5395 = vst.msk [vmem:[%s11613_s3 + $0x310] sm:$0xf] %vm5198_vm3, %v6426_v24  ;;  %v6429_v13 = vpack.c.bf16 %v4117_v5, %v4117_v5  ;;  %v3347_v25 = vadd.f32 1.0, %v7584_v22  ;;  %7605 = vpow2.f32 %v5794_v17  ;;  %11765 = vst [vmem:[#allocation11_spill] sm:$0xff] %v10462_v8  ;;  %v10464_v40 = vpop.f32.mrb[110].mxu1 }
 0x217   :  { %11766 = vst [vmem:[#allocation12_spill] sm:$0xff] %v10464_v40  ;;  %v7588_v27 = vpop.eup %7587  ;;  %5270 = vst.msk [vmem:[%s11613_s3 + $0x11c] sm:$0xf] %vm5198_vm3, %v6301_v16  ;;  %v6299_v4 = vpack.c.bf16 %v3987_v61, %v3987_v61  ;;  %v3224_v12 = vadd.f32 1.0, %v7586_v45  ;;  %7607 = vpow2.f32 %v5922_v36  ;;  %v10480_v36 = vadd.f32 %v10320_v44, %v11767_v43  ;;  %v11768_v45 = vld [vmem:[#allocation15_spill] sm:$0xff]  ;;  %v10521_v8 = vpop.f32.mrb[111].mxu0 }
 0x218   :  { %v7590_v53 = vpop.eup %7589  ;;  %5398 = vst.msk [vmem:[%s11613_s3 + $0x31c] sm:$0xf] %vm5198_vm3, %v6429_v13  ;;  %7609 = vrcp.f32 %v3347_v25  ;;  %v3352_v37 = vadd.f32 1.0, %v7588_v27  ;;  %v10484_v13 = vadd.f32 %v10320_v44, %v11768_v45  ;;  %v11769_v25 = vld [vmem:[#allocation16_spill] sm:$0xff]  ;;  %11774 = vst [vmem:[#allocation13_spill] sm:$0xff] %v10521_v8  ;;  %v10523_v56 = vpop.f32.mrb[111].mxu1 }
 0x219   :  { %v7592_v23 = vpop.eup %7591  ;;  %5268 = vst.msk [vmem:[%s11613_s3 + $0x114] sm:$0xf] %vm5198_vm3, %v6299_v4  ;;  %7611 = vrcp.f32 %v3224_v12  ;;  %v3222_v17 = vadd.f32 1.0, %v7590_v53  ;;  %v10488_v27 = vadd.f32 %v10320_v44, %v11769_v25  ;;  %v5797_v53 = vmul.f32 -1.442695, %v10480_v36  ;;  %11775 = vst [vmem:[#allocation14_spill] sm:$0xff] %v10523_v56 }
 0x21a   :  { %v7594_v52 = vpop.eup %7593  ;;  %7613 = vrcp.f32 %v3352_v37  ;;  %v3350_v11 = vadd.f32 1.0, %v7592_v23  ;;  %v10493_v37 = vadd.f32 %v10320_v44, %v9743_v30  ;;  %v11772_v30 = vld [vmem:[#allocation19_spill] sm:$0xff] }
 0x21b   :  { %v7596_v39 = vpop.eup %7595  ;;  %7615 = vrcp.f32 %v3222_v17  ;;  %v3225_v24 = vadd.f32 1.0, %v7594_v52  ;;  %v10497_v52 = vadd.f32 %v10320_v44, %v9785_v35  ;;  %v5925_v35 = vmul.f32 -1.442695, %v10484_v13 }
 0x21c   :  { %v7598_v5 = vpop.eup %7597  ;;  %7617 = vrcp.f32 %v3350_v11  ;;  %v3353_v22 = vadd.f32 1.0, %v7596_v39  ;;  %v11770_v11 = vld [vmem:[#allocation17_spill] sm:$0xff]  ;;  %v5795_v25 = vmul.f32 -1.442695, %v10488_v27 }
 0x21d   :  { %v7600_v16 = vpop.eup %7599  ;;  %7619 = vrcp.f32 %v3225_v24  ;;  %v3223_v61 = vadd.f32 1.0, %v7598_v5  ;;  %v10501_v43 = vadd.f32 %v10320_v44, %v11770_v11  ;;  %v11771_v5 = vld [vmem:[#allocation18_spill] sm:$0xff] }
 0x21e   :  { %v7602_v4 = vpop.eup %7601  ;;  %7621 = vrcp.f32 %v3353_v22  ;;  %v3351_v12 = vadd.f32 1.0, %v7600_v16  ;;  %v10505_v22 = vadd.f32 %v10320_v44, %v11771_v5  ;;  %v10509_v16 = vadd.f32 %v10320_v44, %v11772_v30 }
 0x21f   :  { %v7604_v23 = vpop.eup %7603  ;;  %7623 = vrcp.f32 %v3223_v61  ;;  %v3228_v17 = vadd.f32 1.0, %v7602_v4 }
 0x220   :  { %v7606_v39 = vpop.eup %7605  ;;  %7625 = vrcp.f32 %v3351_v12  ;;  %v3356_v24 = vadd.f32 1.0, %v7604_v23  ;;  %v5923_v12 = vmul.f32 -1.442695, %v10493_v37  ;;  %v11773_v23 = vld [vmem:[#allocation20_spill] sm:$0xff]  ;;  %v5798_v33 = vmul.f32 -1.442695, %v10505_v22 }
 0x221   :  { %v7608_v61 = vpop.eup %7607  ;;  %7627 = vrcp.f32 %v3228_v17  ;;  %v3226_v45 = vadd.f32 1.0, %v7606_v39  ;;  %v10516_v5 = vadd.f32 %v10320_v44, %v11773_v23  ;;  %v5800_v17 = vmul.f32 -1.442695, %v10497_v52 }
 0x222   :  { %v7610_v4 = vpop.eup %7609  ;;  %7629 = vrcp.f32 %v3356_v24  ;;  %v3354_v11 = vadd.f32 1.0, %v7608_v61  ;;  %v5928_v39 = vmul.f32 -1.442695, %v10501_v43  ;;  %v5926_v23 = vmul.f32 -1.442695, %v10509_v16 }
 0x223   :  { %v7612_v40 = vpop.eup %7611  ;;  %v4115_v30 = vmul.f32 %v7610_v4, %v10324_v2  ;;  %7631 = vrcp.f32 %v3226_v45  ;;  %v11776_v45 = vld [vmem:[#allocation21_spill] sm:$0xff] }
 0x224   :  { %v7614_v24 = vpop.eup %7613  ;;  %v3992_v61 = vmul.f32 %v7612_v40, %v10328_v15  ;;  %7633 = vrcp.f32 %v3354_v11  ;;  %v10531_v4 = vadd.f32 %v10320_v44, %v11776_v45  ;;  %v5801_v15 = vmul.f32 -1.442695, %v10516_v5 }
 0x225   :  { %v7616_v60 = vpop.eup %7615  ;;  %v6427_v50 = vpack.c.bf16 %v4115_v30, %v4115_v30  ;;  %v4120_v2 = vmul.f32 %v7614_v24, %v10332_v18  ;;  %7635 = vpow2.f32 %v5797_v53  ;;  %v11777_v53 = vld [vmem:[#allocation22_spill] sm:$0xff] }
 0x226   :  { %v7618_v8 = vpop.eup %7617  ;;  %v6304_v31 = vpack.c.bf16 %v3992_v61, %v3992_v61  ;;  %v3990_v56 = vmul.f32 %v7616_v60, %v10337_v7  ;;  %7637 = vpow2.f32 %v5925_v35  ;;  %v10542_v30 = vadd.f32 %v10320_v44, %v11777_v53  ;;  %v11778_v35 = vld [vmem:[#allocation23_spill] sm:$0xff]  ;;  %v11779_v61 = vld [vmem:[#allocation24_spill] sm:$0xff] }
 0x227   :  { %v7620_v40 = vpop.eup %7619  ;;  %5396 = vst.msk [vmem:[%s11613_s3 + $0x314] sm:$0xf] %vm5198_vm3, %v6427_v50  ;;  %v6432_v11 = vpack.c.bf16 %v4120_v2, %v4120_v2  ;;  %v4118_v18 = vmul.f32 %v7618_v8, %v10341_v10  ;;  %7639 = vpow2.f32 %v5795_v25  ;;  %v10551_v50 = vadd.f32 %v10320_v44, %v11778_v35 }
 0x228   :  { %v7622_v24 = vpop.eup %7621  ;;  %5273 = vst.msk [vmem:[%s11613_s3 + $0x128] sm:$0xf] %vm5198_vm3, %v6304_v31  ;;  %v6302_v7 = vpack.c.bf16 %v3990_v56, %v3990_v56  ;;  %v3993_v60 = vmul.f32 %v7620_v40, %v10345_v49  ;;  %7641 = vpow2.f32 %v5923_v12  ;;  %v10560_v31 = vadd.f32 %v10320_v44, %v11779_v61  ;;  %v10562_v49 = vpop.f32.mrb[112].mxu0 }
 0x229   :  { %v7624_v10 = vpop.eup %7623  ;;  %5401 = vst.msk [vmem:[%s11613_s3 + $0x328] sm:$0xf] %vm5198_vm3, %v6432_v11  ;;  %v6430_v8 = vpack.c.bf16 %v4118_v18, %v4118_v18  ;;  %v4121_v25 = vmul.f32 %v7622_v24, %v10349_v19  ;;  %7643 = vpow2.f32 %v5800_v17  ;;  %v10564_v56 = vpop.f32.mrb[112].mxu1  ;;  %v5929_v19 = vmul.f32 -1.442695, %v10531_v4 }
 0x22a   :  { %v7626_v12 = vpop.eup %7625  ;;  %5271 = vst.msk [vmem:[%s11613_s3 + $0x120] sm:$0xf] %vm5198_vm3, %v6302_v7  ;;  %v6305_v2 = vpack.c.bf16 %v3993_v60, %v3993_v60  ;;  %v3991_v45 = vmul.f32 %v7624_v10, %v10353_v9  ;;  %7645 = vpow2.f32 %v5928_v39  ;;  %v10572_v17 = vpop.f32.mrb[113].mxu0  ;;  %v5799_v24 = vmul.f32 -1.442695, %v10542_v30 }
 0x22b   :  { %v10574_v40 = vpop.f32.mrb[113].mxu1  ;;  %v7628_v11 = vpop.eup %7627  ;;  %5399 = vst.msk [vmem:[%s11613_s3 + $0x320] sm:$0xf] %vm5198_vm3, %v6430_v8  ;;  %v6433_v18 = vpack.c.bf16 %v4121_v25, %v4121_v25  ;;  %v4119_v53 = vmul.f32 %v7626_v12, %v10358_v48  ;;  %7647 = vpow2.f32 %v5798_v33  ;;  %v5927_v10 = vmul.f32 -1.442695, %v10551_v50 }
 0x22c   :  { %v10582_v9 = vpop.f32.mrb[114].mxu0  ;;  %v10584_v39 = vpop.f32.mrb[114].mxu1  ;;  %5274 = vst.msk [vmem:[%s11613_s3 + $0x12c] sm:$0xf] %vm5198_vm3, %v6305_v2  ;;  %v6303_v60 = vpack.c.bf16 %v3991_v45, %v3991_v45  ;;  %v3996_v35 = vmul.f32 %v7628_v11, %v10379_v6  ;;  %7649 = vpow2.f32 %v5926_v23  ;;  %v5804_v12 = vmul.f32 -1.442695, %v10560_v31 }
 0x22d   :  { %v7630_v7 = vpop.eup %7629  ;;  %v10592_v48 = vpop.f32.mrb[115].mxu0  ;;  %5402 = vst.msk [vmem:[%s11613_s3 + $0x32c] sm:$0xf] %vm5198_vm3, %v6433_v18  ;;  %v6431_v25 = vpack.c.bf16 %v4119_v53, %v4119_v53  ;;  %7651 = vpow2.f32 %v5801_v15 }
 0x22e   :  { %11780 = vst [vmem:[#allocation15_spill] sm:$0xff] %v10592_v48  ;;  %v10594_v33 = vpop.f32.mrb[115].mxu1  ;;  %v7632_v8 = vpop.eup %7631  ;;  %v4124_v61 = vmul.f32 %v7630_v7, %v10392_v14  ;;  %5272 = vst.msk [vmem:[%s11613_s3 + $0x124] sm:$0xf] %vm5198_vm3, %v6303_v60  ;;  %v6308_v23 = vpack.c.bf16 %v3996_v35, %v3996_v35  ;;  %7653 = vpow2.f32 %v5929_v19 }
 0x22f   :  { %11781 = vst [vmem:[#allocation16_spill] sm:$0xff] %v10594_v33  ;;  %v7634_v6 = vpop.eup %7633  ;;  %v3994_v2 = vmul.f32 %v7632_v8, %v10401_v47  ;;  %5400 = vst.msk [vmem:[%s11613_s3 + $0x324] sm:$0xf] %vm5198_vm3, %v6431_v25  ;;  %7655 = vpow2.f32 %v5799_v24  ;;  %v10622_v24 = vpop.f32.mrb[116].mxu1 }
 0x230   :  { %v7636_v45 = vpop.eup %7635  ;;  %v6436_v14 = vpack.c.bf16 %v4124_v61, %v4124_v61  ;;  %v4122_v15 = vmul.f32 %v7634_v6, %v10414_v26  ;;  %5277 = vst.msk [vmem:[%s11613_s3 + $0x138] sm:$0xf] %vm5198_vm3, %v6308_v23  ;;  %7657 = vpow2.f32 %v5927_v10  ;;  %v10620_v26 = vpop.f32.mrb[116].mxu0  ;;  %11783 = vst [vmem:[#allocation18_spill] sm:$0xff] %v10622_v24 }
 0x231   :  { %v7638_v11 = vpop.eup %7637  ;;  %v6306_v18 = vpack.c.bf16 %v3994_v2, %v3994_v2  ;;  %v3229_v53 = vadd.f32 1.0, %v7636_v45  ;;  %7659 = vpow2.f32 %v5804_v12  ;;  %11782 = vst [vmem:[#allocation17_spill] sm:$0xff] %v10620_v26  ;;  %v10628_v10 = vpop.f32.mrb[117].mxu0  ;;  %v11785_v2 = vld [vmem:[#allocation45_spill] sm:$0xff] }
 0x232   :  { %v7640_v47 = vpop.eup %7639  ;;  %5405 = vst.msk [vmem:[%s11613_s3 + $0x338] sm:$0xf] %vm5198_vm3, %v6436_v14  ;;  %v6434_v19 = vpack.c.bf16 %v4122_v15, %v4122_v15  ;;  %v3357_v7 = vadd.f32 1.0, %v7638_v11  ;;  %11784 = vst [vmem:[#allocation19_spill] sm:$0xff] %v10628_v10  ;;  %v10636_v45 = vadd.f32 %v10320_v44, %v11785_v2  ;;  %v10682_v26 = vpop.f32.mrb[118].mxu0 }
 0x233   :  { %v7642_v60 = vpop.eup %7641  ;;  %5275 = vst.msk [vmem:[%s11613_s3 + $0x130] sm:$0xf] %vm5198_vm3, %v6306_v18  ;;  %7661 = vrcp.f32 %v3229_v53  ;;  %v3227_v35 = vadd.f32 1.0, %v7640_v47  ;;  %v11786_v53 = vld [vmem:[#allocation2_spill] sm:$0xff]  ;;  %11789 = vst [vmem:[#allocation21_spill] sm:$0xff] %v10682_v26  ;;  %v10696_v26 = vpop.f32.mrb[119].mxu0 }
 0x234   :  { %v7644_v8 = vpop.eup %7643  ;;  %5403 = vst.msk [vmem:[%s11613_s3 + $0x330] sm:$0xf] %vm5198_vm3, %v6434_v19  ;;  %7663 = vrcp.f32 %v3357_v7  ;;  %v3355_v25 = vadd.f32 1.0, %v7642_v60  ;;  %v10640_v47 = vadd.f32 %v10320_v44, %v11786_v53  ;;  %v11787_v19 = vld [vmem:[#allocation3_spill] sm:$0xff] }
 0x235   :  { %v7646_v61 = vpop.eup %7645  ;;  %7665 = vrcp.f32 %v3227_v35  ;;  %v3232_v12 = vadd.f32 1.0, %v7644_v8  ;;  %v10644_v7 = vadd.f32 %v10320_v44, %v11787_v19  ;;  %v10648_v8 = vadd.f32 %v10320_v44, %v9901_v32 }
 0x236   :  { %v7648_v6 = vpop.eup %7647  ;;  %7667 = vrcp.f32 %v3355_v25  ;;  %v3360_v23 = vadd.f32 1.0, %v7646_v61  ;;  %v10652_v25 = vadd.f32 %v10320_v44, %v9903_v59  ;;  %v10661_v32 = vadd.f32 %v10320_v44, %v9921_v51  ;;  %v10671_v51 = vpop.f32.mrb[117].mxu1 }
 0x237   :  { %v7650_v14 = vpop.eup %7649  ;;  %7669 = vrcp.f32 %v3232_v12  ;;  %v3230_v15 = vadd.f32 1.0, %v7648_v6  ;;  %v5932_v6 = vmul.f32 -1.442695, %v10636_v45  ;;  %v10665_v59 = vadd.f32 %v10320_v44, %v9965_v55  ;;  %11788 = vst [vmem:[#allocation20_spill] sm:$0xff] %v10671_v51  ;;  %v10684_v51 = vpop.f32.mrb[118].mxu1 }
 0x238   :  { %v7652_v11 = vpop.eup %7651  ;;  %7671 = vrcp.f32 %v3360_v23  ;;  %v3358_v18 = vadd.f32 1.0, %v7650_v14  ;;  %v10657_v23 = vadd.f32 %v10320_v44, %v9919_v1  ;;  %v5930_v53 = vmul.f32 -1.442695, %v10644_v7  ;;  %11790 = vst [vmem:[#allocation22_spill] sm:$0xff] %v10684_v51  ;;  %v10698_v51 = vpop.f32.mrb[119].mxu1 }
 0x239   :  { %v7654_v60 = vpop.eup %7653  ;;  %7673 = vrcp.f32 %v3230_v15  ;;  %v3233_v35 = vadd.f32 1.0, %v7652_v11  ;;  %v5808_v24 = vmul.f32 -1.442695, %v10665_v59 }
 0x23a   :  { %v7656_v61 = vpop.eup %7655  ;;  %7675 = vrcp.f32 %v3358_v18  ;;  %v3361_v12 = vadd.f32 1.0, %v7654_v60  ;;  %v5802_v18 = vmul.f32 -1.442695, %v10640_v47  ;;  %v5805_v60 = vmul.f32 -1.442695, %v10648_v8 }
 0x23b   :  { %v7658_v2 = vpop.eup %7657  ;;  %7677 = vrcp.f32 %v3233_v35  ;;  %v3231_v14 = vadd.f32 1.0, %v7656_v61  ;;  %v5933_v35 = vmul.f32 -1.442695, %v10652_v25 }
 0x23c   :  { %v7660_v15 = vpop.eup %7659  ;;  %7679 = vrcp.f32 %v3361_v12  ;;  %v3359_v11 = vadd.f32 1.0, %v7658_v2  ;;  %v5803_v12 = vmul.f32 -1.442695, %v10657_v23  ;;  %v10677_v2 = vadd.f32 %v10320_v44, %v9967_v63 }
 0x23d   :  { %v7662_v1 = vpop.eup %7661  ;;  %7681 = vrcp.f32 %v3231_v14  ;;  %v3236_v19 = vadd.f32 1.0, %v7660_v15  ;;  %v5931_v15 = vmul.f32 -1.442695, %v10661_v32  ;;  %v10689_v63 = vadd.f32 %v10320_v44, %v9974_v28 }
 0x23e   :  { %v7664_v61 = vpop.eup %7663  ;;  %v3997_v55 = vmul.f32 %v7662_v1, %v10480_v36  ;;  %7683 = vrcp.f32 %v3359_v11 }
 0x23f   :  { %v7666_v10 = vpop.eup %7665  ;;  %v4125_v14 = vmul.f32 %v7664_v61, %v10484_v13  ;;  %7685 = vrcp.f32 %v3236_v19  ;;  %v11791_v61 = vld [vmem:[#allocation25_spill] sm:$0xff] }
 0x240   :  { %v7668_v36 = vpop.eup %7667  ;;  %v6309_v11 = vpack.c.bf16 %v3997_v55, %v3997_v55  ;;  %v3995_v1 = vmul.f32 %v7666_v10, %v10488_v27  ;;  %7687 = vpow2.f32 %v5932_v6  ;;  %v10694_v48 = vadd.f32 %v10320_v44, %v11791_v61 }
 0x241   :  { %v7670_v33 = vpop.eup %7669  ;;  %v6437_v13 = vpack.c.bf16 %v4125_v14, %v4125_v14  ;;  %v4123_v19 = vmul.f32 %v7668_v36, %v10493_v37  ;;  %7689 = vpow2.f32 %v5802_v18  ;;  %v5936_v37 = vmul.f32 -1.442695, %v10677_v2  ;;  %v11792_v14 = vld [vmem:[#allocation26_spill] sm:$0xff] }
 0x242   :  { %v7672_v55 = vpop.eup %7671  ;;  %5278 = vst.msk [vmem:[%s11613_s3 + $0x13c] sm:$0xf] %vm5198_vm3, %v6309_v11  ;;  %v6307_v28 = vpack.c.bf16 %v3995_v1, %v3995_v1  ;;  %v4000_v27 = vmul.f32 %v7670_v33, %v10497_v52  ;;  %7691 = vpow2.f32 %v5930_v53  ;;  %v10713_v36 = vadd.f32 %v10320_v44, %v11792_v14  ;;  %v11793_v53 = vld [vmem:[#allocation27_spill] sm:$0xff] }
 0x243   :  { %v7674_v10 = vpop.eup %7673  ;;  %5406 = vst.msk [vmem:[%s11613_s3 + $0x33c] sm:$0xf] %vm5198_vm3, %v6437_v13  ;;  %v6435_v6 = vpack.c.bf16 %v4123_v19, %v4123_v19  ;;  %v4128_v18 = vmul.f32 %v7672_v55, %v10501_v43  ;;  %7693 = vpow2.f32 %v5805_v60  ;;  %v10722_v1 = vadd.f32 %v10320_v44, %v11793_v53 }
 0x244   :  { %v7676_v11 = vpop.eup %7675  ;;  %5276 = vst.msk [vmem:[%s11613_s3 + $0x134] sm:$0xf] %vm5198_vm3, %v6307_v28  ;;  %v6312_v52 = vpack.c.bf16 %v4000_v27, %v4000_v27  ;;  %v3998_v33 = vmul.f32 %v7674_v10, %v10505_v22  ;;  %7695 = vpow2.f32 %v5933_v35  ;;  %v5806_v19 = vmul.f32 -1.442695, %v10689_v63  ;;  %v10742_v10 = vpop.f32.mrb[120].mxu0 }
 0x245   :  { %v7678_v43 = vpop.eup %7677  ;;  %5404 = vst.msk [vmem:[%s11613_s3 + $0x334] sm:$0xf] %vm5198_vm3, %v6435_v6  ;;  %v6440_v60 = vpack.c.bf16 %v4128_v18, %v4128_v18  ;;  %v4126_v13 = vmul.f32 %v7676_v11, %v10509_v16  ;;  %7697 = vpow2.f32 %v5803_v12  ;;  %v5934_v55 = vmul.f32 -1.442695, %v10694_v48  ;;  %v10744_v6 = vpop.f32.mrb[120].mxu1 }
 0x246   :  { %v7680_v61 = vpop.eup %7679  ;;  %5281 = vst.msk [vmem:[%s11613_s3 + $0x148] sm:$0xf] %vm5198_vm3, %v6312_v52  ;;  %v6310_v22 = vpack.c.bf16 %v3998_v33, %v3998_v33  ;;  %v4001_v35 = vmul.f32 %v7678_v43, %v10516_v5  ;;  %7699 = vpow2.f32 %v5931_v15  ;;  %v5809_v27 = vmul.f32 -1.442695, %v10713_v36  ;;  %11794 = vst [vmem:[#allocation23_spill] sm:$0xff] %v10744_v6 }
 0x247   :  { %v7682_v28 = vpop.eup %7681  ;;  %5409 = vst.msk [vmem:[%s11613_s3 + $0x348] sm:$0xf] %vm5198_vm3, %v6440_v60  ;;  %v6438_v16 = vpack.c.bf16 %v4126_v13, %v4126_v13  ;;  %v4129_v12 = vmul.f32 %v7680_v61, %v10531_v4  ;;  %7701 = vpow2.f32 %v5808_v24  ;;  %v5937_v14 = vmul.f32 -1.442695, %v10722_v1  ;;  %v10752_v4 = vpop.f32.mrb[121].mxu0 }
 0x248   :  { %v7684_v5 = vpop.eup %7683  ;;  %5279 = vst.msk [vmem:[%s11613_s3 + $0x140] sm:$0xf] %vm5198_vm3, %v6310_v22  ;;  %v6313_v15 = vpack.c.bf16 %v4001_v35, %v4001_v35  ;;  %v3999_v18 = vmul.f32 %v7682_v28, %v10542_v30  ;;  %7703 = vpow2.f32 %v5936_v37  ;;  %11795 = vst [vmem:[#allocation24_spill] sm:$0xff] %v10752_v4  ;;  %v10754_v24 = vpop.f32.mrb[121].mxu1 }
 0x249   :  { %11796 = vst [vmem:[#allocation45_spill] sm:$0xff] %v10754_v24  ;;  %v7686_v11 = vpop.eup %7685  ;;  %5407 = vst.msk [vmem:[%s11613_s3 + $0x340] sm:$0xf] %vm5198_vm3, %v6438_v16  ;;  %v6441_v52 = vpack.c.bf16 %v4129_v12, %v4129_v12  ;;  %v4127_v33 = vmul.f32 %v7684_v5, %v10551_v50  ;;  %7705 = vpow2.f32 %v5806_v19  ;;  %v10761_v53 = vpop.f32.mrb[122].mxu0 }
 0x24a   :  { %11797 = vst [vmem:[#allocation2_spill] sm:$0xff] %v10761_v53  ;;  %v10763_v30 = vpop.f32.mrb[122].mxu1  ;;  %v7688_v37 = vpop.eup %7687  ;;  %5282 = vst.msk [vmem:[%s11613_s3 + $0x14c] sm:$0xf] %vm5198_vm3, %v6313_v15  ;;  %v6311_v43 = vpack.c.bf16 %v3999_v18, %v3999_v18  ;;  %v4004_v60 = vmul.f32 %v7686_v11, %v10560_v31  ;;  %7707 = vpow2.f32 %v5934_v55  ;;  %v11801_v18 = vld [vmem:[#allocation28_spill] sm:$0xff] }
 0x24b   :  { %11798 = vst [vmem:[#allocation3_spill] sm:$0xff] %v10763_v30  ;;  %v10770_v13 = vpop.f32.mrb[123].mxu0  ;;  %v10772_v61 = vpop.f32.mrb[123].mxu1  ;;  %5410 = vst.msk [vmem:[%s11613_s3 + $0x34c] sm:$0xf] %vm5198_vm3, %v6441_v52  ;;  %v6439_v19 = vpack.c.bf16 %v4127_v33, %v4127_v33  ;;  %v3364_v22 = vadd.f32 1.0, %v7688_v37  ;;  %7709 = vpow2.f32 %v5809_v27 }
 0x24c   :  { %11799 = vst [vmem:[#allocation25_spill] sm:$0xff] %v10770_v13  ;;  %11800 = vst [vmem:[#allocation26_spill] sm:$0xff] %v10772_v61  ;;  %v7690_v50 = vpop.eup %7689  ;;  %v6316_v31 = vpack.c.bf16 %v4004_v60, %v4004_v60  ;;  %7711 = vpow2.f32 %v5937_v14  ;;  %v10792_v14 = vadd.f32 %v10320_v44, %v11801_v18 }
 0x24d   :  { %v7692_v35 = vpop.eup %7691  ;;  %5280 = vst.msk [vmem:[%s11613_s3 + $0x144] sm:$0xf] %vm5198_vm3, %v6311_v43  ;;  %v3234_v55 = vadd.f32 1.0, %v7690_v50  ;;  %5408 = vst.msk [vmem:[%s11613_s3 + $0x344] sm:$0xf] %vm5198_vm3, %v6439_v19  ;;  %7713 = vrcp.f32 %v3364_v22  ;;  %v11802_v43 = vld [vmem:[#allocation29_spill] sm:$0xff]  ;;  %v10800_v22 = vadd.f32 %v10320_v44, %v10078_v41 }
 0x24e   :  { %v7694_v28 = vpop.eup %7693  ;;  %v3362_v16 = vadd.f32 1.0, %v7692_v35  ;;  %5285 = vst.msk [vmem:[%s11613_s3 + $0x158] sm:$0xf] %vm5198_vm3, %v6316_v31  ;;  %v10796_v60 = vadd.f32 %v10320_v44, %v11802_v43 }
 0x24f   :  { %v7696_v12 = vpop.eup %7695  ;;  %7715 = vrcp.f32 %v3234_v55  ;;  %v3237_v27 = vadd.f32 1.0, %v7694_v28  ;;  %v5807_v55 = vmul.f32 -1.442695, %v10792_v14  ;;  %v10805_v28 = vadd.f32 %v10320_v44, %v10080_v20 }
 0x250   :  { %v7698_v5 = vpop.eup %7697  ;;  %7717 = vrcp.f32 %v3362_v16  ;;  %v3365_v15 = vadd.f32 1.0, %v7696_v12 }
 0x251   :  { %v7700_v11 = vpop.eup %7699  ;;  %7719 = vrcp.f32 %v3237_v27  ;;  %v3235_v52 = vadd.f32 1.0, %v7698_v5  ;;  %v11803_v27 = vld [vmem:[#allocation30_spill] sm:$0xff] }
 0x252   :  { %v7702_v33 = vpop.eup %7701  ;;  %7721 = vrcp.f32 %v3365_v15  ;;  %v3363_v37 = vadd.f32 1.0, %v7700_v11  ;;  %v10809_v5 = vadd.f32 %v10320_v44, %v11803_v27  ;;  %v11804_v15 = vld [vmem:[#allocation31_spill] sm:$0xff] }
 0x253   :  { %v7704_v50 = vpop.eup %7703  ;;  %7723 = vrcp.f32 %v3235_v52  ;;  %v3240_v19 = vadd.f32 1.0, %v7702_v33  ;;  %v10813_v41 = vadd.f32 %v10320_v44, %v11804_v15  ;;  %v5935_v52 = vmul.f32 -1.442695, %v10796_v60  ;;  %v11805_v33 = vld [vmem:[#allocation32_spill] sm:$0xff] }
 0x254   :  { %v7706_v35 = vpop.eup %7705  ;;  %7725 = vrcp.f32 %v3363_v37  ;;  %v3368_v31 = vadd.f32 1.0, %v7704_v50  ;;  %v10818_v20 = vadd.f32 %v10320_v44, %v11805_v33  ;;  %v5812_v50 = vmul.f32 -1.442695, %v10800_v22 }
 0x255   :  { %v7708_v16 = vpop.eup %7707  ;;  %7727 = vrcp.f32 %v3240_v19  ;;  %v3238_v12 = vadd.f32 1.0, %v7706_v35  ;;  %v11806_v19 = vld [vmem:[#allocation33_spill] sm:$0xff] }
 0x256   :  { %v7710_v18 = vpop.eup %7709  ;;  %7729 = vrcp.f32 %v3368_v31  ;;  %v3366_v11 = vadd.f32 1.0, %v7708_v16  ;;  %v10823_v35 = vadd.f32 %v10320_v44, %v11806_v19  ;;  %v5940_v31 = vmul.f32 -1.442695, %v10805_v28  ;;  %v11807_v16 = vld [vmem:[#allocation34_spill] sm:$0xff] }
 0x257   :  { %v7712_v37 = vpop.eup %7711  ;;  %7731 = vrcp.f32 %v3238_v12  ;;  %v3241_v43 = vadd.f32 1.0, %v7710_v18  ;;  %v10828_v61 = vadd.f32 %v10320_v44, %v11807_v16  ;;  %v5810_v12 = vmul.f32 -1.442695, %v10809_v5 }
 0x258   :  { %v7714_v27 = vpop.eup %7713  ;;  %7733 = vrcp.f32 %v3366_v11  ;;  %v3369_v15 = vadd.f32 1.0, %v7712_v37  ;;  %v5938_v18 = vmul.f32 -1.442695, %v10813_v41  ;;  %v5813_v11 = vmul.f32 -1.442695, %v10818_v20  ;;  %v11808_v37 = vld [vmem:[#allocation35_spill] sm:$0xff] }
 0x259   :  { %v7716_v33 = vpop.eup %7715  ;;  %v4132_v13 = vmul.f32 %v7714_v27, %v10636_v45  ;;  %7735 = vrcp.f32 %v3241_v43  ;;  %v10837_v53 = vadd.f32 %v10320_v44, %v11808_v37  ;;  %v5941_v45 = vmul.f32 -1.442695, %v10823_v35 }
 0x25a   :  { %v7718_v30 = vpop.eup %7717  ;;  %v4002_v19 = vmul.f32 %v7716_v33, %v10640_v47  ;;  %7737 = vrcp.f32 %v3369_v15  ;;  %v5811_v47 = vmul.f32 -1.442695, %v10828_v61 }
 0x25b   :  { %v7720_v16 = vpop.eup %7719  ;;  %v6444_v24 = vpack.c.bf16 %v4132_v13, %v4132_v13  ;;  %v4130_v4 = vmul.f32 %v7718_v30, %v10644_v7  ;;  %7739 = vpow2.f32 %v5807_v55  ;;  %v11809_v7 = vld [vmem:[#allocation36_spill] sm:$0xff]  ;;  %v10852_v55 = vpop.f32.mrb[124].mxu0 }
 0x25c   :  { %v7722_v43 = vpop.eup %7721  ;;  %v6314_v27 = vpack.c.bf16 %v4002_v19, %v4002_v19  ;;  %v4005_v6 = vmul.f32 %v7720_v16, %v10648_v8  ;;  %7741 = vpow2.f32 %v5935_v52  ;;  %v10850_v30 = vadd.f32 %v10320_v44, %v11809_v7  ;;  %v10854_v8 = vpop.f32.mrb[124].mxu1 }
 0x25d   :  { %v7724_v15 = vpop.eup %7723  ;;  %5413 = vst.msk [vmem:[%s11613_s3 + $0x358] sm:$0xf] %vm5198_vm3, %v6444_v24  ;;  %v6442_v33 = vpack.c.bf16 %v4130_v4, %v4130_v4  ;;  %v4133_v13 = vmul.f32 %v7722_v43, %v10652_v25  ;;  %7743 = vpow2.f32 %v5812_v50  ;;  %v11810_v25 = vld [vmem:[#allocation37_spill] sm:$0xff]  ;;  %v10865_v50 = vpop.f32.mrb[125].mxu0 }
 0x25e   :  { %v7726_v52 = vpop.eup %7725  ;;  %5283 = vst.msk [vmem:[%s11613_s3 + $0x150] sm:$0xf] %vm5198_vm3, %v6314_v27  ;;  %v6317_v19 = vpack.c.bf16 %v4005_v6, %v4005_v6  ;;  %v4003_v4 = vmul.f32 %v7724_v15, %v10657_v23  ;;  %7745 = vpow2.f32 %v5940_v31  ;;  %v10863_v24 = vadd.f32 %v10320_v44, %v11810_v25  ;;  %v10867_v37 = vpop.f32.mrb[125].mxu1  ;;  %v11811_v23 = vld [vmem:[#allocation38_spill] sm:$0xff] }
 0x25f   :  { %v7728_v16 = vpop.eup %7727  ;;  %5411 = vst.msk [vmem:[%s11613_s3 + $0x350] sm:$0xf] %vm5198_vm3, %v6442_v33  ;;  %v6445_v43 = vpack.c.bf16 %v4133_v13, %v4133_v13  ;;  %v4131_v6 = vmul.f32 %v7726_v52, %v10661_v32  ;;  %7747 = vpow2.f32 %v5810_v12  ;;  %v10876_v31 = vadd.f32 %v10320_v44, %v11811_v23  ;;  %v10878_v27 = vpop.f32.mrb[126].mxu0 }
 0x260   :  { %v10880_v15 = vpop.f32.mrb[126].mxu1  ;;  %v7730_v7 = vpop.eup %7729  ;;  %5286 = vst.msk [vmem:[%s11613_s3 + $0x15c] sm:$0xf] %vm5198_vm3, %v6317_v19  ;;  %v6315_v25 = vpack.c.bf16 %v4003_v4, %v4003_v4  ;;  %v4008_v33 = vmul.f32 %v7728_v16, %v10665_v59  ;;  %7749 = vpow2.f32 %v5938_v18  ;;  %v5939_v32 = vmul.f32 -1.442695, %v10837_v53 }
 0x261   :  { %v10888_v12 = vpop.f32.mrb[127].mxu0  ;;  %v10890_v44 = vpop.f32.mrb[127].mxu1  ;;  %5414 = vst.msk [vmem:[%s11613_s3 + $0x35c] sm:$0xf] %vm5198_vm3, %v6445_v43  ;;  %v6443_v52 = vpack.c.bf16 %v4131_v6, %v4131_v6  ;;  %v4136_v23 = vmul.f32 %v7730_v7, %v10677_v2  ;;  %7751 = vpow2.f32 %v5813_v11  ;;  %v5816_v19 = vmul.f32 -1.442695, %v10850_v30 }
 0x262   :  { %11812 = vst [vmem:[#allocation27_spill] sm:$0xff] %v10890_v44  ;;  %v7732_v13 = vpop.eup %7731  ;;  %5284 = vst.msk [vmem:[%s11613_s3 + $0x154] sm:$0xf] %vm5198_vm3, %v6315_v25  ;;  %v6320_v18 = vpack.c.bf16 %v4008_v33, %v4008_v33  ;;  %7753 = vpow2.f32 %v5941_v45  ;;  %v5944_v16 = vmul.f32 -1.442695, %v10863_v24 }
 0x263   :  { %v7734_v59 = vpop.eup %7733  ;;  %v4006_v4 = vmul.f32 %v7732_v13, %v10689_v63  ;;  %5412 = vst.msk [vmem:[%s11613_s3 + $0x354] sm:$0xf] %vm5198_vm3, %v6443_v52  ;;  %v6448_v2 = vpack.c.bf16 %v4136_v23, %v4136_v23  ;;  %7755 = vpow2.f32 %v5811_v47  ;;  %v5814_v43 = vmul.f32 -1.442695, %v10876_v31 }
 0x264   :  { %v7736_v44 = vpop.eup %7735  ;;  %v4134_v11 = vmul.f32 %v7734_v59, %v10694_v48  ;;  %5289 = vst.msk [vmem:[%s11613_s3 + $0x168] sm:$0xf] %vm5198_vm3, %v6320_v18  ;;  %7757 = vpow2.f32 %v5939_v32 }
 0x265   :  { %v7738_v6 = vpop.eup %7737  ;;  %v6318_v63 = vpack.c.bf16 %v4006_v4, %v4006_v4  ;;  %v4009_v45 = vmul.f32 %v7736_v44, %v10713_v36  ;;  %5417 = vst.msk [vmem:[%s11613_s3 + $0x368] sm:$0xf] %vm5198_vm3, %v6448_v2  ;;  %7759 = vpow2.f32 %v5816_v19  ;;  %v10939_v4 = vld [vmem:[%s11612_s2] ss:$0 sm:$0xff] }
 0x266   :  { %v7740_v7 = vpop.eup %7739  ;;  %v6446_v48 = vpack.c.bf16 %v4134_v11, %v4134_v11  ;;  %v4137_v47 = vmul.f32 %v7738_v6, %v10722_v1  ;;  %7761 = vpow2.f32 %v5944_v16  ;;  %v11813_v16 = vld [vmem:[#allocation39_spill] sm:$0xff] }
 0x267   :  { %v7742_v25 = vpop.eup %7741  ;;  %5287 = vst.msk [vmem:[%s11613_s3 + $0x160] sm:$0xf] %vm5198_vm3, %v6318_v63  ;;  %v6321_v33 = vpack.c.bf16 %v4009_v45, %v4009_v45  ;;  %v3239_v13 = vadd.f32 1.0, %v7740_v7  ;;  %7763 = vpow2.f32 %v5814_v43  ;;  %v10943_v2 = vadd.f32 %v10939_v4, %v11813_v16 }
 0x268   :  { %v7744_v36 = vpop.eup %7743  ;;  %5415 = vst.msk [vmem:[%s11613_s3 + $0x360] sm:$0xf] %vm5198_vm3, %v6446_v48  ;;  %v6449_v32 = vpack.c.bf16 %v4137_v47, %v4137_v47  ;;  %v3367_v44 = vadd.f32 1.0, %v7742_v25  ;;  %v11814_v48 = vld [vmem:[#allocation40_spill] sm:$0xff]  ;;  %v11815_v25 = vld [vmem:[#allocation41_spill] sm:$0xff]  ;;  %v10968_v16 = vadd.f32 %v10939_v4, %v10263_v57  ;;  %v10979_v57 = vadd.f32 %v10939_v4, %v10273_v38 }
 0x269   :  { %v7746_v1 = vpop.eup %7745  ;;  %5290 = vst.msk [vmem:[%s11613_s3 + $0x16c] sm:$0xf] %vm5198_vm3, %v6321_v33  ;;  %7765 = vrcp.f32 %v3239_v13  ;;  %v3244_v52 = vadd.f32 1.0, %v7744_v36  ;;  %v10947_v47 = vadd.f32 %v10939_v4, %v11814_v48  ;;  %v10951_v33 = vadd.f32 %v10939_v4, %v11815_v25 }
 0x26a   :  { %v7748_v23 = vpop.eup %7747  ;;  %5418 = vst.msk [vmem:[%s11613_s3 + $0x36c] sm:$0xf] %vm5198_vm3, %v6449_v32  ;;  %7767 = vrcp.f32 %v3367_v44  ;;  %v3372_v19 = vadd.f32 1.0, %v7746_v1  ;;  %v5942_v32 = vmul.f32 -1.442695, %v10943_v2  ;;  %v10956_v44 = vadd.f32 %v10939_v4, %v10216_v54 }
 0x26b   :  { %v7750_v59 = vpop.eup %7749  ;;  %7769 = vrcp.f32 %v3244_v52  ;;  %v3242_v18 = vadd.f32 1.0, %v7748_v23  ;;  %v10960_v23 = vadd.f32 %v10939_v4, %v10218_v3  ;;  %v10972_v54 = vadd.f32 %v10939_v4, %v10271_v34 }
 0x26c   :  { %v7752_v11 = vpop.eup %7751  ;;  %7771 = vrcp.f32 %v3372_v19  ;;  %v3370_v43 = vadd.f32 1.0, %v7750_v59  ;;  %v10964_v19 = vadd.f32 %v10939_v4, %v10261_v62  ;;  %v5817_v3 = vmul.f32 -1.442695, %v10947_v47 }
 0x26d   :  { %v7754_v6 = vpop.eup %7753  ;;  %7773 = vrcp.f32 %v3242_v18  ;;  %v3245_v63 = vadd.f32 1.0, %v7752_v11  ;;  %v5943_v48 = vmul.f32 -1.442695, %v10960_v23 }
 0x26e   :  { %v7756_v45 = vpop.eup %7755  ;;  %7775 = vrcp.f32 %v3370_v43  ;;  %v3373_v7 = vadd.f32 1.0, %v7754_v6  ;;  %v5945_v6 = vmul.f32 -1.442695, %v10951_v33  ;;  %v5820_v25 = vmul.f32 -1.442695, %v10964_v19 }
 0x26f   :  { %v7758_v13 = vpop.eup %7757  ;;  %7777 = vrcp.f32 %v3245_v63  ;;  %v3243_v36 = vadd.f32 1.0, %v7756_v45  ;;  %v5815_v45 = vmul.f32 -1.442695, %v10956_v44 }
 0x270   :  { %v7760_v1 = vpop.eup %7759  ;;  %7779 = vrcp.f32 %v3373_v7  ;;  %v3371_v52 = vadd.f32 1.0, %v7758_v13 }
 0x271   :  { %v7762_v59 = vpop.eup %7761  ;;  %7781 = vrcp.f32 %v3243_v36  ;;  %v3248_v18 = vadd.f32 1.0, %v7760_v1  ;;  %v5948_v1 = vmul.f32 -1.442695, %v10968_v16 }
 0x272   :  { %v7764_v11 = vpop.eup %7763  ;;  %7783 = vrcp.f32 %v3371_v52  ;;  %v3376_v43 = vadd.f32 1.0, %v7762_v59  ;;  %v5818_v52 = vmul.f32 -1.442695, %v10972_v54 }
 0x273   :  { %v7766_v62 = vpop.eup %7765  ;;  %7785 = vrcp.f32 %v3248_v18  ;;  %v3246_v63 = vadd.f32 1.0, %v7764_v11 }
 0x274   :  { %v7768_v7 = vpop.eup %7767  ;;  %v4007_v34 = vmul.f32 %v7766_v62, %v10792_v14  ;;  %7787 = vrcp.f32 %v3376_v43  ;;  %v10990_v14 = vadd.f32 %v10939_v4, %v10281_v29  ;;  %v11001_v29 = vadd.f32 %v10939_v4, %v10283_v0 }
 0x275   :  { %v7770_v13 = vpop.eup %7769  ;;  %v4135_v36 = vmul.f32 %v7768_v7, %v10796_v60  ;;  %7789 = vrcp.f32 %v3246_v63  ;;  %v5946_v60 = vmul.f32 -1.442695, %v10979_v57 }
 0x276   :  { %v7772_v59 = vpop.eup %7771  ;;  %v6319_v18 = vpack.c.bf16 %v4007_v34, %v4007_v34  ;;  %v4012_v38 = vmul.f32 %v7770_v13, %v10800_v22  ;;  %7791 = vpow2.f32 %v5942_v32  ;;  %v11010_v34 = vadd.f32 %v10939_v4, %v10290_v21  ;;  %v11816_v13 = vld [vmem:[#allocation4_spill] sm:$0xff] }
 0x277   :  { %v7774_v11 = vpop.eup %7773  ;;  %v6447_v43 = vpack.c.bf16 %v4135_v36, %v4135_v36  ;;  %v4140_v62 = vmul.f32 %v7772_v59, %v10805_v28  ;;  %7793 = vpow2.f32 %v5817_v3  ;;  %v11019_v36 = vadd.f32 %v10939_v4, %v11816_v13 }
 0x278   :  { %v7776_v63 = vpop.eup %7775  ;;  %5288 = vst.msk [vmem:[%s11613_s3 + $0x164] sm:$0xf] %vm5198_vm3, %v6319_v18  ;;  %v6324_v7 = vpack.c.bf16 %v4012_v38, %v4012_v38  ;;  %v4010_v22 = vmul.f32 %v7774_v11, %v10809_v5  ;;  %7795 = vpow2.f32 %v5945_v6  ;;  %v5821_v59 = vmul.f32 -1.442695, %v10990_v14 }
 0x279   :  { %v7778_v32 = vpop.eup %7777  ;;  %5416 = vst.msk [vmem:[%s11613_s3 + $0x364] sm:$0xf] %vm5198_vm3, %v6447_v43  ;;  %v6452_v28 = vpack.c.bf16 %v4140_v62, %v4140_v62  ;;  %v4138_v3 = vmul.f32 %v7776_v63, %v10813_v41  ;;  %7797 = vpow2.f32 %v5815_v45  ;;  %v5949_v38 = vmul.f32 -1.442695, %v11001_v29 }
 0x27a   :  { %v7780_v5 = vpop.eup %7779  ;;  %5293 = vst.msk [vmem:[%s11613_s3 + $0x178] sm:$0xf] %vm5198_vm3, %v6324_v7  ;;  %v6322_v0 = vpack.c.bf16 %v4010_v22, %v4010_v22  ;;  %v4013_v6 = vmul.f32 %v7778_v32, %v10818_v20  ;;  %7799 = vpow2.f32 %v5943_v48  ;;  %v5819_v43 = vmul.f32 -1.442695, %v11010_v34 }
 0x27b   :  { %v7782_v41 = vpop.eup %7781  ;;  %5421 = vst.msk [vmem:[%s11613_s3 + $0x378] sm:$0xf] %vm5198_vm3, %v6452_v28  ;;  %v6450_v21 = vpack.c.bf16 %v4138_v3, %v4138_v3  ;;  %v4141_v45 = vmul.f32 %v7780_v5, %v10823_v35  ;;  %7801 = vpow2.f32 %v5820_v25  ;;  %v5947_v63 = vmul.f32 -1.442695, %v11019_v36 }
 0x27c   :  { %v7784_v18 = vpop.eup %7783  ;;  %5291 = vst.msk [vmem:[%s11613_s3 + $0x170] sm:$0xf] %vm5198_vm3, %v6322_v0  ;;  %v6325_v20 = vpack.c.bf16 %v4013_v6, %v4013_v6  ;;  %v4011_v48 = vmul.f32 %v7782_v41, %v10828_v61  ;;  %7803 = vpow2.f32 %v5948_v1 }
 0x27d   :  { %v7786_v11 = vpop.eup %7785  ;;  %5419 = vst.msk [vmem:[%s11613_s3 + $0x370] sm:$0xf] %vm5198_vm3, %v6450_v21  ;;  %v6453_v35 = vpack.c.bf16 %v4141_v45, %v4141_v45  ;;  %v4139_v25 = vmul.f32 %v7784_v18, %v10837_v53  ;;  %7805 = vpow2.f32 %v5818_v52 }
 0x27e   :  { %v7788_v62 = vpop.eup %7787  ;;  %5294 = vst.msk [vmem:[%s11613_s3 + $0x17c] sm:$0xf] %vm5198_vm3, %v6325_v20  ;;  %v6323_v61 = vpack.c.bf16 %v4011_v48, %v4011_v48  ;;  %v4016_v1 = vmul.f32 %v7786_v11, %v10850_v30  ;;  %7807 = vpow2.f32 %v5946_v60 }
 0x27f   :  { %v7790_v7 = vpop.eup %7789  ;;  %5422 = vst.msk [vmem:[%s11613_s3 + $0x37c] sm:$0xf] %vm5198_vm3, %v6453_v35  ;;  %v6451_v53 = vpack.c.bf16 %v4139_v25, %v4139_v25  ;;  %v4144_v52 = vmul.f32 %v7788_v62, %v10863_v24  ;;  %7809 = vpow2.f32 %v5821_v59 }
 0x280   :  { %v7792_v22 = vpop.eup %7791  ;;  %5292 = vst.msk [vmem:[%s11613_s3 + $0x174] sm:$0xf] %vm5198_vm3, %v6323_v61  ;;  %v6328_v30 = vpack.c.bf16 %v4016_v1, %v4016_v1  ;;  %v4014_v60 = vmul.f32 %v7790_v7, %v10876_v31  ;;  %7811 = vpow2.f32 %v5949_v38  ;;  %v11817_v38 = vld [vmem:[#allocation5_spill] sm:$0xff]  ;;  %v11819_v61 = vld [vmem:[#allocation7_spill] sm:$0xff] }
 0x281   :  { %v7794_v32 = vpop.eup %7793  ;;  %5420 = vst.msk [vmem:[%s11613_s3 + $0x374] sm:$0xf] %vm5198_vm3, %v6451_v53  ;;  %v6456_v28 = vpack.c.bf16 %v4144_v52, %v4144_v52  ;;  %v3374_v3 = vadd.f32 1.0, %v7792_v22  ;;  %7813 = vpow2.f32 %v5819_v43  ;;  %v11073_v11 = vadd.f32 %v10939_v4, %v11817_v38  ;;  %v11818_v43 = vld [vmem:[#allocation6_spill] sm:$0xff]  ;;  %v11820_v53 = vld [vmem:[#allocation8_spill] sm:$0xff] }
 0x282   :  { %v7796_v24 = vpop.eup %7795  ;;  %5297 = vst.msk [vmem:[%s11613_s3 + $0x188] sm:$0xf] %vm5198_vm3, %v6328_v30  ;;  %v6326_v5 = vpack.c.bf16 %v4014_v60, %v4014_v60  ;;  %v3249_v0 = vadd.f32 1.0, %v7794_v32  ;;  %7815 = vpow2.f32 %v5947_v63  ;;  %v11077_v62 = vadd.f32 %v10939_v4, %v11818_v43  ;;  %v11822_v43 = vld [vmem:[#allocation10_spill] sm:$0xff] }
 0x283   :  { %v7798_v31 = vpop.eup %7797  ;;  %5425 = vst.msk [vmem:[%s11613_s3 + $0x388] sm:$0xf] %vm5198_vm3, %v6456_v28  ;;  %7817 = vrcp.f32 %v3374_v3  ;;  %v3377_v6 = vadd.f32 1.0, %v7796_v24  ;;  %v11081_v1 = vadd.f32 %v10939_v4, %v11819_v61  ;;  %v11085_v52 = vadd.f32 %v10939_v4, %v11820_v53 }
 0x284   :  { %v7800_v13 = vpop.eup %7799  ;;  %5295 = vst.msk [vmem:[%s11613_s3 + $0x180] sm:$0xf] %vm5198_vm3, %v6326_v5  ;;  %7819 = vrcp.f32 %v3249_v0  ;;  %v3247_v41 = vadd.f32 1.0, %v7798_v31  ;;  %v11089_v22 = vadd.f32 %v10939_v4, %v10381_v42  ;;  %v11093_v32 = vadd.f32 %v10939_v4, %v10383_v58  ;;  %v11821_v0 = vld [vmem:[#allocation9_spill] sm:$0xff] }
 0x285   :  { %v7802_v21 = vpop.eup %7801  ;;  %7821 = vrcp.f32 %v3377_v6  ;;  %v3375_v45 = vadd.f32 1.0, %v7800_v13  ;;  %v11097_v28 = vadd.f32 %v10939_v4, %v10403_v46  ;;  %v5824_v5 = vmul.f32 -1.442695, %v11073_v11 }
 0x286   :  { %v7804_v59 = vpop.eup %7803  ;;  %7823 = vrcp.f32 %v3247_v41  ;;  %v3252_v18 = vadd.f32 1.0, %v7802_v21  ;;  %v11102_v42 = vadd.f32 %v10939_v4, %v11821_v0  ;;  %v5952_v13 = vmul.f32 -1.442695, %v11077_v62 }
 0x287   :  { %v7806_v20 = vpop.eup %7805  ;;  %7825 = vrcp.f32 %v3375_v45  ;;  %v3380_v48 = vadd.f32 1.0, %v7804_v59  ;;  %v5822_v58 = vmul.f32 -1.442695, %v11081_v1  ;;  %v5950_v21 = vmul.f32 -1.442695, %v11085_v52 }
 0x288   :  { %v7808_v35 = vpop.eup %7807  ;;  %7827 = vrcp.f32 %v3252_v18  ;;  %v3250_v25 = vadd.f32 1.0, %v7806_v20  ;;  %v5825_v45 = vmul.f32 -1.442695, %v11089_v22  ;;  %v5953_v20 = vmul.f32 -1.442695, %v11093_v32 }
 0x289   :  { %v7810_v63 = vpop.eup %7809  ;;  %7829 = vrcp.f32 %v3380_v48  ;;  %v3378_v7 = vadd.f32 1.0, %v7808_v35  ;;  %v5823_v48 = vmul.f32 -1.442695, %v11097_v28  ;;  %v11115_v61 = vadd.f32 %v10939_v4, %v11822_v43 }
 0x28a   :  { %v7812_v30 = vpop.eup %7811  ;;  %7831 = vrcp.f32 %v3250_v25  ;;  %v3253_v60 = vadd.f32 1.0, %v7810_v63  ;;  %v5951_v25 = vmul.f32 -1.442695, %v11102_v42 }
 0x28b   :  { %v7814_v3 = vpop.eup %7813  ;;  %7833 = vrcp.f32 %v3378_v7  ;;  %v3381_v24 = vadd.f32 1.0, %v7812_v30 }
 0x28c   :  { %v7816_v31 = vpop.eup %7815  ;;  %7835 = vrcp.f32 %v3253_v60  ;;  %v3251_v6 = vadd.f32 1.0, %v7814_v3 }
 0x28d   :  { %v7818_v41 = vpop.eup %7817  ;;  %7837 = vrcp.f32 %v3381_v24  ;;  %v3379_v46 = vadd.f32 1.0, %v7816_v31  ;;  %v11824_v24 = vld [vmem:[#allocation43_spill] sm:$0xff] }
 0x28e   :  { %v7820_v59 = vpop.eup %7819  ;;  %v4142_v18 = vmul.f32 %v7818_v41, %v10943_v2  ;;  %7839 = vrcp.f32 %v3251_v6  ;;  %v11823_v2 = vld [vmem:[#allocation42_spill] sm:$0xff]  ;;  %v11125_v0 = vadd.f32 %v10939_v4, %v11824_v24  ;;  %v11825_v6 = vld [vmem:[#allocation44_spill] sm:$0xff] }
 0x28f   :  { %v7822_v38 = vpop.eup %7821  ;;  %v4017_v35 = vmul.f32 %v7820_v59, %v10947_v47  ;;  %7841 = vrcp.f32 %v3379_v46  ;;  %v11120_v30 = vadd.f32 %v10939_v4, %v11823_v2  ;;  %v11134_v41 = vadd.f32 %v10939_v4, %v11825_v6 }
 0x290   :  { %v7824_v63 = vpop.eup %7823  ;;  %v6454_v7 = vpack.c.bf16 %v4142_v18, %v4142_v18  ;;  %v4145_v53 = vmul.f32 %v7822_v38, %v10951_v33  ;;  %7843 = vpow2.f32 %v5824_v5  ;;  %v5828_v59 = vmul.f32 -1.442695, %v11115_v61  ;;  %v11826_v38 = vld [vmem:[#allocation11_spill] sm:$0xff] }
 0x291   :  { %v7826_v60 = vpop.eup %7825  ;;  %v6329_v3 = vpack.c.bf16 %v4017_v35, %v4017_v35  ;;  %v4015_v47 = vmul.f32 %v7824_v63, %v10956_v44  ;;  %7845 = vpow2.f32 %v5952_v13  ;;  %v11149_v35 = vadd.f32 %v10939_v4, %v11826_v38 }
 0x292   :  { %v7828_v31 = vpop.eup %7827  ;;  %5423 = vst.msk [vmem:[%s11613_s3 + $0x380] sm:$0xf] %vm5198_vm3, %v6454_v7  ;;  %v6457_v33 = vpack.c.bf16 %v4145_v53, %v4145_v53  ;;  %v4143_v5 = vmul.f32 %v7826_v60, %v10960_v23  ;;  %7847 = vpow2.f32 %v5822_v58  ;;  %v5956_v63 = vmul.f32 -1.442695, %v11120_v30 }
 0x293   :  { %v7830_v44 = vpop.eup %7829  ;;  %5298 = vst.msk [vmem:[%s11613_s3 + $0x18c] sm:$0xf] %vm5198_vm3, %v6329_v3  ;;  %v6327_v13 = vpack.c.bf16 %v4015_v47, %v4015_v47  ;;  %v4020_v46 = vmul.f32 %v7828_v31, %v10964_v19  ;;  %7849 = vpow2.f32 %v5950_v21  ;;  %v5826_v53 = vmul.f32 -1.442695, %v11125_v0 }
 0x294   :  { %v7832_v18 = vpop.eup %7831  ;;  %5426 = vst.msk [vmem:[%s11613_s3 + $0x38c] sm:$0xf] %vm5198_vm3, %v6457_v33  ;;  %v6455_v23 = vpack.c.bf16 %v4143_v5, %v4143_v5  ;;  %v4148_v58 = vmul.f32 %v7830_v44, %v10968_v16  ;;  %7851 = vpow2.f32 %v5825_v45  ;;  %v5954_v60 = vmul.f32 -1.442695, %v11134_v41 }
 0x295   :  { %v7834_v43 = vpop.eup %7833  ;;  %5296 = vst.msk [vmem:[%s11613_s3 + $0x184] sm:$0xf] %vm5198_vm3, %v6327_v13  ;;  %v6332_v19 = vpack.c.bf16 %v4020_v46, %v4020_v46  ;;  %v4018_v21 = vmul.f32 %v7832_v18, %v10972_v54  ;;  %7853 = vpow2.f32 %v5953_v20  ;;  %v5829_v47 = vmul.f32 -1.442695, %v11149_v35 }
 0x296   :  { %v7836_v7 = vpop.eup %7835  ;;  %5424 = vst.msk [vmem:[%s11613_s3 + $0x384] sm:$0xf] %vm5198_vm3, %v6455_v23  ;;  %v6460_v16 = vpack.c.bf16 %v4148_v58, %v4148_v58  ;;  %v4146_v45 = vmul.f32 %v7834_v43, %v10979_v57  ;;  %7855 = vpow2.f32 %v5823_v48 }
 0x297   :  { %v7838_v2 = vpop.eup %7837  ;;  %5301 = vst.msk [vmem:[%s11613_s3 + $0x198] sm:$0xf] %vm5198_vm3, %v6332_v19  ;;  %v6330_v54 = vpack.c.bf16 %v4018_v21, %v4018_v21  ;;  %v4021_v20 = vmul.f32 %v7836_v7, %v10990_v14  ;;  %7857 = vpow2.f32 %v5951_v25  ;;  %v11827_v21 = vld [vmem:[#allocation12_spill] sm:$0xff] }
 0x298   :  { %v7840_v3 = vpop.eup %7839  ;;  %5429 = vst.msk [vmem:[%s11613_s3 + $0x398] sm:$0xf] %vm5198_vm3, %v6460_v16  ;;  %v6458_v57 = vpack.c.bf16 %v4146_v45, %v4146_v45  ;;  %v4149_v48 = vmul.f32 %v7838_v2, %v11001_v29  ;;  %7859 = vpow2.f32 %v5828_v59  ;;  %v11828_v45 = vld [vmem:[#allocation13_spill] sm:$0xff] }
 0x299   :  { %v7842_v24 = vpop.eup %7841  ;;  %5299 = vst.msk [vmem:[%s11613_s3 + $0x190] sm:$0xf] %vm5198_vm3, %v6330_v54  ;;  %v6333_v14 = vpack.c.bf16 %v4021_v20, %v4021_v20  ;;  %v4019_v25 = vmul.f32 %v7840_v3, %v11010_v34  ;;  %7861 = vpow2.f32 %v5956_v63  ;;  %v11203_v63 = vadd.f32 %v10939_v4, %v11827_v21  ;;  %v11829_v20 = vld [vmem:[#allocation14_spill] sm:$0xff] }
 0x29a   :  { %v7844_v31 = vpop.eup %7843  ;;  %5427 = vst.msk [vmem:[%s11613_s3 + $0x390] sm:$0xf] %vm5198_vm3, %v6458_v57  ;;  %v6461_v29 = vpack.c.bf16 %v4149_v48, %v4149_v48  ;;  %v4147_v33 = vmul.f32 %v7842_v24, %v11019_v36  ;;  %7863 = vpow2.f32 %v5826_v53  ;;  %v11207_v53 = vadd.f32 %v10939_v4, %v11828_v45 }
 0x29b   :  { %v7846_v5 = vpop.eup %7845  ;;  %5302 = vst.msk [vmem:[%s11613_s3 + $0x19c] sm:$0xf] %vm5198_vm3, %v6333_v14  ;;  %v6331_v6 = vpack.c.bf16 %v4019_v25, %v4019_v25  ;;  %v3256_v44 = vadd.f32 1.0, %v7844_v31  ;;  %7865 = vpow2.f32 %v5954_v60  ;;  %v11211_v60 = vadd.f32 %v10939_v4, %v11829_v20 }
 0x29c   :  { %v7848_v34 = vpop.eup %7847  ;;  %5430 = vst.msk [vmem:[%s11613_s3 + $0x39c] sm:$0xf] %vm5198_vm3, %v6461_v29  ;;  %v6459_v13 = vpack.c.bf16 %v4147_v33, %v4147_v33  ;;  %v3384_v46 = vadd.f32 1.0, %v7846_v5  ;;  %7867 = vpow2.f32 %v5829_v47  ;;  %v11215_v3 = vadd.f32 %v10939_v4, %v10562_v49 }
 0x29d   :  { %v7850_v36 = vpop.eup %7849  ;;  %5300 = vst.msk [vmem:[%s11613_s3 + $0x194] sm:$0xf] %vm5198_vm3, %v6331_v6  ;;  %7869 = vrcp.f32 %v3256_v44  ;;  %v3254_v59 = vadd.f32 1.0, %v7848_v34  ;;  %v11219_v47 = vadd.f32 %v10939_v4, %v10564_v56  ;;  %v5957_v25 = vmul.f32 -1.442695, %v11203_v63 }
 0x29e   :  { %v7852_v18 = vpop.eup %7851  ;;  %5428 = vst.msk [vmem:[%s11613_s3 + $0x394] sm:$0xf] %vm5198_vm3, %v6459_v13  ;;  %7871 = vrcp.f32 %v3384_v46  ;;  %v3382_v23 = vadd.f32 1.0, %v7850_v36  ;;  %v11224_v31 = vadd.f32 %v10939_v4, %v10572_v17  ;;  %v5827_v33 = vmul.f32 -1.442695, %v11207_v53 }
 0x29f   :  { %v7854_v58 = vpop.eup %7853  ;;  %7873 = vrcp.f32 %v3254_v59  ;;  %v3257_v38 = vadd.f32 1.0, %v7852_v18  ;;  %v11229_v5 = vadd.f32 %v10939_v4, %v10574_v40  ;;  %v5955_v44 = vmul.f32 -1.442695, %v11211_v60 }
 0x2a0   :  { %v7856_v43 = vpop.eup %7855  ;;  %7875 = vrcp.f32 %v3382_v23  ;;  %v3385_v19 = vadd.f32 1.0, %v7854_v58  ;;  %v5832_v34 = vmul.f32 -1.442695, %v11215_v3  ;;  %v5960_v46 = vmul.f32 -1.442695, %v11219_v47 }
 0x2a1   :  { %v7858_v7 = vpop.eup %7857  ;;  %7877 = vrcp.f32 %v3257_v38  ;;  %v3255_v16 = vadd.f32 1.0, %v7856_v43  ;;  %v11236_v36 = vadd.f32 %v10939_v4, %v10582_v9  ;;  %v5830_v18 = vmul.f32 -1.442695, %v11224_v31 }
 0x2a2   :  { %v7860_v2 = vpop.eup %7859  ;;  %7879 = vrcp.f32 %v3385_v19  ;;  %v3383_v54 = vadd.f32 1.0, %v7858_v7  ;;  %v11242_v23 = vadd.f32 %v10939_v4, %v10584_v39  ;;  %v5958_v43 = vmul.f32 -1.442695, %v11229_v5  ;;  %v11830_v19 = vld [vmem:[#allocation15_spill] sm:$0xff] }
 0x2a3   :  { %v7862_v57 = vpop.eup %7861  ;;  %7881 = vrcp.f32 %v3255_v16  ;;  %v3260_v48 = vadd.f32 1.0, %v7860_v2  ;;  %v11248_v9 = vadd.f32 %v10939_v4, %v11830_v19  ;;  %v11831_v16 = vld [vmem:[#allocation16_spill] sm:$0xff] }
 0x2a4   :  { %v7864_v24 = vpop.eup %7863  ;;  %7883 = vrcp.f32 %v3383_v54  ;;  %v3388_v14 = vadd.f32 1.0, %v7862_v57  ;;  %v11253_v45 = vadd.f32 %v10939_v4, %v11831_v16  ;;  %v5833_v54 = vmul.f32 -1.442695, %v11236_v36 }
 0x2a5   :  { %v7866_v29 = vpop.eup %7865  ;;  %7885 = vrcp.f32 %v3260_v48  ;;  %v3258_v49 = vadd.f32 1.0, %v7864_v24  ;;  %v5961_v48 = vmul.f32 -1.442695, %v11242_v23 }
 0x2a6   :  { %v7868_v56 = vpop.eup %7867  ;;  %7887 = vrcp.f32 %v3388_v14  ;;  %v3386_v6 = vadd.f32 1.0, %v7866_v29 }
 0x2a7   :  { %v7870_v13 = vpop.eup %7869  ;;  %7889 = vrcp.f32 %v3258_v49  ;;  %v3261_v17 = vadd.f32 1.0, %v7868_v56  ;;  %v11833_v56 = vld [vmem:[#allocation18_spill] sm:$0xff] }
 0x2a8   :  { %v7872_v59 = vpop.eup %7871  ;;  %v4024_v40 = vmul.f32 %v7870_v13, %v11073_v11  ;;  %7891 = vrcp.f32 %v3386_v6  ;;  %v11279_v6 = vadd.f32 %v10939_v4, %v11833_v56  ;;  %v5831_v13 = vmul.f32 -1.442695, %v11248_v9 }
 0x2a9   :  { %v7874_v58 = vpop.eup %7873  ;;  %v4152_v38 = vmul.f32 %v7872_v59, %v11077_v62  ;;  %7893 = vrcp.f32 %v3261_v17  ;;  %v5959_v59 = vmul.f32 -1.442695, %v11253_v45 }
 0x2aa   :  { %v7876_v21 = vpop.eup %7875  ;;  %v6336_v7 = vpack.c.bf16 %v4024_v40, %v4024_v40  ;;  %v4022_v11 = vmul.f32 %v7874_v58, %v11081_v1  ;;  %7895 = vpow2.f32 %v5957_v25  ;;  %v11832_v25 = vld [vmem:[#allocation17_spill] sm:$0xff]  ;;  %v5964_v19 = vmul.f32 -1.442695, %v11279_v6 }
 0x2ab   :  { %v7878_v39 = vpop.eup %7877  ;;  %v6464_v2 = vpack.c.bf16 %v4152_v38, %v4152_v38  ;;  %v4150_v62 = vmul.f32 %v7876_v21, %v11085_v52  ;;  %7897 = vpow2.f32 %v5827_v33  ;;  %v11270_v29 = vadd.f32 %v10939_v4, %v11832_v25 }
 0x2ac   :  { %v7880_v20 = vpop.eup %7879  ;;  %5305 = vst.msk [vmem:[%s11613_s3 + $0x1a8] sm:$0xf] %vm5198_vm3, %v6336_v7  ;;  %v6334_v57 = vpack.c.bf16 %v4022_v11, %v4022_v11  ;;  %v4025_v1 = vmul.f32 %v7878_v39, %v11089_v22  ;;  %7899 = vpow2.f32 %v5955_v44 }
 0x2ad   :  { %v7882_v24 = vpop.eup %7881  ;;  %5433 = vst.msk [vmem:[%s11613_s3 + $0x3a8] sm:$0xf] %vm5198_vm3, %v6464_v2  ;;  %v6462_v52 = vpack.c.bf16 %v4150_v62, %v4150_v62  ;;  %v4153_v14 = vmul.f32 %v7880_v20, %v11093_v32  ;;  %7901 = vpow2.f32 %v5832_v34  ;;  %v5836_v58 = vmul.f32 -1.442695, %v11270_v29 }
 0x2ae   :  { %v7884_v49 = vpop.eup %7883  ;;  %5303 = vst.msk [vmem:[%s11613_s3 + $0x1a0] sm:$0xf] %vm5198_vm3, %v6334_v57  ;;  %v6337_v22 = vpack.c.bf16 %v4025_v1, %v4025_v1  ;;  %v4023_v33 = vmul.f32 %v7882_v24, %v11097_v28  ;;  %7903 = vpow2.f32 %v5960_v46 }
 0x2af   :  { %v7886_v32 = vpop.eup %7885  ;;  %5431 = vst.msk [vmem:[%s11613_s3 + $0x3a0] sm:$0xf] %vm5198_vm3, %v6462_v52  ;;  %v6465_v44 = vpack.c.bf16 %v4153_v14, %v4153_v14  ;;  %v4151_v34 = vmul.f32 %v7884_v49, %v11102_v42  ;;  %7905 = vpow2.f32 %v5830_v18 }
 0x2b0   :  { %v7888_v17 = vpop.eup %7887  ;;  %5306 = vst.msk [vmem:[%s11613_s3 + $0x1ac] sm:$0xf] %vm5198_vm3, %v6337_v22  ;;  %v6335_v28 = vpack.c.bf16 %v4023_v33, %v4023_v33  ;;  %v4028_v46 = vmul.f32 %v7886_v32, %v11115_v61  ;;  %7907 = vpow2.f32 %v5958_v43  ;;  %v11834_v33 = vld [vmem:[#allocation19_spill] sm:$0xff] }
 0x2b1   :  { %v7890_v40 = vpop.eup %7889  ;;  %5434 = vst.msk [vmem:[%s11613_s3 + $0x3ac] sm:$0xf] %vm5198_vm3, %v6465_v44  ;;  %v6463_v42 = vpack.c.bf16 %v4151_v34, %v4151_v34  ;;  %v4156_v18 = vmul.f32 %v7888_v17, %v11120_v30  ;;  %7909 = vpow2.f32 %v5833_v54  ;;  %v11333_v56 = vadd.f32 %v10939_v4, %v11834_v33  ;;  %v11835_v34 = vld [vmem:[#allocation20_spill] sm:$0xff]  ;;  %v11836_v17 = vld [vmem:[#allocation21_spill] sm:$0xff] }
 0x2b2   :  { %v7892_v38 = vpop.eup %7891  ;;  %5304 = vst.msk [vmem:[%s11613_s3 + $0x1a4] sm:$0xf] %vm5198_vm3, %v6335_v28  ;;  %v6340_v61 = vpack.c.bf16 %v4028_v46, %v4028_v46  ;;  %v4026_v43 = vmul.f32 %v7890_v40, %v11125_v0  ;;  %7911 = vpow2.f32 %v5961_v48  ;;  %v11341_v28 = vadd.f32 %v10939_v4, %v11836_v17  ;;  %v11837_v40 = vld [vmem:[#allocation22_spill] sm:$0xff] }
 0x2b3   :  { %v7894_v21 = vpop.eup %7893  ;;  %5432 = vst.msk [vmem:[%s11613_s3 + $0x3a4] sm:$0xf] %vm5198_vm3, %v6463_v42  ;;  %v6468_v30 = vpack.c.bf16 %v4156_v18, %v4156_v18  ;;  %v4154_v7 = vmul.f32 %v7892_v38, %v11134_v41  ;;  %7913 = vpow2.f32 %v5831_v13  ;;  %v11337_v13 = vadd.f32 %v10939_v4, %v11835_v34 }
 0x2b4   :  { %v7896_v11 = vpop.eup %7895  ;;  %5309 = vst.msk [vmem:[%s11613_s3 + $0x1b8] sm:$0xf] %vm5198_vm3, %v6340_v61  ;;  %v6338_v0 = vpack.c.bf16 %v4026_v43, %v4026_v43  ;;  %v4029_v16 = vmul.f32 %v7894_v21, %v11149_v35  ;;  %7915 = vpow2.f32 %v5959_v59  ;;  %v11345_v42 = vadd.f32 %v10939_v4, %v11837_v40 }
 0x2b5   :  { %v7898_v39 = vpop.eup %7897  ;;  %5437 = vst.msk [vmem:[%s11613_s3 + $0x3b8] sm:$0xf] %vm5198_vm3, %v6468_v30  ;;  %v6466_v2 = vpack.c.bf16 %v4154_v7, %v4154_v7  ;;  %v3389_v62 = vadd.f32 1.0, %v7896_v11  ;;  %7917 = vpow2.f32 %v5836_v58  ;;  %v11349_v18 = vadd.f32 %v10939_v4, %v10696_v26  ;;  %v11838_v7 = vld [vmem:[#allocation23_spill] sm:$0xff] }
 0x2b6   :  { %v7900_v41 = vpop.eup %7899  ;;  %5307 = vst.msk [vmem:[%s11613_s3 + $0x1b0] sm:$0xf] %vm5198_vm3, %v6338_v0  ;;  %v6341_v54 = vpack.c.bf16 %v4029_v16, %v4029_v16  ;;  %v3259_v20 = vadd.f32 1.0, %v7898_v39  ;;  %7919 = vpow2.f32 %v5964_v19  ;;  %v11353_v61 = vadd.f32 %v10939_v4, %v10698_v51 }
 0x2b7   :  { %v7902_v35 = vpop.eup %7901  ;;  %5435 = vst.msk [vmem:[%s11613_s3 + $0x3b0] sm:$0xf] %vm5198_vm3, %v6466_v2  ;;  %7921 = vrcp.f32 %v3389_v62  ;;  %v3387_v57 = vadd.f32 1.0, %v7900_v41  ;;  %v11357_v43 = vadd.f32 %v10939_v4, %v10742_v10  ;;  %v5834_v30 = vmul.f32 -1.442695, %v11333_v56 }
 0x2b8   :  { %v7904_v1 = vpop.eup %7903  ;;  %5310 = vst.msk [vmem:[%s11613_s3 + $0x1bc] sm:$0xf] %vm5198_vm3, %v6341_v54  ;;  %7923 = vrcp.f32 %v3259_v20  ;;  %v3264_v48 = vadd.f32 1.0, %v7902_v35  ;;  %v11362_v26 = vadd.f32 %v10939_v4, %v11838_v7  ;;  %v5962_v16 = vmul.f32 -1.442695, %v11337_v13  ;;  %v11843_v7 = vld [vmem:[#allocation25_spill] sm:$0xff] }
 0x2b9   :  { %v7906_v24 = vpop.eup %7905  ;;  %7925 = vrcp.f32 %v3387_v57  ;;  %v3392_v52 = vadd.f32 1.0, %v7904_v1  ;;  %v5837_v51 = vmul.f32 -1.442695, %v11341_v28  ;;  %v5965_v2 = vmul.f32 -1.442695, %v11345_v42 }
 0x2ba   :  { %v7908_v14 = vpop.eup %7907  ;;  %7927 = vrcp.f32 %v3264_v48  ;;  %v3262_v25 = vadd.f32 1.0, %v7906_v24  ;;  %v5835_v62 = vmul.f32 -1.442695, %v11349_v18  ;;  %v5963_v20 = vmul.f32 -1.442695, %v11353_v61  ;;  %v11839_v24 = vld [vmem:[#allocation24_spill] sm:$0xff] }
 0x2bb   :  { %v7910_v49 = vpop.eup %7909  ;;  %7929 = vrcp.f32 %v3392_v52  ;;  %v3390_v22 = vadd.f32 1.0, %v7908_v14  ;;  %v5840_v35 = vmul.f32 -1.442695, %v11357_v43  ;;  %v5968_v48 = vmul.f32 -1.442695, %v11362_v26 }
 0x2bc   :  { %v7912_v32 = vpop.eup %7911  ;;  %7931 = vrcp.f32 %v3262_v25  ;;  %v3265_v44 = vadd.f32 1.0, %v7910_v49  ;;  %v11375_v52 = vadd.f32 %v10939_v4, %v11839_v24 }
 0x2bd   :  { %v7914_v46 = vpop.eup %7913  ;;  %7933 = vrcp.f32 %v3390_v22  ;;  %v3393_v59 = vadd.f32 1.0, %v7912_v32 }
 0x2be   :  { %v7916_v58 = vpop.eup %7915  ;;  %7935 = vrcp.f32 %v3265_v44  ;;  %v3263_v38 = vadd.f32 1.0, %v7914_v46  ;;  %v11841_v44 = vld [vmem:[#allocation2_spill] sm:$0xff] }
 0x2bf   :  { %v7918_v19 = vpop.eup %7917  ;;  %7937 = vrcp.f32 %v3393_v59  ;;  %v3391_v21 = vadd.f32 1.0, %v7916_v58  ;;  %v11385_v34 = vadd.f32 %v10939_v4, %v11841_v44  ;;  %v11842_v59 = vld [vmem:[#allocation3_spill] sm:$0xff] }
 0x2c0   :  { %v7920_v11 = vpop.eup %7919  ;;  %7939 = vrcp.f32 %v3263_v38  ;;  %v3268_v0 = vadd.f32 1.0, %v7918_v19  ;;  %v11394_v40 = vadd.f32 %v10939_v4, %v11842_v59  ;;  %v5838_v19 = vmul.f32 -1.442695, %v11375_v52 }
 0x2c1   :  { %v7922_v39 = vpop.eup %7921  ;;  %7941 = vrcp.f32 %v3391_v21  ;;  %v3396_v10 = vadd.f32 1.0, %v7920_v11  ;;  %v11409_v11 = vadd.f32 %v10939_v4, %v11843_v7 }
 0x2c2   :  { %v7924_v41 = vpop.eup %7923  ;;  %v4157_v54 = vmul.f32 %v7922_v39, %v11203_v63  ;;  %7943 = vrcp.f32 %v3268_v0  ;;  %v11840_v63 = vld [vmem:[#allocation45_spill] sm:$0xff] }
 0x2c3   :  { %v7926_v57 = vpop.eup %7925  ;;  %v4027_v1 = vmul.f32 %v7924_v41, %v11207_v53  ;;  %7945 = vrcp.f32 %v3396_v10  ;;  %v11380_v22 = vadd.f32 %v10939_v4, %v11840_v63  ;;  %v5841_v10 = vmul.f32 -1.442695, %v11385_v34 }
 0x2c4   :  { %v7928_v14 = vpop.eup %7927  ;;  %v6469_v25 = vpack.c.bf16 %v4157_v54, %v4157_v54  ;;  %v4155_v49 = vmul.f32 %v7926_v57, %v11211_v60  ;;  %7947 = vpow2.f32 %v5834_v30  ;;  %v5969_v41 = vmul.f32 -1.442695, %v11394_v40 }
 0x2c5   :  { %v7930_v33 = vpop.eup %7929  ;;  %v6339_v32 = vpack.c.bf16 %v4027_v1, %v4027_v1  ;;  %v4032_v53 = vmul.f32 %v7928_v14, %v11215_v3  ;;  %7949 = vpow2.f32 %v5962_v16 }
 0x2c6   :  { %v7932_v17 = vpop.eup %7931  ;;  %5438 = vst.msk [vmem:[%s11613_s3 + $0x3bc] sm:$0xf] %vm5198_vm3, %v6469_v25  ;;  %v6467_v60 = vpack.c.bf16 %v4155_v49, %v4155_v49  ;;  %v4160_v46 = vmul.f32 %v7930_v33, %v11219_v47  ;;  %7951 = vpow2.f32 %v5837_v51  ;;  %v5966_v51 = vmul.f32 -1.442695, %v11380_v22 }
 0x2c7   :  { %v7934_v3 = vpop.eup %7933  ;;  %5308 = vst.msk [vmem:[%s11613_s3 + $0x1b4] sm:$0xf] %vm5198_vm3, %v6339_v32  ;;  %v6344_v58 = vpack.c.bf16 %v4032_v53, %v4032_v53  ;;  %v4030_v38 = vmul.f32 %v7932_v17, %v11224_v31  ;;  %7953 = vpow2.f32 %v5965_v2 }
 0x2c8   :  { %v7936_v21 = vpop.eup %7935  ;;  %5436 = vst.msk [vmem:[%s11613_s3 + $0x3b4] sm:$0xf] %vm5198_vm3, %v6467_v60  ;;  %v6472_v47 = vpack.c.bf16 %v4160_v46, %v4160_v46  ;;  %v4158_v30 = vmul.f32 %v7934_v3, %v11229_v5  ;;  %7955 = vpow2.f32 %v5835_v62 }
 0x2c9   :  { %v7938_v0 = vpop.eup %7937  ;;  %5313 = vst.msk [vmem:[%s11613_s3 + $0x1c8] sm:$0xf] %vm5198_vm3, %v6344_v58  ;;  %v6342_v31 = vpack.c.bf16 %v4030_v38, %v4030_v38  ;;  %v4033_v16 = vmul.f32 %v7936_v21, %v11236_v36  ;;  %7957 = vpow2.f32 %v5963_v20  ;;  %v8039_v21 = vld [vmem:[%s11612_s2] ss:$0 sm:$0xff] }
 0x2ca   :  { %v7940_v39 = vpop.eup %7939  ;;  %5441 = vst.msk [vmem:[%s11613_s3 + $0x3c8] sm:$0xf] %vm5198_vm3, %v6472_v47  ;;  %v6470_v4 = vpack.c.bf16 %v4158_v30, %v4158_v30  ;;  %v4161_v5 = vmul.f32 %v7938_v0, %v11242_v23  ;;  %7959 = vpow2.f32 %v5840_v35  ;;  %v5839_v35 = vmul.f32 -1.442695, %v11409_v11  ;;  %v11844_v47 = vld [vmem:[#allocation26_spill] sm:$0xff] }
 0x2cb   :  { %v7942_v2 = vpop.eup %7941  ;;  %5311 = vst.msk [vmem:[%s11613_s3 + $0x1c0] sm:$0xf] %vm5198_vm3, %v6342_v31  ;;  %v6345_v36 = vpack.c.bf16 %v4033_v16, %v4033_v16  ;;  %v4031_v62 = vmul.f32 %v7940_v39, %v11248_v9  ;;  %7961 = vpow2.f32 %v5968_v48  ;;  %v11465_v30 = vadd.f32 %v8039_v21, %v11844_v47 }
 0x2cc   :  { %v7944_v54 = vpop.eup %7943  ;;  %5439 = vst.msk [vmem:[%s11613_s3 + $0x3c0] sm:$0xf] %vm5198_vm3, %v6470_v4  ;;  %v6473_v23 = vpack.c.bf16 %v4161_v5, %v4161_v5  ;;  %v4159_v20 = vmul.f32 %v7942_v2, %v11253_v45  ;;  %7963 = vpow2.f32 %v5838_v19  ;;  %v11468_v7 = vadd.f32 %v8039_v21, %v10852_v55 }
 0x2cd   :  { %v7946_v57 = vpop.eup %7945  ;;  %5314 = vst.msk [vmem:[%s11613_s3 + $0x1cc] sm:$0xf] %vm5198_vm3, %v6345_v36  ;;  %v6343_v9 = vpack.c.bf16 %v4031_v62, %v4031_v62  ;;  %v4036_v1 = vmul.f32 %v7944_v54, %v11270_v29  ;;  %7965 = vpow2.f32 %v5966_v51  ;;  %v11471_v16 = vadd.f32 %v8039_v21, %v10854_v8 }
 0x2ce   :  { %v7948_v48 = vpop.eup %7947  ;;  %5442 = vst.msk [vmem:[%s11613_s3 + $0x3cc] sm:$0xf] %vm5198_vm3, %v6473_v23  ;;  %v6471_v45 = vpack.c.bf16 %v4159_v20, %v4159_v20  ;;  %v4164_v24 = vmul.f32 %v7946_v57, %v11279_v6  ;;  %7967 = vpow2.f32 %v5841_v10  ;;  %v11474_v4 = vadd.f32 %v8039_v21, %v10865_v50 }
 0x2cf   :  { %v7950_v14 = vpop.eup %7949  ;;  %5312 = vst.msk [vmem:[%s11613_s3 + $0x1c4] sm:$0xf] %vm5198_vm3, %v6343_v9  ;;  %v6348_v25 = vpack.c.bf16 %v4036_v1, %v4036_v1  ;;  %v3266_v49 = vadd.f32 1.0, %v7948_v48  ;;  %7969 = vpow2.f32 %v5969_v41  ;;  %v11477_v2 = vadd.f32 %v8039_v21, %v10867_v37 }
 0x2d0   :  { %v7952_v29 = vpop.eup %7951  ;;  %5440 = vst.msk [vmem:[%s11613_s3 + $0x3c4] sm:$0xf] %vm5198_vm3, %v6471_v45  ;;  %v6476_v63 = vpack.c.bf16 %v4164_v24, %v4164_v24  ;;  %v3394_v33 = vadd.f32 1.0, %v7950_v14  ;;  %7971 = vpow2.f32 %v5839_v35  ;;  %v5967_v62 = vmul.f32 -1.442695, %v11465_v30 }
 0x2d1   :  { %v7954_v6 = vpop.eup %7953  ;;  %5317 = vst.msk [vmem:[%s11613_s3 + $0x1d8] sm:$0xf] %vm5198_vm3, %v6348_v25  ;;  %7973 = vrcp.f32 %v3266_v49  ;;  %v3269_v32 = vadd.f32 1.0, %v7952_v29  ;;  %v5844_v8 = vmul.f32 -1.442695, %v11468_v7  ;;  %v11483_v50 = vadd.f32 %v8039_v21, %v10878_v27 }
 0x2d2   :  { %v7956_v53 = vpop.eup %7955  ;;  %5445 = vst.msk [vmem:[%s11613_s3 + $0x3d8] sm:$0xf] %vm5198_vm3, %v6476_v63  ;;  %7975 = vrcp.f32 %v3394_v33  ;;  %v3397_v44 = vadd.f32 1.0, %v7954_v6  ;;  %v5972_v23 = vmul.f32 -1.442695, %v11471_v16  ;;  %v11488_v57 = vadd.f32 %v8039_v21, %v10880_v15 }
 0x2d3   :  { %v7958_v17 = vpop.eup %7957  ;;  %7977 = vrcp.f32 %v3269_v32  ;;  %v3267_v60 = vadd.f32 1.0, %v7956_v53  ;;  %v5842_v37 = vmul.f32 -1.442695, %v11474_v4  ;;  %v5970_v48 = vmul.f32 -1.442695, %v11477_v2 }
 0x2d4   :  { %v7960_v46 = vpop.eup %7959  ;;  %7979 = vrcp.f32 %v3397_v44  ;;  %v3395_v59 = vadd.f32 1.0, %v7958_v17  ;;  %v11493_v45 = vadd.f32 %v8039_v21, %v10888_v12  ;;  %v5973_v33 = vmul.f32 -1.442695, %v11488_v57 }
 0x2d5   :  { %v7962_v3 = vpop.eup %7961  ;;  %7981 = vrcp.f32 %v3267_v60  ;;  %v3272_v58 = vadd.f32 1.0, %v7960_v46 }
 0x2d6   :  { %v7964_v38 = vpop.eup %7963  ;;  %7983 = vrcp.f32 %v3395_v59  ;;  %v3400_v19 = vadd.f32 1.0, %v7962_v3  ;;  %v5843_v53 = vmul.f32 -1.442695, %v11493_v45 }
 0x2d7   :  { %v7966_v0 = vpop.eup %7965  ;;  %7985 = vrcp.f32 %v3272_v58  ;;  %v3270_v31 = vadd.f32 1.0, %v7964_v38 }
 0x2d8   :  { %v7968_v51 = vpop.eup %7967  ;;  %7987 = vrcp.f32 %v3400_v19  ;;  %v3398_v39 = vadd.f32 1.0, %v7966_v0 }
 0x2d9   :  { %v7970_v5 = vpop.eup %7969  ;;  %7989 = vrcp.f32 %v3270_v31  ;;  %v3273_v10 = vadd.f32 1.0, %v7968_v51 }
 0x2da   :  { %v7972_v55 = vpop.eup %7971  ;;  %7991 = vrcp.f32 %v3398_v39  ;;  %v3401_v36 = vadd.f32 1.0, %v7970_v5 }
 0x2db   :  { %v7974_v41 = vpop.eup %7973  ;;  %7993 = vrcp.f32 %v3273_v10  ;;  %v3271_v54 = vadd.f32 1.0, %v7972_v55 }
 0x2dc   :  { %v7976_v20 = vpop.eup %7975  ;;  %v4034_v35 = vmul.f32 %v7974_v41, %v11333_v56  ;;  %7995 = vrcp.f32 %v3401_v36  ;;  %v11845_v56 = vld [vmem:[#allocation27_spill] sm:$0xff] }
 0x2dd   :  { %v7978_v9 = vpop.eup %7977  ;;  %v4162_v1 = vmul.f32 %v7976_v20, %v11337_v13  ;;  %7997 = vrcp.f32 %v3271_v54  ;;  %v11497_v25 = vadd.f32 %v8039_v21, %v11845_v56  ;;  %v5845_v13 = vmul.f32 -1.442695, %v11483_v50 }
 0x2de   :  { %v7980_v27 = vpop.eup %7979  ;;  %v6346_v24 = vpack.c.bf16 %v4034_v35, %v4034_v35  ;;  %v4037_v14 = vmul.f32 %v7978_v9, %v11341_v28  ;;  %7999 = vpow2.f32 %v5967_v62 }
 0x2df   :  { %v7982_v49 = vpop.eup %7981  ;;  %v6474_v15 = vpack.c.bf16 %v4162_v1, %v4162_v1  ;;  %v4165_v29 = vmul.f32 %v7980_v27, %v11345_v42  ;;  %8001 = vpow2.f32 %v5844_v8  ;;  %v5971_v60 = vmul.f32 -1.442695, %v11497_v25 }
 0x2e0   :  { %v7984_v63 = vpop.eup %7983  ;;  %5315 = vst.msk [vmem:[%s11613_s3 + $0x1d0] sm:$0xf] %vm5198_vm3, %v6346_v24  ;;  %v6349_v12 = vpack.c.bf16 %v4037_v14, %v4037_v14  ;;  %v4035_v28 = vmul.f32 %v7982_v49, %v11349_v18  ;;  %8003 = vpow2.f32 %v5972_v23 }
 0x2e1   :  { %v7986_v6 = vpop.eup %7985  ;;  %5443 = vst.msk [vmem:[%s11613_s3 + $0x3d0] sm:$0xf] %vm5198_vm3, %v6474_v15  ;;  %v6477_v42 = vpack.c.bf16 %v4165_v29, %v4165_v29  ;;  %v4163_v32 = vmul.f32 %v7984_v63, %v11353_v61  ;;  %8005 = vpow2.f32 %v5842_v37 }
 0x2e2   :  { %v7988_v44 = vpop.eup %7987  ;;  %5318 = vst.msk [vmem:[%s11613_s3 + $0x1dc] sm:$0xf] %vm5198_vm3, %v6349_v12  ;;  %v6347_v18 = vpack.c.bf16 %v4035_v28, %v4035_v28  ;;  %v4040_v17 = vmul.f32 %v7986_v6, %v11357_v43  ;;  %8007 = vpow2.f32 %v5970_v48 }
 0x2e3   :  { %v7990_v46 = vpop.eup %7989  ;;  %5446 = vst.msk [vmem:[%s11613_s3 + $0x3dc] sm:$0xf] %vm5198_vm3, %v6477_v42  ;;  %v6475_v61 = vpack.c.bf16 %v4163_v32, %v4163_v32  ;;  %v4168_v59 = vmul.f32 %v7988_v44, %v11362_v26  ;;  %8009 = vpow2.f32 %v5845_v13 }
 0x2e4   :  { %v7992_v3 = vpop.eup %7991  ;;  %5316 = vst.msk [vmem:[%s11613_s3 + $0x1d4] sm:$0xf] %vm5198_vm3, %v6347_v18  ;;  %v6352_v43 = vpack.c.bf16 %v4040_v17, %v4040_v17  ;;  %v4038_v58 = vmul.f32 %v7990_v46, %v11375_v52  ;;  %8011 = vpow2.f32 %v5973_v33 }
 0x2e5   :  { %v7994_v38 = vpop.eup %7993  ;;  %5444 = vst.msk [vmem:[%s11613_s3 + $0x3d4] sm:$0xf] %vm5198_vm3, %v6475_v61  ;;  %v6480_v19 = vpack.c.bf16 %v4168_v59, %v4168_v59  ;;  %v4166_v26 = vmul.f32 %v7992_v3, %v11380_v22  ;;  %8013 = vpow2.f32 %v5843_v53 }
 0x2e6   :  { %v7996_v21 = vpop.eup %7995  ;;  %5321 = vst.msk [vmem:[%s11613_s3 + $0x1e8] sm:$0xf] %vm5198_vm3, %v6352_v43  ;;  %v6350_v47 = vpack.c.bf16 %v4038_v58, %v4038_v58  ;;  %v4041_v52 = vmul.f32 %v7994_v38, %v11385_v34  ;;  %8015 = vpow2.f32 %v5971_v60 }
 0x2e7   :  { %v7998_v0 = vpop.eup %7997  ;;  %5449 = vst.msk [vmem:[%s11613_s3 + $0x3e8] sm:$0xf] %vm5198_vm3, %v6480_v19  ;;  %v6478_v31 = vpack.c.bf16 %v4166_v26, %v4166_v26  ;;  %v4169_v22 = vmul.f32 %v7996_v21, %v11394_v40 }
 0x2e8   :  { %v8000_v51 = vpop.eup %7999  ;;  %5319 = vst.msk [vmem:[%s11613_s3 + $0x1e0] sm:$0xf] %vm5198_vm3, %v6350_v47  ;;  %v6353_v39 = vpack.c.bf16 %v4041_v52, %v4041_v52  ;;  %v4039_v5 = vmul.f32 %v7998_v0, %v11409_v11 }
 0x2e9   :  { %v8002_v34 = vpop.eup %8001  ;;  %5447 = vst.msk [vmem:[%s11613_s3 + $0x3e0] sm:$0xf] %vm5198_vm3, %v6478_v31  ;;  %v6481_v10 = vpack.c.bf16 %v4169_v22, %v4169_v22  ;;  %v3399_v55 = vadd.f32 1.0, %v8000_v51 }
 0x2ea   :  { %v8004_v36 = vpop.eup %8003  ;;  %5322 = vst.msk [vmem:[%s11613_s3 + $0x1ec] sm:$0xf] %vm5198_vm3, %v6353_v39  ;;  %v6351_v40 = vpack.c.bf16 %v4039_v5, %v4039_v5  ;;  %v3276_v62 = vadd.f32 1.0, %v8002_v34 }
 0x2eb   :  { %v8006_v8 = vpop.eup %8005  ;;  %5450 = vst.msk [vmem:[%s11613_s3 + $0x3ec] sm:$0xf] %vm5198_vm3, %v6481_v10  ;;  %8017 = vrcp.f32 %v3399_v55  ;;  %v3404_v11 = vadd.f32 1.0, %v8004_v36 }
 0x2ec   :  { %v8008_v41 = vpop.eup %8007  ;;  %5320 = vst.msk [vmem:[%s11613_s3 + $0x1e4] sm:$0xf] %vm5198_vm3, %v6351_v40  ;;  %8019 = vrcp.f32 %v3276_v62  ;;  %v3274_v54 = vadd.f32 1.0, %v8006_v8 }
 0x2ed   :  { %v8010_v23 = vpop.eup %8009  ;;  %8021 = vrcp.f32 %v3404_v11  ;;  %v3402_v20 = vadd.f32 1.0, %v8008_v41 }
 0x2ee   :  { %v8012_v35 = vpop.eup %8011  ;;  %8023 = vrcp.f32 %v3274_v54  ;;  %v3277_v37 = vadd.f32 1.0, %v8010_v23 }
 0x2ef   :  { %v8014_v9 = vpop.eup %8013  ;;  %8025 = vrcp.f32 %v3402_v20  ;;  %v3405_v1 = vadd.f32 1.0, %v8012_v35 }
 0x2f0   :  { %v8016_v48 = vpop.eup %8015  ;;  %8027 = vrcp.f32 %v3277_v37  ;;  %v3275_v27 = vadd.f32 1.0, %v8014_v9 }
 0x2f1   :  { %8029 = vrcp.f32 %v3405_v1  ;;  %v3403_v24 = vadd.f32 1.0, %v8016_v48 }
 0x2f2   :  { %8031 = vrcp.f32 %v3275_v27 }
 0x2f3   :  { %8033 = vrcp.f32 %v3403_v24 }
 0x2f5   :  { %v8018_v14 = vpop.eup %8017 }
 0x2f6   :  { %v8020_v56 = vpop.eup %8019  ;;  %v4167_v49 = vmul.f32 %v8018_v14, %v11465_v30 }
 0x2f7   :  { %v8022_v15 = vpop.eup %8021  ;;  %v4044_v29 = vmul.f32 %v8020_v56, %v11468_v7 }
 0x2f8   :  { %v8024_v13 = vpop.eup %8023  ;;  %v6479_v63 = vpack.c.bf16 %v4167_v49, %v4167_v49  ;;  %v4172_v12 = vmul.f32 %v8022_v15, %v11471_v16 }
 0x2f9   :  { %v8026_v28 = vpop.eup %8025  ;;  %v6356_v33 = vpack.c.bf16 %v4044_v29, %v4044_v29  ;;  %v4042_v6 = vmul.f32 %v8024_v13, %v11474_v4 }
 0x2fa   :  { %v8028_v42 = vpop.eup %8027  ;;  %5448 = vst.msk [vmem:[%s11613_s3 + $0x3e4] sm:$0xf] %vm5198_vm3, %v6479_v63  ;;  %v6484_v32 = vpack.c.bf16 %v4172_v12, %v4172_v12  ;;  %v4170_v30 = vmul.f32 %v8026_v28, %v11477_v2 }
 0x2fb   :  { %v8030_v53 = vpop.eup %8029  ;;  %5325 = vst.msk [vmem:[%s11613_s3 + $0x1f8] sm:$0xf] %vm5198_vm3, %v6356_v33  ;;  %v6354_v7 = vpack.c.bf16 %v4042_v6, %v4042_v6  ;;  %v4045_v16 = vmul.f32 %v8028_v42, %v11483_v50 }
 0x2fc   :  { %v8032_v44 = vpop.eup %8031  ;;  %5453 = vst.msk [vmem:[%s11613_s3 + $0x3f8] sm:$0xf] %vm5198_vm3, %v6484_v32  ;;  %v6482_v4 = vpack.c.bf16 %v4170_v30, %v4170_v30  ;;  %v4173_v18 = vmul.f32 %v8030_v53, %v11488_v57 }
 0x2fd   :  { %v8034_v17 = vpop.eup %8033  ;;  %5323 = vst.msk [vmem:[%s11613_s3 + $0x1f0] sm:$0xf] %vm5198_vm3, %v6354_v7  ;;  %v6357_v2 = vpack.c.bf16 %v4045_v16, %v4045_v16  ;;  %v4043_v60 = vmul.f32 %v8032_v44, %v11493_v45 }
 0x2fe   :  { %5451 = vst.msk [vmem:[%s11613_s3 + $0x3f0] sm:$0xf] %vm5198_vm3, %v6482_v4  ;;  %v6485_v50 = vpack.c.bf16 %v4173_v18, %v4173_v18  ;;  %v4171_v46 = vmul.f32 %v8034_v17, %v11497_v25 }
 0x2ff   :  { %5326 = vst.msk [vmem:[%s11613_s3 + $0x1fc] sm:$0xf] %vm5198_vm3, %v6357_v2  ;;  %v6355_v57 = vpack.c.bf16 %v4043_v60, %v4043_v60 }
 0x300   :  { %5454 = vst.msk [vmem:[%s11613_s3 + $0x3fc] sm:$0xf] %vm5198_vm3, %v6485_v50  ;;  %v6483_v45 = vpack.c.bf16 %v4171_v46, %v4171_v46 }
 0x301   :  { %5324 = vst.msk [vmem:[%s11613_s3 + $0x1f4] sm:$0xf] %vm5198_vm3, %v6355_v57 }
 0x302   :  { %5452 = vst.msk [vmem:[%s11613_s3 + $0x3f4] sm:$0xf] %vm5198_vm3, %v6483_v45 }

</bundles_post_ra>
